<compile_context>
chip_gen: v6e
topology: v6e:2x2x1
jax: 0.10.0
libtpu: 0.0.40
codegen_flags: <defaults>
</compile_context>

<pallas_src>
import jax
import jax.numpy as jnp
from jax.experimental import pallas as pl
from jax.experimental.pallas import tpu as pltpu


def _scatter_add_kernel(idx_ref, val_ref, out_ref, rows_ref):
    # idx_ref : (1, tile)  int32   lane-dense index tile
    # val_ref : (tile, D)  float32 value tile
    # out_ref : (K, D)     float32 per-core partial (resident accumulator)
    # rows_ref: (K, tile)  int32   cached row-id iota
    i = pl.program_id(1)

    @pl.when(i == 0)
    def _():
        out_ref[...] = jnp.zeros_like(out_ref)
        rows_ref[...] = jax.lax.broadcasted_iota(jnp.int32, rows_ref.shape, 0)

    # one-hot: onehot[k, t] = (idx[t] == k), shape (K, tile), fully lane-dense.
    onehot = (rows_ref[...] == idx_ref[...]).astype(jnp.float32)

    # scatter-add via MXU: partial[K, D] += onehot[K, tile] @ vals[tile, D]
    out_ref[...] += jax.lax.dot_general(
        onehot, val_ref[...],
        dimension_numbers=(((1,), (0,)), ((), ())),
        preferred_element_type=jnp.float32)


def index_put_accumulate(base, indices, values, *, tile=8192, num_splits=2):
    """out = base + scatter_add(indices, values), matching
    aten.index_put(base, [indices], values, accumulate=True)."""
    K, D = base.shape

    # Flatten; PyTorch indices are int64, TPU wants int32 (row ids < K).
    idx_flat = indices.reshape(-1).astype(jnp.int32)
    # Normalize negative indices (PyTorch allows idx in [-K, K)).
    idx_flat = jnp.where(idx_flat < 0, idx_flat + K, idx_flat)
    val_flat = values.reshape(-1, D).astype(jnp.float32)
    n = idx_flat.shape[0]

    # Pad to a multiple of tile * num_splits.  Sentinel index K matches no
    # one-hot row; padded values are zero anyway.
    chunk = tile * num_splits
    n_pad = (-n) % chunk
    if n_pad:
        idx_flat = jnp.concatenate(
            [idx_flat, jnp.full((n_pad,), K, dtype=jnp.int32)])
        val_flat = jnp.concatenate(
            [val_flat, jnp.zeros((n_pad, D), dtype=jnp.float32)])
    n_total = n + n_pad
    steps = n_total // chunk

    # Lane-dense index layout: a single (1, N) row.
    idx_2d = idx_flat.reshape(1, n_total)

    partials = pl.pallas_call(
        _scatter_add_kernel,
        out_shape=jax.ShapeDtypeStruct((num_splits, K, D), jnp.float32),
        grid_spec=pltpu.PrefetchScalarGridSpec(
            num_scalar_prefetch=0,
            grid=(num_splits, steps),
            in_specs=[
                # indices: (1, tile) lane-dense block
                pl.BlockSpec((1, tile), lambda c, i: (0, c * steps + i)),
                # values: (tile, D) block
                pl.BlockSpec((tile, D), lambda c, i: (c * steps + i, 0)),
            ],
            # per-core partial, resident across the reduction axis
            out_specs=pl.BlockSpec((None, K, D), lambda c, i: (c, 0, 0)),
            scratch_shapes=[pltpu.VMEM((K, tile), jnp.int32)],
        ),
        compiler_params=pltpu.CompilerParams(
            dimension_semantics=("parallel", "arbitrary"),
            vmem_limit_bytes=48 * 1024 * 1024),
    )(idx_2d, val_flat)

    # Fold in the base and merge the (tiny) per-core partials.
    return base.astype(jnp.float32) + partials.sum(axis=0)


if __name__ == "__main__":
    key = jax.random.PRNGKey(0)
    k0, k1, k2 = jax.random.split(key, 3)

    # Module shapes: full_4 (32, 8), add_37 (1024, 1024) int64,
    # clone_129 (1024, 1024, 8).  Keep the (32, 8) base; use a smaller
    # spatial grid S (non-divisible by the tile, to exercise tail padding),
    # with some negative indices to exercise normalization.
    K, D = 32, 8
    S = 250
    base = jax.random.normal(k0, (K, D), dtype=jnp.float32)
    indices = jax.random.randint(k1, (S, S), -K, K, dtype=jnp.int32)
    values = jax.random.normal(k2, (S, S, D), dtype=jnp.float32)

    out = index_put_accumulate(base, indices, values)
    out = jax.block_until_ready(out)

    # Reference: jnp scatter-add with the same negative-index normalization.
    idx_norm = jnp.where(indices < 0, indices + K, indices).reshape(-1)
    ref = base.at[idx_norm].add(values.reshape(-1, D))

    assert out.shape == (K, D) and out.dtype == jnp.float32
    assert jnp.allclose(out, ref, atol=1e-3, rtol=1e-3), float(
        jnp.max(jnp.abs(out - ref)))
    print("KERNEL_OK")
</pallas_src>

<mosaic_0001>
module attributes {stable_mosaic.version = 11 : i64} {
  func.func @_scatter_add_kernel(%arg0: i32, %arg1: i32, %arg2: memref<1x8192xi32, #tpu.memory_space<vmem>>, %arg3: memref<8192x8xf32, #tpu.memory_space<vmem>>, %arg4: memref<1x32x8xf32, #tpu.memory_space<vmem>>, %arg5: memref<32x8192xi32, #tpu.memory_space<vmem>>) attributes {dimension_semantics = [#tpu.dimension_semantics<parallel>, #tpu.dimension_semantics<arbitrary>], iteration_bounds = array<i64: 2, 4>, scalar_prefetch = 0 : i64, scratch_operands = 1 : i64, tpu.core_type = #tpu.core_type<tc>, window_params = [{transform_indices = @transform_0, window_bounds = array<i64: 1, 8192>}, {transform_indices = @transform_1, window_bounds = array<i64: 8192, 8>}, {transform_indices = @transform_2, window_bounds = array<i64: 1, 32, 8>}]} {
    %c0_i32 = arith.constant 0 : i32
    %0 = arith.cmpi eq, %arg1, %c0_i32 : i32
    %1 = arith.extui %0 : i1 to i32
    %c0_i32_0 = arith.constant 0 : i32
    %2 = arith.cmpi ne, %1, %c0_i32_0 : i32
    scf.if %2 {
      %cst_12 = arith.constant 0.000000e+00 : f32
      %17 = vector.broadcast %cst_12 : f32 to vector<32x8xf32>
      %c0_13 = arith.constant 0 : index
      %c0_14 = arith.constant 0 : index
      %c0_15 = arith.constant 0 : index
      %18 = vector.load %arg4[%c0_13, %c0_14, %c0_15] : memref<1x32x8xf32, #tpu.memory_space<vmem>>, vector<1x32x8xf32>
      %19 = vector.shape_cast %18 : vector<1x32x8xf32> to vector<32x8xf32>
      %20 = vector.shape_cast %17 : vector<32x8xf32> to vector<1x32x8xf32>
      tpu.vector_store %arg4[%c0_13, %c0_14, %c0_15], %20 {strides = array<i32>} : memref<1x32x8xf32, #tpu.memory_space<vmem>>, vector<1x32x8xf32>,
      %21 = tpu.iota {dimensions = array<i32: 0>} : vector<32x8192xi32>
      %c0_16 = arith.constant 0 : index
      %c0_17 = arith.constant 0 : index
      %22 = vector.load %arg5[%c0_16, %c0_17] : memref<32x8192xi32, #tpu.memory_space<vmem>>, vector<32x8192xi32>
      tpu.vector_store %arg5[%c0_16, %c0_17], %21 {strides = array<i32>} : memref<32x8192xi32, #tpu.memory_space<vmem>>, vector<32x8192xi32>,
    } else {
    }
    %c0 = arith.constant 0 : index
    %c0_1 = arith.constant 0 : index
    %3 = vector.load %arg5[%c0, %c0_1] : memref<32x8192xi32, #tpu.memory_space<vmem>>, vector<32x8192xi32>
    %c0_2 = arith.constant 0 : index
    %c0_3 = arith.constant 0 : index
    %4 = vector.load %arg2[%c0_2, %c0_3] : memref<1x8192xi32, #tpu.memory_space<vmem>>, vector<1x8192xi32>
    %5 = vector.broadcast %4 : vector<1x8192xi32> to vector<32x8192xi32>
    %6 = arith.cmpi eq, %3, %5 : vector<32x8192xi32>
    %7 = arith.extui %6 : vector<32x8192xi1> to vector<32x8192xi32>
    %8 = arith.sitofp %7 : vector<32x8192xi32> to vector<32x8192xf32>
    %c0_4 = arith.constant 0 : index
    %c0_5 = arith.constant 0 : index
    %c0_6 = arith.constant 0 : index
    %9 = vector.load %arg4[%c0_4, %c0_5, %c0_6] : memref<1x32x8xf32, #tpu.memory_space<vmem>>, vector<1x32x8xf32>
    %10 = vector.shape_cast %9 : vector<1x32x8xf32> to vector<32x8xf32>
    %c0_7 = arith.constant 0 : index
    %c0_8 = arith.constant 0 : index
    %11 = vector.load %arg3[%c0_7, %c0_8] : memref<8192x8xf32, #tpu.memory_space<vmem>>, vector<8192x8xf32>
    %cst = arith.constant dense<0.000000e+00> : vector<32x8xf32>
    %12 = tpu.matmul %8, %11, %cst {dimension_numbers = #tpu.dot_dimension_numbers<[1], [0], [0], [1], [0, 0, 1, 1], [], []>} : vector<32x8192xf32>, vector<8192x8xf32>, vector<32x8xf32> -> vector<32x8xf32>
    %13 = arith.addf %10, %12 : vector<32x8xf32>
    %c0_9 = arith.constant 0 : index
    %c0_10 = arith.constant 0 : index
    %c0_11 = arith.constant 0 : index
    %14 = vector.load %arg4[%c0_9, %c0_10, %c0_11] : memref<1x32x8xf32, #tpu.memory_space<vmem>>, vector<1x32x8xf32>
    %15 = vector.shape_cast %14 : vector<1x32x8xf32> to vector<32x8xf32>
    %16 = vector.shape_cast %13 : vector<32x8xf32> to vector<1x32x8xf32>
    tpu.vector_store %arg4[%c0_9, %c0_10, %c0_11], %16 {strides = array<i32>} : memref<1x32x8xf32, #tpu.memory_space<vmem>>, vector<1x32x8xf32>,
    return
  }
  func.func @transform_0(%arg0: i32, %arg1: i32) -> (i32, i32) {
    %c4_i32 = arith.constant 4 : i32
    %0 = arith.muli %arg0, %c4_i32 : i32
    %1 = arith.addi %0, %arg1 : i32
    %c0_i32 = arith.constant 0 : i32
    %c0_i32_0 = arith.constant 0 : i32
    return %c0_i32, %1 : i32, i32
  }
  func.func @transform_1(%arg0: i32, %arg1: i32) -> (i32, i32) {
    %c4_i32 = arith.constant 4 : i32
    %0 = arith.muli %arg0, %c4_i32 : i32
    %1 = arith.addi %0, %arg1 : i32
    %c0_i32 = arith.constant 0 : i32
    %c0_i32_0 = arith.constant 0 : i32
    return %1, %c0_i32 : i32, i32
  }
  func.func @transform_2(%arg0: i32, %arg1: i32) -> (i32, i32, i32) {
    %c0_i32 = arith.constant 0 : i32
    %c0_i32_0 = arith.constant 0 : i32
    %c0_i32_1 = arith.constant 0 : i32
    return %arg0, %c0_i32, %c0_i32_0 : i32, i32, i32
  }
}

</mosaic_0001>

<bundles_post_ra>
// kernel: tpu_custom_call.1
= control target key start
LH: loop header
LB: loop body
LE: loop exit
PB: predicated region body
PF: predicated region fallthrough
CT: control target
= control target key end

     0   :  { %s7634_s9 = smov 0   ;;  %s7636_s10 = smov 0   ;;  %s10221_s0 = inlined_call_operand.vmem [shape: s32[1,65536], index: 0, kind: input, shape index: {}]   ;;  %s10222_s1 = inlined_call_operand.vmem [shape: f32[65536,8], index: 1, kind: input, shape index: {}]   ;;  %s10223_s2 = inlined_call_operand.vmem [shape: f32[2,32,8], index: 2, kind: output, shape index: {}]  }
   0x1   :  { %s7638_s11 = smov 0   ;;  %s7640_s12 = smov 0  }
   0x2   :  { %s7642_s13 = smov 0  }
   0x3 LB: > { %s21_s14 = sadd.s32 1, %s7607_s11  ;;  %s24_s15 = sadd.s32 1, %s7611_s12  ;;  %s7615_s13 = sphi %s7642_s13, %s12_s13   ;;  %s7611_s12 = sphi %s7640_s12, %s10259_s12   ;;  %s7607_s11 = sphi %s7638_s11, %s10258_s11   ;;  %s7603_s10 = sphi %s7636_s10, %s10257_s10   ;;  %s7599_s9 = sphi %s7634_s9, %s10256_s9  }
   0x4   : > { %p22_p0 = scmp.ge.s32.totalorder %s21_s14, 4  ;;  %p5603_p1 = scmp.ge.s32.totalorder %s7615_s13, 1 }
   0x5   : > { %p151_p2 = scmp.lt.s32.totalorder %s7615_s13, 9 }
   0x6   : > { %s10261_s14 = smov (%p22_p0, %s21_s14), 0  ;;  %s10263_s15 = smov (!%p22_p0, %s24_s15), %s7611_s12 }
   0x7   : > { %p152_p3 = pnand %p5603_p1, %p151_p2  ;;  %p26_p4 = scmp.ge.s32.totalorder %s10263_s15, 2 }
   0x9   : > { %s10265_s15 = smov (%p26_p4, %s10263_s15), 0  ;;  %155 = sbr.rel (%p152_p3) target bundleno = 1006 (0x3ee), region = 28 }
   0xe   : > { %s5604_s16 = sshll.u32 %s7603_s10, 2  ;;  %p200_p5 = scmp.lt.s32.totalorder %s7603_s10, 1 }
   0xf   : > { %s182_s17 = sadd.s32 %s7599_s9, %s5604_s16  ;;  %p5611_p8 = scmp.ne.s32.totalorder %s7599_s9, 0 }
  0x10   : > { %s5605_s18 = sshll.u32 %s182_s17, 6  ;;  %s5607_s19 = sshll.u32 %s182_s17, 10 }
  0x11   : > { %p184_p6 = scmp.lt.s32.totalorder %s5605_s18, 511  ;;  %p193_p7 = scmp.lt.s32.totalorder %s5607_s19, 8191 }
  0x12   : > { %s10267_s10 = smov (!%p200_p5, %s7603_s10), 1  ;;  %208 = sbr.rel (%p5611_p8) target bundleno = 155 (0x9b), region = 32 }
  0x13   : > { %s10269_s18 = smov (!%p184_p6, %s5605_s18), 511  ;;  %s10271_s19 = smov (!%p193_p7, %s5607_s19), 8191 }
  0x14   : > { %s7670_s22 = scalar_lea.vmem %s10221_s0, %s10269_s18  ;;  %s6126_s23 = sshll.u32 %s10267_s10, 5 }
  0x15   : > { %s5608_s24 = sshll.u32 %s10271_s19, 3  ;;  %s7675_s27 = scalar_lea.vmem %s10223_s2, %s6126_s23 }
  0x16   : > { %s7680_s30 = scalar_lea.vmem %s10222_s1, %s5608_s24 }
  0x17   : > { %vm209_vm0 = vcmask 64512   ;;  %v214_v0 = vlaneseq  ;;  %v7617_v1 = vmov 0.0  }
  0x18   : > { %210 = vst.msk [vmem:[%s7675_s27] sm:$0xff] %vm209_vm0, %v7617_v1  ;;  %211 = vst.msk [vmem:[%s7675_s27 + $0x8] sm:$0xff] %vm209_vm0, %v7617_v1 }
  0x19   : > { %212 = vst.msk [vmem:[%s7675_s27 + $0x10] sm:$0xff] %vm209_vm0, %v7617_v1  ;;  %213 = vst.msk [vmem:[%s7675_s27 + $0x18] sm:$0xff] %vm209_vm0, %v7617_v1  ;;  %v7687_v2 = vshrl.u32 %v214_v0, 7 }
  0x1b   : > { %219 = vst [vmem:[#allocation2 + $0x2b0] sm:$0xff] %v7687_v2  ;;  %220 = vst [vmem:[#allocation2 + $0x3b0] sm:$0xff] %v7687_v2  ;;  %v7754_v3 = vadd.s32 8, %v7687_v2  ;;  %v7757_v4 = vadd.s32 16, %v7687_v2  ;;  %v7760_v5 = vadd.s32 24, %v7687_v2 }
  0x1c   : > { %221 = vst [vmem:[#allocation2 + $0x4d8] sm:$0xff] %v7687_v2  ;;  %222 = vst [vmem:[#allocation2 + $0x18] sm:$0xff] %v7687_v2 }
  0x1d   : > { %223 = vst [vmem:[#allocation2 + $0x450] sm:$0xff] %v7687_v2  ;;  %224 = vst [vmem:[#allocation2 + $0x768] sm:$0xff] %v7687_v2 }
  0x1e   : > { %225 = vst [vmem:[#allocation2 + $0x330] sm:$0xff] %v7687_v2  ;;  %226 = vst [vmem:[#allocation2 + $0x448] sm:$0xff] %v7687_v2 }
  0x1f   : > { %227 = vst [vmem:[#allocation2 + $0x380] sm:$0xff] %v7687_v2  ;;  %228 = vst [vmem:[#allocation2 + $0x110] sm:$0xff] %v7687_v2 }
  0x20   : > { %229 = vst [vmem:[#allocation2 + $0x518] sm:$0xff] %v7687_v2  ;;  %230 = vst [vmem:[#allocation2 + $0x498] sm:$0xff] %v7687_v2 }
  0x21   : > { %231 = vst [vmem:[#allocation2 + $0x320] sm:$0xff] %v7687_v2  ;;  %232 = vst [vmem:[#allocation2 + $0x550] sm:$0xff] %v7687_v2 }
  0x22   : > { %233 = vst [vmem:[#allocation2 + $0x508] sm:$0xff] %v7687_v2  ;;  %234 = vst [vmem:[#allocation2 + $0x720] sm:$0xff] %v7687_v2 }
  0x23   : > { %235 = vst [vmem:[#allocation2 + $0x6e0] sm:$0xff] %v7687_v2  ;;  %236 = vst [vmem:[#allocation2 + $0x788] sm:$0xff] %v7687_v2 }
  0x24   : > { %237 = vst [vmem:[#allocation2 + $0x338] sm:$0xff] %v7687_v2  ;;  %238 = vst [vmem:[#allocation2 + $0x740] sm:$0xff] %v7687_v2 }
  0x25   : > { %239 = vst [vmem:[#allocation2 + $0x2e0] sm:$0xff] %v7687_v2  ;;  %240 = vst [vmem:[#allocation2 + $0x5a8] sm:$0xff] %v7687_v2 }
  0x26   : > { %241 = vst [vmem:[#allocation2 + $0x5b8] sm:$0xff] %v7687_v2  ;;  %242 = vst [vmem:[#allocation2 + $0x568] sm:$0xff] %v7687_v2 }
  0x27   : > { %243 = vst [vmem:[#allocation2 + $0x3e8] sm:$0xff] %v7687_v2  ;;  %244 = vst [vmem:[#allocation2 + $0x6f8] sm:$0xff] %v7687_v2 }
  0x28   : > { %245 = vst [vmem:[#allocation2 + $0x690] sm:$0xff] %v7687_v2  ;;  %246 = vst [vmem:[#allocation2 + $0x368] sm:$0xff] %v7687_v2 }
  0x29   : > { %247 = vst [vmem:[#allocation2 + $0x138] sm:$0xff] %v7687_v2  ;;  %248 = vst [vmem:[#allocation2 + $0xc0] sm:$0xff] %v7687_v2 }
  0x2a   : > { %249 = vst [vmem:[#allocation2 + $0x1c0] sm:$0xff] %v7687_v2  ;;  %250 = vst [vmem:[#allocation2 + $0x280] sm:$0xff] %v7687_v2 }
  0x2b   : > { %251 = vst [vmem:[#allocation2 + $0x100] sm:$0xff] %v7687_v2  ;;  %252 = vst [vmem:[#allocation2 + $0x3c0] sm:$0xff] %v7687_v2 }
  0x2c   : > { %253 = vst [vmem:[#allocation2 + $0x558] sm:$0xff] %v7687_v2  ;;  %254 = vst [vmem:[#allocation2 + $0x3e0] sm:$0xff] %v7687_v2 }
  0x2d   : > { %255 = vst [vmem:[#allocation2 + $0x618] sm:$0xff] %v7687_v2  ;;  %256 = vst [vmem:[#allocation2 + $0x4c0] sm:$0xff] %v7687_v2 }
  0x2e   : > { %257 = vst [vmem:[#allocation2 + $0x70] sm:$0xff] %v7687_v2  ;;  %258 = vst [vmem:[#allocation2 + $0x7b8] sm:$0xff] %v7687_v2 }
  0x2f   : > { %259 = vst [vmem:[#allocation2 + $0x400] sm:$0xff] %v7687_v2  ;;  %260 = vst [vmem:[#allocation2 + $0x6a8] sm:$0xff] %v7687_v2 }
  0x30   : > { %261 = vst [vmem:[#allocation2 + $0x3f8] sm:$0xff] %v7687_v2  ;;  %262 = vst [vmem:[#allocation2 + $0x2e8] sm:$0xff] %v7687_v2 }
  0x31   : > { %263 = vst [vmem:[#allocation2 + $0x6c8] sm:$0xff] %v7687_v2  ;;  %264 = vst [vmem:[#allocation2 + $0x5c0] sm:$0xff] %v7687_v2 }
  0x32   : > { %265 = vst [vmem:[#allocation2 + $0x5e8] sm:$0xff] %v7687_v2  ;;  %266 = vst [vmem:[#allocation2 + $0x5f8] sm:$0xff] %v7687_v2 }
  0x33   : > { %267 = vst [vmem:[#allocation2 + $0x770] sm:$0xff] %v7687_v2  ;;  %268 = vst [vmem:[#allocation2 + $0x520] sm:$0xff] %v7687_v2 }
  0x34   : > { %269 = vst [vmem:[#allocation2 + $0x640] sm:$0xff] %v7687_v2  ;;  %270 = vst [vmem:[#allocation2 + $0x250] sm:$0xff] %v7687_v2 }
  0x35   : > { %271 = vst [vmem:[#allocation2 + $0x348] sm:$0xff] %v7687_v2  ;;  %272 = vst [vmem:[#allocation2 + $0x420] sm:$0xff] %v7687_v2 }
  0x36   : > { %273 = vst [vmem:[#allocation2 + $0xe0] sm:$0xff] %v7687_v2  ;;  %274 = vst [vmem:[#allocation2 + $0x620] sm:$0xff] %v7687_v2 }
  0x37   : > { %275 = vst [vmem:[#allocation2 + $0x148] sm:$0xff] %v7687_v2  ;;  %276 = vst [vmem:[#allocation2 + $0x3a0] sm:$0xff] %v7687_v2 }
  0x38   : > { %277 = vst [vmem:[#allocation2 + $0x4e8] sm:$0xff] %v7687_v2  ;;  %278 = vst [vmem:[#allocation2 + $0x310] sm:$0xff] %v7687_v2 }
  0x39   : > { %279 = vst [vmem:[#allocation2 + $0x38] sm:$0xff] %v7687_v2  ;;  %280 = vst [vmem:[#allocation2 + $0x440] sm:$0xff] %v7687_v2 }
  0x3a   : > { %281 = vst [vmem:[#allocation2 + $0x50] sm:$0xff] %v7687_v2  ;;  %282 = vst [vmem:[#allocation2 + $0x390] sm:$0xff] %v7687_v2 }
  0x3b   : > { %283 = vst [vmem:[#allocation2 + $0x538] sm:$0xff] %v7754_v3  ;;  %284 = vst [vmem:[#allocation2 + $0xf0] sm:$0xff] %v7754_v3 }
  0x3c   : > { %285 = vst [vmem:[#allocation2 + $0x790] sm:$0xff] %v7754_v3  ;;  %286 = vst [vmem:[#allocation2 + $0x680] sm:$0xff] %v7754_v3 }
  0x3d   : > { %287 = vst [vmem:[#allocation2 + $0xb8] sm:$0xff] %v7754_v3  ;;  %288 = vst [vmem:[#allocation2 + $0x120] sm:$0xff] %v7754_v3 }
  0x3e   : > { %289 = vst [vmem:[#allocation2 + $0xd0] sm:$0xff] %v7754_v3  ;;  %290 = vst [vmem:[#allocation2 + $0x40] sm:$0xff] %v7754_v3 }
  0x3f   : > { %291 = vst [vmem:[#allocation2 + $0x6f0] sm:$0xff] %v7754_v3  ;;  %292 = vst [vmem:[#allocation2 + $0x2f8] sm:$0xff] %v7754_v3 }
  0x40   : > { %293 = vst [vmem:[#allocation2 + $0x758] sm:$0xff] %v7754_v3  ;;  %294 = vst [vmem:[#allocation2 + $0x178] sm:$0xff] %v7754_v3 }
  0x41   : > { %295 = vst [vmem:[#allocation2 + $0x738] sm:$0xff] %v7754_v3  ;;  %296 = vst [vmem:[#allocation2 + $0x598] sm:$0xff] %v7754_v3 }
  0x42   : > { %297 = vst [vmem:[#allocation2 + $0x7d8] sm:$0xff] %v7754_v3  ;;  %298 = vst [vmem:[#allocation2 + $0x6d8] sm:$0xff] %v7754_v3 }
  0x43   : > { %299 = vst [vmem:[#allocation2 + $0x398] sm:$0xff] %v7754_v3  ;;  %300 = vst [vmem:[#allocation2 + $0x1a8] sm:$0xff] %v7754_v3 }
  0x44   : > { %301 = vst [vmem:[#allocation2 + $0x698] sm:$0xff] %v7754_v3  ;;  %302 = vst [vmem:[#allocation2 + $0x3b8] sm:$0xff] %v7754_v3 }
  0x45   : > { %303 = vst [vmem:[#allocation2 + $0x5d8] sm:$0xff] %v7754_v3  ;;  %304 = vst [vmem:[#allocation2 + $0x610] sm:$0xff] %v7754_v3 }
  0x46   : > { %305 = vst [vmem:[#allocation2 + $0x218] sm:$0xff] %v7754_v3  ;;  %306 = vst [vmem:[#allocation2 + $0x1d8] sm:$0xff] %v7754_v3 }
  0x47   : > { %307 = vst [vmem:[#allocation2 + $0x628] sm:$0xff] %v7754_v3  ;;  %308 = vst [vmem:[#allocation2 + $0x1f8] sm:$0xff] %v7754_v3 }
  0x48   : > { %309 = vst [vmem:[#allocation2 + $0x388] sm:$0xff] %v7754_v3  ;;  %310 = vst [vmem:[#allocation2 + $0x278] sm:$0xff] %v7754_v3 }
  0x49   : > { %311 = vst [vmem:[#allocation2 + $0x478] sm:$0xff] %v7754_v3  ;;  %312 = vst [vmem:[#allocation2 + $0x2c0] sm:$0xff] %v7754_v3 }
  0x4a   : > { %313 = vst [vmem:[#allocation2 + $0x1c8] sm:$0xff] %v7754_v3  ;;  %314 = vst [vmem:[#allocation2 + $0x7c0] sm:$0xff] %v7754_v3 }
  0x4b   : > { %315 = vst [vmem:[#allocation2 + $0x418] sm:$0xff] %v7754_v3  ;;  %316 = vst [vmem:[#allocation2 + $0x7f0] sm:$0xff] %v7754_v3 }
  0x4c   : > { %317 = vst [vmem:[#allocation2 + $0x4b0] sm:$0xff] %v7754_v3  ;;  %318 = vst [vmem:[#allocation2 + $0x318] sm:$0xff] %v7754_v3 }
  0x4d   : > { %319 = vst [vmem:[#allocation2 + $0x90] sm:$0xff] %v7754_v3  ;;  %320 = vst [vmem:[#allocation2 + $0x540] sm:$0xff] %v7754_v3 }
  0x4e   : > { %321 = vst [vmem:[#allocation2 + $0x588] sm:$0xff] %v7754_v3  ;;  %322 = vst [vmem:[#allocation2 + $0x648] sm:$0xff] %v7754_v3 }
  0x4f   : > { %323 = vst [vmem:[#allocation2 + $0x58] sm:$0xff] %v7754_v3  ;;  %324 = vst [vmem:[#allocation2 + $0x198] sm:$0xff] %v7754_v3 }
  0x50   : > { %325 = vst [vmem:[#allocation2 + $0x68] sm:$0xff] %v7754_v3  ;;  %326 = vst [vmem:[#allocation2 + $0x600] sm:$0xff] %v7754_v3 }
  0x51   : > { %327 = vst [vmem:[#allocation2 + $0x3a8] sm:$0xff] %v7754_v3  ;;  %328 = vst [vmem:[#allocation2 + $0xb0] sm:$0xff] %v7754_v3 }
  0x52   : > { %329 = vst [vmem:[#allocation2 + $0x630] sm:$0xff] %v7754_v3  ;;  %330 = vst [vmem:[#allocation2 + $0x158] sm:$0xff] %v7754_v3 }
  0x53   : > { %331 = vst [vmem:[#allocation2 + $0x370] sm:$0xff] %v7754_v3  ;;  %332 = vst [vmem:[#allocation2 + $0x1e0] sm:$0xff] %v7754_v3 }
  0x54   : > { %333 = vst [vmem:[#allocation2 + $0x7b0] sm:$0xff] %v7754_v3  ;;  %334 = vst [vmem:[#allocation2 + $0x6c0] sm:$0xff] %v7754_v3 }
  0x55   : > { %335 = vst [vmem:[#allocation2 + $0xd8] sm:$0xff] %v7754_v3  ;;  %336 = vst [vmem:[#allocation2 + $0x6b8] sm:$0xff] %v7754_v3 }
  0x56   : > { %337 = vst [vmem:[#allocation2 + $0x140] sm:$0xff] %v7754_v3  ;;  %338 = vst [vmem:[#allocation2 + $0x5b0] sm:$0xff] %v7754_v3 }
  0x57   : > { %339 = vst [vmem:[#allocation2 + $0x30] sm:$0xff] %v7754_v3  ;;  %340 = vst [vmem:[#allocation2 + $0x128] sm:$0xff] %v7754_v3 }
  0x58   : > { %341 = vst [vmem:[#allocation2 + $0x1a0] sm:$0xff] %v7754_v3  ;;  %342 = vst [vmem:[#allocation2 + $0x5f0] sm:$0xff] %v7754_v3 }
  0x59   : > { %343 = vst [vmem:[#allocation2 + $0x670] sm:$0xff] %v7754_v3  ;;  %344 = vst [vmem:[#allocation2 + $0x240] sm:$0xff] %v7754_v3 }
  0x5a   : > { %345 = vst [vmem:[#allocation2 + $0x118] sm:$0xff] %v7754_v3  ;;  %346 = vst [vmem:[#allocation2 + $0x268] sm:$0xff] %v7754_v3 }
  0x5b   : > { %347 = vst [vmem:[#allocation2 + $0x4a8] sm:$0xff] %v7757_v4  ;;  %348 = vst [vmem:[#allocation2 + $0x5c8] sm:$0xff] %v7757_v4 }
  0x5c   : > { %349 = vst [vmem:[#allocation2 + $0x438] sm:$0xff] %v7757_v4  ;;  %350 = vst [vmem:[#allocation2 + $0x350] sm:$0xff] %v7757_v4 }
  0x5d   : > { %351 = vst [vmem:[#allocation2 + $0x2c8] sm:$0xff] %v7757_v4  ;;  %352 = vst [vmem:[#allocation2 + $0xf8] sm:$0xff] %v7757_v4 }
  0x5e   : > { %353 = vst [vmem:[#allocation2 + $0x488] sm:$0xff] %v7757_v4  ;;  %354 = vst [vmem:[#allocation2 + $0x6a0] sm:$0xff] %v7757_v4 }
  0x5f   : > { %355 = vst [vmem:[#allocation2 + $0x3c8] sm:$0xff] %v7757_v4  ;;  %356 = vst [vmem:[#allocation2 + $0x1e8] sm:$0xff] %v7757_v4 }
  0x60   : > { %357 = vst [vmem:[#allocation2 + $0x6d0] sm:$0xff] %v7757_v4  ;;  %358 = vst [vmem:[#allocation2 + $0x688] sm:$0xff] %v7757_v4 }
  0x61   : > { %359 = vst [vmem:[#allocation2 + $0x730] sm:$0xff] %v7757_v4  ;;  %360 = vst [vmem:[#allocation2 + $0x658] sm:$0xff] %v7757_v4 }
  0x62   : > { %361 = vst [vmem:[#allocation2 + $0x458] sm:$0xff] %v7757_v4  ;;  %362 = vst [vmem:[#allocation2 + $0x1b8] sm:$0xff] %v7757_v4 }
  0x63   : > { %363 = vst [vmem:[#allocation2 + $0x460] sm:$0xff] %v7757_v4  ;;  %364 = vst [vmem:[#allocation2 + $0x4f0] sm:$0xff] %v7757_v4 }
  0x64   : > { %365 = vst [vmem:[#allocation2 + $0x528] sm:$0xff] %v7757_v4  ;;  %366 = vst [vmem:[#allocation2 + $0x258] sm:$0xff] %v7757_v4 }
  0x65   : > { %367 = vst [vmem:[#allocation2 + $0x4d0] sm:$0xff] %v7757_v4  ;;  %368 = vst [vmem:[#allocation2 + $0x4f8] sm:$0xff] %v7757_v4 }
  0x66   : > { %369 = vst [vmem:[#allocation2 + $0x78] sm:$0xff] %v7757_v4  ;;  %370 = vst [vmem:[#allocation2 + $0x2a0] sm:$0xff] %v7757_v4 }
  0x67   : > { %371 = vst [vmem:[#allocation2 + $0x10] sm:$0xff] %v7757_v4  ;;  %372 = vst [vmem:[#allocation2 + $0x778] sm:$0xff] %v7757_v4 }
  0x68   : > { %373 = vst [vmem:[#allocation2 + $0x7a8] sm:$0xff] %v7757_v4  ;;  %374 = vst [vmem:[#allocation2 + $0x530] sm:$0xff] %v7757_v4 }
  0x69   : > { %375 = vst [vmem:[#allocation2 + $0x590] sm:$0xff] %v7757_v4  ;;  %376 = vst [vmem:[#allocation2 + $0x660] sm:$0xff] %v7757_v4 }
  0x6a   : > { %377 = vst [vmem:[#allocation2 + $0x358] sm:$0xff] %v7757_v4  ;;  %378 = vst [vmem:[#allocation2 + $0x700] sm:$0xff] %v7757_v4 }
  0x6b   : > { %379 = vst [vmem:[#allocation2 + $0x340] sm:$0xff] %v7757_v4  ;;  %380 = vst [vmem:[#allocation2 + $0x5a0] sm:$0xff] %v7757_v4 }
  0x6c   : > { %381 = vst [vmem:[#allocation2 + $0x3d0] sm:$0xff] %v7757_v4  ;;  %382 = vst [vmem:[#allocation2 + $0x230] sm:$0xff] %v7757_v4 }
  0x6d   : > { %383 = vst [vmem:[#allocation2 + $0x560] sm:$0xff] %v7757_v4  ;;  %384 = vst [vmem:[#allocation2 + $0x7f8] sm:$0xff] %v7757_v4 }
  0x6e   : > { %385 = vst [vmem:[#allocation2 + $0x4e0] sm:$0xff] %v7757_v4  ;;  %386 = vst [vmem:[#allocation2 + $0x200] sm:$0xff] %v7757_v4 }
  0x6f   : > { %387 = vst [vmem:[#allocation2 + $0x468] sm:$0xff] %v7757_v4  ;;  %388 = vst [vmem:[#allocation2 + $0x2a8] sm:$0xff] %v7757_v4 }
  0x70   : > { %389 = vst [vmem:[#allocation2 + $0x1d0] sm:$0xff] %v7757_v4  ;;  %390 = vst [vmem:[#allocation2 + $0x510] sm:$0xff] %v7757_v4 }
  0x71   : > { %391 = vst [vmem:[#allocation2 + $0x750] sm:$0xff] %v7757_v4  ;;  %392 = vst [vmem:[#allocation2 + $0x130] sm:$0xff] %v7757_v4 }
  0x72   : > { %393 = vst [vmem:[#allocation2 + $0x28] sm:$0xff] %v7757_v4  ;;  %394 = vst [vmem:[#allocation2 + $0x760] sm:$0xff] %v7757_v4 }
  0x73   : > { %395 = vst [vmem:[#allocation2 + $0x5d0] sm:$0xff] %v7757_v4  ;;  %396 = vst [vmem:[#allocation2 + $0x228] sm:$0xff] %v7757_v4 }
  0x74   : > { %397 = vst [vmem:[#allocation2 + $0x208] sm:$0xff] %v7757_v4  ;;  %398 = vst [vmem:[#allocation2 + $0x290] sm:$0xff] %v7757_v4 }
  0x75   : > { %399 = vst [vmem:[#allocation2 + $0x7a0] sm:$0xff] %v7757_v4  ;;  %400 = vst [vmem:[#allocation2 + $0x80] sm:$0xff] %v7757_v4 }
  0x76   : > { %401 = vst [vmem:[#allocation2 + $0x4c8] sm:$0xff] %v7757_v4  ;;  %402 = vst [vmem:[#allocation2 + $0x3f0] sm:$0xff] %v7757_v4 }
  0x77   : > { %403 = vst [vmem:[#allocation2 + $0x798] sm:$0xff] %v7757_v4  ;;  %404 = vst [vmem:[#allocation2 + $0x378] sm:$0xff] %v7757_v4 }
  0x78   : > { %405 = vst [vmem:[#allocation2 + $0x160] sm:$0xff] %v7757_v4  ;;  %406 = vst [vmem:[#allocation2 + $0x260] sm:$0xff] %v7757_v4 }
  0x79   : > { %407 = vst [vmem:[#allocation2 + $0x728] sm:$0xff] %v7757_v4  ;;  %408 = vst [vmem:[#allocation2 + $0x288] sm:$0xff] %v7757_v4 }
  0x7a   : > { %409 = vst [vmem:[#allocation2 + $0x188] sm:$0xff] %v7757_v4  ;;  %410 = vst [vmem:[#allocation2 + $0x408] sm:$0xff] %v7757_v4 }
  0x7b   : > { %411 = vst [vmem:[#allocation2 + $0x678] sm:$0xff] %v7760_v5  ;;  %412 = vst [vmem:[#allocation2 + $0x98] sm:$0xff] %v7760_v5 }
  0x7c   : > { %413 = vst [vmem:[#allocation2 + $0x470] sm:$0xff] %v7760_v5  ;;  %414 = vst [vmem:[#allocation2 + $0x410] sm:$0xff] %v7760_v5 }
  0x7d   : > { %415 = vst [vmem:[#allocation2 + $0x248] sm:$0xff] %v7760_v5  ;;  %416 = vst [vmem:[#allocation2 + $0x548] sm:$0xff] %v7760_v5 }
  0x7e   : > { %417 = vst [vmem:[#allocation2 + $0x220] sm:$0xff] %v7760_v5  ;;  %418 = vst [vmem:[#allocation2 + $0x780] sm:$0xff] %v7760_v5 }
  0x7f   : > { %419 = vst [vmem:[#allocation2 + $0x708] sm:$0xff] %v7760_v5  ;;  %420 = vst [vmem:[#allocation2 + $0x8] sm:$0xff] %v7760_v5 }
  0x80   : > { %421 = vst [vmem:[#allocation2 + $0x428] sm:$0xff] %v7760_v5  ;;  %422 = vst [vmem:[#allocation2 + $0x170] sm:$0xff] %v7760_v5 }
  0x81   : > { %423 = vst [vmem:[#allocation2 + $0x7e0] sm:$0xff] %v7760_v5  ;;  %424 = vst [vmem:[#allocation2 + $0x20] sm:$0xff] %v7760_v5 }
  0x82   : > { %425 = vst [vmem:[#allocation2 + $0x308] sm:$0xff] %v7760_v5  ;;  %426 = vst [vmem:[#allocation2 + $0x88] sm:$0xff] %v7760_v5 }
  0x83   : > { %427 = vst [vmem:[#allocation2 + $0x6e8] sm:$0xff] %v7760_v5  ;;  %428 = vst [vmem:[#allocation2 + $0x6b0] sm:$0xff] %v7760_v5 }
  0x84   : > { %429 = vst [vmem:[#allocation2 + $0x300] sm:$0xff] %v7760_v5  ;;  %430 = vst [vmem:[#allocation2 + $0x108] sm:$0xff] %v7760_v5 }
  0x85   : > { %431 = vst [vmem:[#allocation2 + $0x180] sm:$0xff] %v7760_v5  ;;  %432 = vst [vmem:[#allocation2 + $0x490] sm:$0xff] %v7760_v5 }
  0x86   : > { %433 = vst [vmem:[#allocation2 + $0x570] sm:$0xff] %v7760_v5  ;;  %434 = vst [vmem:[#allocation2 + $0x500] sm:$0xff] %v7760_v5 }
  0x87   : > { %435 = vst [vmem:[#allocation2 + $0xe8] sm:$0xff] %v7760_v5  ;;  %436 = vst [vmem:[#allocation2 + $0x2f0] sm:$0xff] %v7760_v5 }
  0x88   : > { %437 = vst [vmem:[#allocation2 + $0x7e8] sm:$0xff] %v7760_v5  ;;  %438 = vst [vmem:[#allocation2 + $0x360] sm:$0xff] %v7760_v5 }
  0x89   : > { %439 = vst [vmem:[#allocation2 + $0x60] sm:$0xff] %v7760_v5  ;;  %440 = vst [vmem:[#allocation2 + $0x210] sm:$0xff] %v7760_v5 }
  0x8a   : > { %441 = vst [vmem:[#allocation2 + $0x4a0] sm:$0xff] %v7760_v5  ;;  %442 = vst [vmem:[#allocation2 + $0x748] sm:$0xff] %v7760_v5 }
  0x8b   : > { %443 = vst [vmem:[#allocation2 + $0x168] sm:$0xff] %v7760_v5  ;;  %444 = vst [vmem:[#allocation2 + $0x668] sm:$0xff] %v7760_v5 }
  0x8c   : > { %445 = vst [vmem:[#allocation2 + $0x270] sm:$0xff] %v7760_v5  ;;  %446 = vst [vmem:[#allocation2 + $0x2d8] sm:$0xff] %v7760_v5 }
  0x8d   : > { %447 = vst [vmem:[#allocation2 + $0xc8] sm:$0xff] %v7760_v5  ;;  %448 = vst [vmem:[#allocation2 + $0xa0] sm:$0xff] %v7760_v5 }
  0x8e   : > { %449 = vst [vmem:[#allocation2 + $0x48] sm:$0xff] %v7760_v5  ;;  %450 = vst [vmem:[#allocation2 + $0x328] sm:$0xff] %v7760_v5 }
  0x8f   : > { %451 = vst [vmem:[#allocation2 + $0x7c8] sm:$0xff] %v7760_v5  ;;  %452 = vst [vmem:[#allocation2 + $0x430] sm:$0xff] %v7760_v5 }
  0x90   : > { %453 = vst [vmem:[#allocation2 + $0x578] sm:$0xff] %v7760_v5  ;;  %454 = vst [vmem:[#allocation2 + $0x608] sm:$0xff] %v7760_v5 }
  0x91   : > { %455 = vst [vmem:[#allocation2 + $0x638] sm:$0xff] %v7760_v5  ;;  %456 = vst [vmem:[#allocation2 + $0x4b8] sm:$0xff] %v7760_v5 }
  0x92   : > { %457 = vst [vmem:[#allocation2 + $0x298] sm:$0xff] %v7760_v5  ;;  %458 = vst [vmem:[#allocation2 + $0x1f0] sm:$0xff] %v7760_v5 }
  0x93   : > { %459 = vst [vmem:[#allocation2] sm:$0xff] %v7760_v5  ;;  %460 = vst [vmem:[#allocation2 + $0x2d0] sm:$0xff] %v7760_v5 }
  0x94   : > { %461 = vst [vmem:[#allocation2 + $0x650] sm:$0xff] %v7760_v5  ;;  %462 = vst [vmem:[#allocation2 + $0x480] sm:$0xff] %v7760_v5 }
  0x95   : > { %463 = vst [vmem:[#allocation2 + $0x3d8] sm:$0xff] %v7760_v5  ;;  %464 = vst [vmem:[#allocation2 + $0x718] sm:$0xff] %v7760_v5 }
  0x96   : > { %465 = vst [vmem:[#allocation2 + $0x7d0] sm:$0xff] %v7760_v5  ;;  %466 = vst [vmem:[#allocation2 + $0x190] sm:$0xff] %v7760_v5 }
  0x97   : > { %467 = vst [vmem:[#allocation2 + $0x710] sm:$0xff] %v7760_v5  ;;  %468 = vst [vmem:[#allocation2 + $0xa8] sm:$0xff] %v7760_v5 }
  0x98   : > { %469 = vst [vmem:[#allocation2 + $0x2b8] sm:$0xff] %v7760_v5  ;;  %470 = vst [vmem:[#allocation2 + $0x238] sm:$0xff] %v7760_v5 }
  0x99   : > { %471 = vst [vmem:[#allocation2 + $0x1b0] sm:$0xff] %v7760_v5  ;;  %472 = vst [vmem:[#allocation2 + $0x5e0] sm:$0xff] %v7760_v5 }
  0x9a   : > { %473 = vst [vmem:[#allocation2 + $0x580] sm:$0xff] %v7760_v5  ;;  %474 = vst [vmem:[#allocation2 + $0x150] sm:$0xff] %v7760_v5 }
  0x9b PF: > { %v1798_v6 = vld [vmem:[%s7680_s30 + $0xf8] sm:$0xff]  ;;  %v1797_v10 = vld [vmem:[%s7680_s30 + $0xf0] sm:$0xff]  ;;  %v1796_v14 = vld [vmem:[%s7680_s30 + $0xe8] sm:$0xff]  ;;  %v739_v38 = vlaneseq }
  0x9c   : > { %v1830_v7 = vld [vmem:[%s7680_s30 + $0x1f8] sm:$0xff]  ;;  %6127 = vmatprep.subr.mxu0 %v1798_v6  ;;  %v1829_v11 = vld [vmem:[%s7680_s30 + $0x1f0] sm:$0xff]  ;;  %v1828_v15 = vld [vmem:[%s7680_s30 + $0x1e8] sm:$0xff] }
  0x9d   : > { %v1782_v8 = vld [vmem:[%s7680_s30 + $0x78] sm:$0xff]  ;;  %6171 = vmatprep.subr.mxu1 %v1830_v7  ;;  %v1781_v12 = vld [vmem:[%s7680_s30 + $0x70] sm:$0xff]  ;;  %v1780_v16 = vld [vmem:[%s7680_s30 + $0x68] sm:$0xff]  ;;  %v7994_v47 = vshrl.u32 %v739_v38, 7 }
  0x9e   : > { %v1814_v9 = vld [vmem:[%s7680_s30 + $0x178] sm:$0xff]  ;;  %6128 = vmatpush3.msra.mxu0 %v1782_v8  ;;  %v1813_v13 = vld [vmem:[%s7680_s30 + $0x170] sm:$0xff]  ;;  %v1812_v17 = vld [vmem:[%s7680_s30 + $0x168] sm:$0xff] }
  0x9f   : > { %6172 = vmatpush3.msra.mxu1 %v1814_v9  ;;  %6129 = vmatprep.subr.mxu0 %v1797_v10  ;;  %v1795_v18 = vld [vmem:[%s7680_s30 + $0xe0] sm:$0xff]  ;;  %v1794_v22 = vld [vmem:[%s7680_s30 + $0xd8] sm:$0xff]  ;;  %v1793_v26 = vld [vmem:[%s7680_s30 + $0xd0] sm:$0xff]  ;;  %v8005_v56 = vsub.s32 1, %v7994_v47  ;;  %v8013_v60 = vsub.s32 3, %v7994_v47  ;;  %v8018_v63 = vsub.s32 0, %v7994_v47 }
  0xa0   : > { %6173 = vmatprep.subr.mxu1 %v1829_v11  ;;  %6130 = vmatpush3.msra.mxu0 %v1781_v12  ;;  %v1827_v19 = vld [vmem:[%s7680_s30 + $0x1e0] sm:$0xff]  ;;  %v1826_v23 = vld [vmem:[%s7680_s30 + $0x1d8] sm:$0xff]  ;;  %v1825_v27 = vld [vmem:[%s7680_s30 + $0x1d0] sm:$0xff]  ;;  %v8021_v0 = vsub.s32 2, %v7994_v47 }
  0xa1   : > { %6174 = vmatpush3.msra.mxu1 %v1813_v13  ;;  %6131 = vmatprep.subr.mxu0 %v1796_v14  ;;  %v1779_v20 = vld [vmem:[%s7680_s30 + $0x60] sm:$0xff]  ;;  %v1778_v24 = vld [vmem:[%s7680_s30 + $0x58] sm:$0xff]  ;;  %v1777_v28 = vld [vmem:[%s7680_s30 + $0x50] sm:$0xff] }
  0xa2   : > { %6175 = vmatprep.subr.mxu1 %v1828_v15  ;;  %v1811_v21 = vld [vmem:[%s7680_s30 + $0x160] sm:$0xff]  ;;  %6132 = vmatpush3.msra.mxu0 %v1780_v16  ;;  %v1810_v25 = vld [vmem:[%s7680_s30 + $0x158] sm:$0xff]  ;;  %v1809_v29 = vld [vmem:[%s7680_s30 + $0x150] sm:$0xff] }
  0xa3   : > { %6176 = vmatpush3.msra.mxu1 %v1812_v17  ;;  %6133 = vmatprep.subr.mxu0 %v1795_v18  ;;  %v1792_v30 = vld [vmem:[%s7680_s30 + $0xc8] sm:$0xff]  ;;  %v1791_v34 = vld [vmem:[%s7680_s30 + $0xc0] sm:$0xff]  ;;  %v1790_v39 = vld [vmem:[%s7680_s30 + $0xb8] sm:$0xff] }
  0xa4   : > { %6177 = vmatprep.subr.mxu1 %v1827_v19  ;;  %6134 = vmatpush3.msra.mxu0 %v1779_v20  ;;  %v1824_v31 = vld [vmem:[%s7680_s30 + $0x1c8] sm:$0xff]  ;;  %v1823_v35 = vld [vmem:[%s7680_s30 + $0x1c0] sm:$0xff]  ;;  %v1822_v40 = vld [vmem:[%s7680_s30 + $0x1b8] sm:$0xff] }
  0xa5   : > { %6178 = vmatpush3.msra.mxu1 %v1811_v21  ;;  %6135 = vmatprep.subr.mxu0 %v1794_v22  ;;  %v1776_v32 = vld [vmem:[%s7680_s30 + $0x48] sm:$0xff]  ;;  %v1775_v36 = vld [vmem:[%s7680_s30 + $0x40] sm:$0xff]  ;;  %v1774_v41 = vld [vmem:[%s7680_s30 + $0x38] sm:$0xff]  ;;  %v7618_v21 = vmov 1.0  }
  0xa6   : > { %6179 = vmatprep.subr.mxu1 %v1826_v23  ;;  %6136 = vmatpush3.msra.mxu0 %v1778_v24  ;;  %v1808_v33 = vld [vmem:[%s7680_s30 + $0x148] sm:$0xff]  ;;  %v1807_v37 = vld [vmem:[%s7680_s30 + $0x140] sm:$0xff]  ;;  %v1806_v42 = vld [vmem:[%s7680_s30 + $0x138] sm:$0xff] }
  0xa7   : > { %6180 = vmatpush3.msra.mxu1 %v1810_v25  ;;  %6137 = vmatprep.subr.mxu0 %v1793_v26  ;;  %v1789_v43 = vld [vmem:[%s7680_s30 + $0xb0] sm:$0xff]  ;;  %v1788_v48 = vld [vmem:[%s7680_s30 + $0xa8] sm:$0xff]  ;;  %v1787_v52 = vld [vmem:[%s7680_s30 + $0xa0] sm:$0xff] }
  0xa8   : > { %6181 = vmatprep.subr.mxu1 %v1825_v27  ;;  %6138 = vmatpush3.msra.mxu0 %v1777_v28  ;;  %v1821_v44 = vld [vmem:[%s7680_s30 + $0x1b0] sm:$0xff]  ;;  %v1820_v49 = vld [vmem:[%s7680_s30 + $0x1a8] sm:$0xff]  ;;  %v1819_v53 = vld [vmem:[%s7680_s30 + $0x1a0] sm:$0xff] }
  0xa9   : > { %6182 = vmatpush3.msra.mxu1 %v1809_v29  ;;  %6139 = vmatprep.subr.mxu0 %v1792_v30  ;;  %v1773_v45 = vld [vmem:[%s7680_s30 + $0x30] sm:$0xff]  ;;  %v1772_v50 = vld [vmem:[%s7680_s30 + $0x28] sm:$0xff]  ;;  %v1771_v54 = vld [vmem:[%s7680_s30 + $0x20] sm:$0xff] }
  0xaa   : > { %6183 = vmatprep.subr.mxu1 %v1824_v31  ;;  %6140 = vmatpush3.msra.mxu0 %v1776_v32  ;;  %v1805_v46 = vld [vmem:[%s7680_s30 + $0x130] sm:$0xff]  ;;  %v1804_v51 = vld [vmem:[%s7680_s30 + $0x128] sm:$0xff]  ;;  %v1803_v55 = vld [vmem:[%s7680_s30 + $0x120] sm:$0xff] }
  0xab   : > { %6184 = vmatpush3.msra.mxu1 %v1808_v33  ;;  %6141 = vmatprep.subr.mxu0 %v1791_v34  ;;  %v1786_v57 = vld [vmem:[%s7680_s30 + $0x98] sm:$0xff]  ;;  %v8010_v59 = vld [vmem:[%s7670_s22] sm:$0xff]  ;;  %v1785_v1 = vld [vmem:[%s7680_s30 + $0x90] sm:$0xff] }
  0xac   : > { %6185 = vmatprep.subr.mxu1 %v1823_v35  ;;  %6142 = vmatpush3.msra.mxu0 %v1775_v36  ;;  %v1818_v58 = vld [vmem:[%s7680_s30 + $0x198] sm:$0xff]  ;;  %v1817_v2 = vld [vmem:[%s7680_s30 + $0x190] sm:$0xff]  ;;  %v1784_v5 = vld [vmem:[%s7680_s30 + $0x88] sm:$0xff]  ;;  %v8030_v6 = vrot.slane %v8010_v59, %v8005_v56  ;;  %v8036_v10 = vrot.slane %v8010_v59, %v8013_v60  ;;  %v8042_v14 = vrot.slane %v8010_v59, %v8018_v63 }
  0xad   : > { %6186 = vmatpush3.msra.mxu1 %v1807_v37  ;;  %6143 = vmatprep.subr.mxu0 %v1790_v39  ;;  %v1770_v61 = vld [vmem:[%s7680_s30 + $0x18] sm:$0xff]  ;;  %v1769_v3 = vld [vmem:[%s7680_s30 + $0x10] sm:$0xff]  ;;  %v1816_v7 = vld [vmem:[%s7680_s30 + $0x188] sm:$0xff]  ;;  %v8046_v15 = vrot.slane %v8010_v59, %v8021_v0 }
  0xae   : > { %6187 = vmatprep.subr.mxu1 %v1822_v40  ;;  %6144 = vmatpush3.msra.mxu0 %v1774_v41  ;;  %v1802_v62 = vld [vmem:[%s7680_s30 + $0x118] sm:$0xff]  ;;  %v1801_v4 = vld [vmem:[%s7680_s30 + $0x110] sm:$0xff]  ;;  %v1768_v8 = vld [vmem:[%s7680_s30 + $0x8] sm:$0xff] }
  0xaf   : > { %6188 = vmatpush3.msra.mxu1 %v1806_v42  ;;  %6145 = vmatprep.subr.mxu0 %v1789_v43  ;;  %v476_v9 = vld [vmem:[#allocation2 + $0x3b0] sm:$0xff]  ;;  %v1800_v11 = vld [vmem:[%s7680_s30 + $0x108] sm:$0xff]  ;;  %v1783_v12 = vld [vmem:[%s7680_s30 + $0x80] sm:$0xff] }
  0xb0   : > { %6189 = vmatprep.subr.mxu1 %v1821_v44  ;;  %6146 = vmatpush3.msra.mxu0 %v1773_v45  ;;  %v478_v13 = vld [vmem:[#allocation2 + $0x18] sm:$0xff]  ;;  %v1815_v16 = vld [vmem:[%s7680_s30 + $0x180] sm:$0xff]  ;;  %v475_v17 = vld [vmem:[#allocation2 + $0x2b0] sm:$0xff]  ;;  %vm996_vm1 = vcmp.eq.s32.totalorder %v476_v9, %v8030_v6 }
  0xb1   : > { %6190 = vmatpush3.msra.mxu1 %v1805_v46  ;;  %6147 = vmatprep.subr.mxu0 %v1788_v48  ;;  %v477_v18 = vld [vmem:[#allocation2 + $0x4d8] sm:$0xff]  ;;  %v1767_v19 = vld [vmem:[%s7680_s30] sm:$0xff]  ;;  %vm998_vm2 = vcmp.eq.s32.totalorder %v478_v13, %v8036_v10  ;;  %vm995_vm3 = vcmp.eq.s32.totalorder %v475_v17, %v8042_v14  ;;  %v1861_v26 = vld [vmem:[%s7680_s30 + $0x2f0] sm:$0xff] }
  0xb2   : > { %6191 = vmatprep.subr.mxu1 %v1820_v49  ;;  %6148 = vmatpush3.msra.mxu0 %v1772_v50  ;;  %v1799_v20 = vld [vmem:[%s7680_s30 + $0x100] sm:$0xff]  ;;  %vm997_vm4 = vcmp.eq.s32.totalorder %v477_v18, %v8046_v15  ;;  %v1862_v22 = vld [vmem:[%s7680_s30 + $0x2f8] sm:$0xff]  ;;  %v1893_v27 = vld [vmem:[%s7680_s30 + $0x3f0] sm:$0xff] }
  0xb3   : > { %6192 = vmatpush3.msra.mxu1 %v1804_v51  ;;  %6149 = vmatprep.subr.mxu0 %v1787_v52  ;;  %v1894_v23 = vld [vmem:[%s7680_s30 + $0x3f8] sm:$0xff]  ;;  %v1845_v28 = vld [vmem:[%s7680_s30 + $0x270] sm:$0xff]  ;;  %v1860_v30 = vld [vmem:[%s7680_s30 + $0x2e8] sm:$0xff] }
  0xb4   : > { %6193 = vmatprep.subr.mxu1 %v1819_v53  ;;  %6150 = vmatpush3.msra.mxu0 %v1771_v54  ;;  %v1846_v24 = vld [vmem:[%s7680_s30 + $0x278] sm:$0xff]  ;;  %v1877_v29 = vld [vmem:[%s7680_s30 + $0x370] sm:$0xff]  ;;  %v1892_v31 = vld [vmem:[%s7680_s30 + $0x3e8] sm:$0xff] }
  0xb5   : > { %6194 = vmatpush3.msra.mxu1 %v1803_v55  ;;  %6151 = vmatprep.subr.mxu0 %v1786_v57  ;;  %v1878_v25 = vld [vmem:[%s7680_s30 + $0x378] sm:$0xff]  ;;  %v1844_v32 = vld [vmem:[%s7680_s30 + $0x268] sm:$0xff]  ;;  %v1859_v34 = vld [vmem:[%s7680_s30 + $0x2e0] sm:$0xff] }
  0xb6   : > { %6195 = vmatprep.subr.mxu1 %v1818_v58  ;;  %6152 = vmatpush3.msra.mxu0 %v1770_v61  ;;  %v1876_v33 = vld [vmem:[%s7680_s30 + $0x368] sm:$0xff]  ;;  %v1891_v35 = vld [vmem:[%s7680_s30 + $0x3e0] sm:$0xff]  ;;  %v1858_v38 = vld [vmem:[%s7680_s30 + $0x2d8] sm:$0xff] }
  0xb7   : > { %6196 = vmatpush3.msra.mxu1 %v1802_v62  ;;  %6153 = vmatprep.subr.mxu0 %v1785_v1  ;;  %v1843_v36 = vld [vmem:[%s7680_s30 + $0x260] sm:$0xff]  ;;  %v1890_v39 = vld [vmem:[%s7680_s30 + $0x3d8] sm:$0xff]  ;;  %v1857_v42 = vld [vmem:[%s7680_s30 + $0x2d0] sm:$0xff] }
  0xb8   : > { %6197 = vmatprep.subr.mxu1 %v1817_v2  ;;  %6154 = vmatpush3.msra.mxu0 %v1769_v3  ;;  %v1875_v37 = vld [vmem:[%s7680_s30 + $0x360] sm:$0xff]  ;;  %v1842_v40 = vld [vmem:[%s7680_s30 + $0x258] sm:$0xff]  ;;  %v1889_v43 = vld [vmem:[%s7680_s30 + $0x3d0] sm:$0xff] }
  0xb9   : > { %6198 = vmatpush3.msra.mxu1 %v1801_v4  ;;  %6155 = vmatprep.subr.mxu0 %v1784_v5  ;;  %v1874_v41 = vld [vmem:[%s7680_s30 + $0x358] sm:$0xff]  ;;  %v1841_v44 = vld [vmem:[%s7680_s30 + $0x250] sm:$0xff]  ;;  %v1856_v46 = vld [vmem:[%s7680_s30 + $0x2c8] sm:$0xff] }
  0xba   : > { %6199 = vmatprep.subr.mxu1 %v1816_v7  ;;  %6156 = vmatpush3.msra.mxu0 %v1768_v8  ;;  %v1873_v45 = vld [vmem:[%s7680_s30 + $0x350] sm:$0xff]  ;;  %v1888_v48 = vld [vmem:[%s7680_s30 + $0x3c8] sm:$0xff]  ;;  %v1855_v51 = vld [vmem:[%s7680_s30 + $0x2c0] sm:$0xff] }
  0xbb   : > { %6200 = vmatpush3.msra.mxu1 %v1800_v11  ;;  %6157 = vmatprep.subr.mxu0 %v1783_v12  ;;  %v1840_v49 = vld [vmem:[%s7680_s30 + $0x248] sm:$0xff]  ;;  %v1887_v52 = vld [vmem:[%s7680_s30 + $0x3c0] sm:$0xff]  ;;  %v540_v55 = vld [vmem:[#allocation2 + $0xf0] sm:$0xff] }
  0xbc   : > { %6201 = vmatprep.subr.mxu1 %v1815_v16  ;;  %6158 = vmatpush3.msra.mxu0 %v1767_v19  ;;  %v1872_v50 = vld [vmem:[%s7680_s30 + $0x348] sm:$0xff]  ;;  %v1839_v53 = vld [vmem:[%s7680_s30 + $0x240] sm:$0xff]  ;;  %v1854_v58 = vld [vmem:[%s7680_s30 + $0x2b8] sm:$0xff]  ;;  %vm1060_vm5 = vcmp.eq.s32.totalorder %v540_v55, %v8030_v6 }
  0xbd   : > { %5868 = vmatprep.mubr.msk.f32.mxu0 %vm996_vm1, %v7618_v21  ;;  %6202 = vmatpush3.msra.mxu1 %v1799_v20  ;;  %v1871_v54 = vld [vmem:[%s7680_s30 + $0x340] sm:$0xff]  ;;  %v1886_v61 = vld [vmem:[%s7680_s30 + $0x3b8] sm:$0xff]  ;;  %v541_v3 = vld [vmem:[#allocation2 + $0x790] sm:$0xff] }
  0xbe   : > { %5876 = vmatprep.mubr.msk.f32.mxu1 %vm998_vm2, %v7618_v21  ;;  %5869 = vmatmul.mubr.msk.f32.vlgmr.msra.gmra.mxu0 %vm995_vm3, %v7618_v21  ;;  %v542_v57 = vld [vmem:[#allocation2 + $0x680] sm:$0xff]  ;;  %v1838_v62 = vld [vmem:[%s7680_s30 + $0x238] sm:$0xff]  ;;  %v1853_v4 = vld [vmem:[%s7680_s30 + $0x2b0] sm:$0xff]  ;;  %vm1061_vm8 = vcmp.eq.s32.totalorder %v541_v3, %v8046_v15 }
  0xbf   : > { %5877 = vmatmul.mubr.msk.f32.vlgmr.msra.gmra.mxu1 %vm997_vm4, %v7618_v21  ;;  %6215 = vmatprep.subr.mxu0 %v1862_v22  ;;  %v1870_v1 = vld [vmem:[%s7680_s30 + $0x338] sm:$0xff]  ;;  %vm1062_vm6 = vcmp.eq.s32.totalorder %v542_v57, %v8036_v10  ;;  %v1885_v5 = vld [vmem:[%s7680_s30 + $0x3b0] sm:$0xff]  ;;  %v604_v9 = vld [vmem:[#allocation2 + $0x5c8] sm:$0xff] }
  0xc0   : > { %6259 = vmatprep.subr.mxu1 %v1894_v23  ;;  %6216 = vmatpush3.msra.mxu0 %v1846_v24  ;;  %v539_v2 = vld [vmem:[#allocation2 + $0x538] sm:$0xff]  ;;  %v1837_v7 = vld [vmem:[%s7680_s30 + $0x230] sm:$0xff]  ;;  %v1852_v12 = vld [vmem:[%s7680_s30 + $0x2a8] sm:$0xff]  ;;  %vm1124_vm9 = vcmp.eq.s32.totalorder %v604_v9, %v8030_v6 }
  0xc1   : > { %6260 = vmatpush3.msra.mxu1 %v1878_v25  ;;  %6217 = vmatprep.subr.mxu0 %v1861_v26  ;;  %vm1059_vm7 = vcmp.eq.s32.totalorder %v539_v2, %v8042_v14  ;;  %v1869_v8 = vld [vmem:[%s7680_s30 + $0x330] sm:$0xff]  ;;  %v1884_v13 = vld [vmem:[%s7680_s30 + $0x3a8] sm:$0xff]  ;;  %v605_v19 = vld [vmem:[#allocation2 + $0x438] sm:$0xff] }
  0xc2   : > { %6261 = vmatprep.subr.mxu1 %v1893_v27  ;;  %6218 = vmatpush3.msra.mxu0 %v1845_v28  ;;  %v606_v11 = vld [vmem:[#allocation2 + $0x350] sm:$0xff]  ;;  %v1836_v16 = vld [vmem:[%s7680_s30 + $0x228] sm:$0xff]  ;;  %v1851_v20 = vld [vmem:[%s7680_s30 + $0x2a0] sm:$0xff]  ;;  %vm1125_vm12 = vcmp.eq.s32.totalorder %v605_v19, %v8046_v15 }
  0xc3   : > { %6262 = vmatpush3.msra.mxu1 %v1877_v29  ;;  %6219 = vmatprep.subr.mxu0 %v1860_v30  ;;  %v1868_v17 = vld [vmem:[%s7680_s30 + $0x328] sm:$0xff]  ;;  %vm1126_vm10 = vcmp.eq.s32.totalorder %v606_v11, %v8036_v10  ;;  %v1883_v22 = vld [vmem:[%s7680_s30 + $0x3a0] sm:$0xff]  ;;  %v668_v25 = vld [vmem:[#allocation2 + $0x98] sm:$0xff] }
  0xc4   : > { %6263 = vmatprep.subr.mxu1 %v1892_v31  ;;  %6220 = vmatpush3.msra.mxu0 %v1844_v32  ;;  %v603_v18 = vld [vmem:[#allocation2 + $0x4a8] sm:$0xff]  ;;  %v1835_v23 = vld [vmem:[%s7680_s30 + $0x220] sm:$0xff]  ;;  %v670_v26 = vld [vmem:[#allocation2 + $0x410] sm:$0xff]  ;;  %vm1188_vm13 = vcmp.eq.s32.totalorder %v668_v25, %v8030_v6  ;;  %v8143_v6 = vsub.s32 6, %v7994_v47 }
  0xc5   : > { %6264 = vmatpush3.msra.mxu1 %v1876_v33  ;;  %6221 = vmatprep.subr.mxu0 %v1859_v34  ;;  %vm1123_vm11 = vcmp.eq.s32.totalorder %v603_v18, %v8042_v14  ;;  %v1867_v24 = vld [vmem:[%s7680_s30 + $0x320] sm:$0xff]  ;;  %v1850_v27 = vld [vmem:[%s7680_s30 + $0x298] sm:$0xff]  ;;  %v669_v32 = vld [vmem:[#allocation2 + $0x470] sm:$0xff]  ;;  %v8128_v33 = vsub.s32 5, %v7994_v47  ;;  %vm1190_vm14 = vcmp.eq.s32.totalorder %v670_v26, %v8036_v10  ;;  %v8133_v34 = vsub.s32 4, %v7994_v47 }
  0xc6   : > { %6265 = vmatprep.subr.mxu1 %v1891_v35  ;;  %6222 = vmatpush3.msra.mxu0 %v1843_v36  ;;  %v1882_v28 = vld [vmem:[%s7680_s30 + $0x398] sm:$0xff]  ;;  %v1849_v35 = vld [vmem:[%s7680_s30 + $0x290] sm:$0xff]  ;;  %vm1189_vm0 = vcmp.eq.s32.totalorder %v669_v32, %v8046_v15  ;;  %v1880_v15 = vld [vmem:[%s7680_s30 + $0x388] sm:$0xff] }
  0xc7   : > { %6266 = vmatpush3.msra.mxu1 %v1875_v37  ;;  %6223 = vmatprep.subr.mxu0 %v1858_v38  ;;  %v1834_v29 = vld [vmem:[%s7680_s30 + $0x218] sm:$0xff]  ;;  %v1881_v36 = vld [vmem:[%s7680_s30 + $0x390] sm:$0xff]  ;;  %v8138_v37 = vsub.s32 7, %v7994_v47  ;;  %v8157_v47 = vrot.slane %v8010_v59, %v8133_v34  ;;  %v546_v2 = vld [vmem:[#allocation2 + $0x40] sm:$0xff] }
  0xc8   : > { %6267 = vmatprep.subr.mxu1 %v1890_v39  ;;  %6224 = vmatpush3.msra.mxu0 %v1842_v40  ;;  %v1866_v30 = vld [vmem:[%s7680_s30 + $0x318] sm:$0xff]  ;;  %v1833_v10 = vld [vmem:[%s7680_s30 + $0x210] sm:$0xff]  ;;  %v8151_v39 = vrot.slane %v8010_v59, %v8128_v33  ;;  %v480_v40 = vld [vmem:[#allocation2 + $0x768] sm:$0xff] }
  0xc9   : > { %6268 = vmatpush3.msra.mxu1 %v1874_v41  ;;  %6225 = vmatprep.subr.mxu0 %v1857_v42  ;;  %v667_v31 = vld [vmem:[#allocation2 + $0x678] sm:$0xff]  ;;  %v1865_v38 = vld [vmem:[%s7680_s30 + $0x310] sm:$0xff]  ;;  %v1832_v41 = vld [vmem:[%s7680_s30 + $0x208] sm:$0xff] }
  0xca   : > { %6269 = vmatprep.subr.mxu1 %v1889_v43  ;;  %6226 = vmatpush3.msra.mxu0 %v1841_v44  ;;  %vm1187_vm15 = vcmp.eq.s32.totalorder %v667_v31, %v8042_v14  ;;  %v1848_v14 = vld [vmem:[%s7680_s30 + $0x288] sm:$0xff]  ;;  %v479_v43 = vld [vmem:[#allocation2 + $0x450] sm:$0xff]  ;;  %v8165_v44 = vrot.slane %v8010_v59, %v8138_v37  ;;  %vm1000_vm1 = vcmp.eq.s32.totalorder %v480_v40, %v8151_v39  ;;  %v1910_v55 = vld [vmem:[%s7680_s30 + $0x478] sm:$0xff] }
  0xcb   : > { %6270 = vmatpush3.msra.mxu1 %v1873_v45  ;;  %6227 = vmatprep.subr.mxu0 %v1856_v46  ;;  %v1864_v42 = vld [vmem:[%s7680_s30 + $0x308] sm:$0xff]  ;;  %v1847_v45 = vld [vmem:[%s7680_s30 + $0x280] sm:$0xff]  ;;  %vm999_vm2 = vcmp.eq.s32.totalorder %v479_v43, %v8157_v47  ;;  %v1942_v57 = vld [vmem:[%s7680_s30 + $0x578] sm:$0xff] }
  0xcc   : > { %6271 = vmatprep.subr.mxu1 %v1888_v48  ;;  %6228 = vmatpush3.msra.mxu0 %v1840_v49  ;;  %v1879_v46 = vld [vmem:[%s7680_s30 + $0x380] sm:$0xff]  ;;  %v482_v48 = vld [vmem:[#allocation2 + $0x448] sm:$0xff]  ;;  %v8171_v49 = vrot.slane %v8010_v59, %v8143_v6  ;;  %v1926_v59 = vld [vmem:[%s7680_s30 + $0x4f8] sm:$0xff] }
  0xcd   : > { %6272 = vmatpush3.msra.mxu1 %v1872_v50  ;;  %6229 = vmatprep.subr.mxu0 %v1855_v51  ;;  %v1831_v50 = vld [vmem:[%s7680_s30 + $0x200] sm:$0xff]  ;;  %v481_v51 = vld [vmem:[#allocation2 + $0x330] sm:$0xff]  ;;  %vm1002_vm3 = vcmp.eq.s32.totalorder %v482_v48, %v8165_v44  ;;  %v608_v9 = vld [vmem:[#allocation2 + $0xf8] sm:$0xff] }
  0xce   : > { %6273 = vmatprep.subr.mxu1 %v1887_v52  ;;  %6230 = vmatpush3.msra.mxu0 %v1839_v53  ;;  %v1863_v52 = vld [vmem:[%s7680_s30 + $0x300] sm:$0xff]  ;;  %v1958_v53 = vld [vmem:[%s7680_s30 + $0x5f8] sm:$0xff]  ;;  %vm1001_vm4 = vcmp.eq.s32.totalorder %v481_v51, %v8171_v49  ;;  %v1941_v3 = vld [vmem:[%s7680_s30 + $0x570] sm:$0xff] }
  0xcf   : > { %6274 = vmatpush3.msra.mxu1 %v1871_v54  ;;  %6231 = vmatprep.subr.mxu0 %v1854_v58  ;;  %v544_v54 = vld [vmem:[#allocation2 + $0x120] sm:$0xff]  ;;  %v543_v58 = vld [vmem:[#allocation2 + $0xb8] sm:$0xff]  ;;  %v1940_v11 = vld [vmem:[%s7680_s30 + $0x568] sm:$0xff] }
  0xd0   : > { %6275 = vmatprep.subr.mxu1 %v1886_v61  ;;  %6232 = vmatpush3.msra.mxu0 %v1838_v62  ;;  %v1925_v61 = vld [vmem:[%s7680_s30 + $0x4f0] sm:$0xff]  ;;  %v610_v18 = vld [vmem:[#allocation2 + $0x6a0] sm:$0xff]  ;;  %v672_v25 = vld [vmem:[#allocation2 + $0x548] sm:$0xff] }
  0xd1   : > { %6276 = vmatpush3.msra.mxu1 %v1870_v1  ;;  %5870 = vmatprep.mubr.msk.f32.mxu0 %vm1060_vm5, %v7618_v21  ;;  %v1957_v62 = vld [vmem:[%s7680_s30 + $0x5f0] sm:$0xff]  ;;  %vm1064_vm5 = vcmp.eq.s32.totalorder %v544_v54, %v8151_v39  ;;  %v1939_v19 = vld [vmem:[%s7680_s30 + $0x560] sm:$0xff]  ;;  %v1938_v26 = vld [vmem:[%s7680_s30 + $0x558] sm:$0xff] }
  0xd2   : > { %5878 = vmatprep.mubr.msk.f32.mxu1 %vm1062_vm6, %v7618_v21  ;;  %6233 = vmatprep.subr.mxu0 %v1853_v4  ;;  %v1909_v1 = vld [vmem:[%s7680_s30 + $0x470] sm:$0xff]  ;;  %vm1063_vm6 = vcmp.eq.s32.totalorder %v543_v58, %v8157_v47  ;;  %v1924_v4 = vld [vmem:[%s7680_s30 + $0x4e8] sm:$0xff]  ;;  %v674_v31 = vld [vmem:[#allocation2 + $0x780] sm:$0xff] }
  0xd3   : > { %6277 = vmatprep.subr.mxu1 %v1885_v5  ;;  %5871 = vmatmul.mubr.msk.f32.gmra.mxu0 %vm1059_vm7, %v7618_v21  ;;  %v1956_v5 = vld [vmem:[%s7680_s30 + $0x5e8] sm:$0xff]  ;;  %vm1066_vm7 = vcmp.eq.s32.totalorder %v546_v2, %v8165_v44  ;;  %v1937_v32 = vld [vmem:[%s7680_s30 + $0x550] sm:$0xff]  ;;  %v1903_v40 = vld [vmem:[%s7680_s30 + $0x440] sm:$0xff] }
  0xd4   : > { %5879 = vmatmul.mubr.msk.f32.gmra.mxu1 %vm1061_vm8, %v7618_v21  ;;  %6234 = vmatpush3.msra.mxu0 %v1837_v7  ;;  %v545_v7 = vld [vmem:[#allocation2 + $0xd0] sm:$0xff]  ;;  %v1902_v43 = vld [vmem:[%s7680_s30 + $0x438] sm:$0xff]  ;;  %v1948_v51 = vld [vmem:[%s7680_s30 + $0x5a8] sm:$0xff] }
  0xd5   : > { %6278 = vmatpush3.msra.mxu1 %v1869_v8  ;;  %6235 = vmatprep.subr.mxu0 %v1852_v12  ;;  %v1908_v8 = vld [vmem:[%s7680_s30 + $0x468] sm:$0xff]  ;;  %v1923_v12 = vld [vmem:[%s7680_s30 + $0x4e0] sm:$0xff]  ;;  %vm1065_vm8 = vcmp.eq.s32.totalorder %v545_v7, %v8171_v49  ;;  %v1901_v48 = vld [vmem:[%s7680_s30 + $0x430] sm:$0xff] }
  0xd6   : > { %6279 = vmatprep.subr.mxu1 %v1884_v13  ;;  %6236 = vmatpush3.msra.mxu0 %v1836_v16  ;;  %v607_v13 = vld [vmem:[#allocation2 + $0x2c8] sm:$0xff]  ;;  %v1955_v16 = vld [vmem:[%s7680_s30 + $0x5e0] sm:$0xff]  ;;  %v1914_v58 = vld [vmem:[%s7680_s30 + $0x498] sm:$0xff] }
  0xd7   : > { %6280 = vmatpush3.msra.mxu1 %v1868_v17  ;;  %5872 = vmatprep.mubr.msk.f32.mxu0 %vm1124_vm9, %v7618_v21  ;;  %vm1128_vm9 = vcmp.eq.s32.totalorder %v608_v9, %v8151_v39  ;;  %v1907_v17 = vld [vmem:[%s7680_s30 + $0x460] sm:$0xff]  ;;  %v1930_v2 = vld [vmem:[%s7680_s30 + $0x518] sm:$0xff]  ;;  %v1929_v7 = vld [vmem:[%s7680_s30 + $0x510] sm:$0xff] }
  0xd8   : > { %5880 = vmatprep.mubr.msk.f32.mxu1 %vm1126_vm10, %v7618_v21  ;;  %6237 = vmatprep.subr.mxu0 %v1851_v20  ;;  %vm1127_vm10 = vcmp.eq.s32.totalorder %v607_v13, %v8157_v47  ;;  %v1922_v20 = vld [vmem:[%s7680_s30 + $0x4d8] sm:$0xff]  ;;  %v1947_v54 = vld [vmem:[%s7680_s30 + $0x5a0] sm:$0xff]  ;;  %v1912_v9 = vld [vmem:[%s7680_s30 + $0x488] sm:$0xff] }
  0xd9   : > { %6281 = vmatprep.subr.mxu1 %v1883_v22  ;;  %5873 = vmatmul.mubr.msk.f32.gmra.mxu0 %vm1123_vm11, %v7618_v21  ;;  %v1954_v22 = vld [vmem:[%s7680_s30 + $0x5d8] sm:$0xff]  ;;  %vm1130_vm11 = vcmp.eq.s32.totalorder %v610_v18, %v8165_v44  ;;  %v483_v18 = vld [vmem:[#allocation2 + $0x380] sm:$0xff] }
  0xda   : > { %5881 = vmatmul.mubr.msk.f32.gmra.mxu1 %vm1125_vm12, %v7618_v21  ;;  %6238 = vmatpush3.msra.mxu0 %v1835_v23  ;;  %v609_v23 = vld [vmem:[#allocation2 + $0x488] sm:$0xff] }
  0xdb   : > { %6282 = vmatpush3.msra.mxu1 %v1867_v24  ;;  %6239 = vmatprep.subr.mxu0 %v1850_v27  ;;  %v1906_v24 = vld [vmem:[%s7680_s30 + $0x458] sm:$0xff]  ;;  %v1921_v27 = vld [vmem:[%s7680_s30 + $0x4d0] sm:$0xff]  ;;  %vm1129_vm12 = vcmp.eq.s32.totalorder %v609_v23, %v8171_v49 }
  0xdc   : > { %6283 = vmatprep.subr.mxu1 %v1882_v28  ;;  %6240 = vmatpush3.msra.mxu0 %v1834_v29  ;;  %v671_v28 = vld [vmem:[#allocation2 + $0x248] sm:$0xff]  ;;  %v1953_v29 = vld [vmem:[%s7680_s30 + $0x5d0] sm:$0xff]  ;;  %v486_v23 = vld [vmem:[#allocation2 + $0x498] sm:$0xff] }
  0xdd   : > { %6284 = vmatpush3.msra.mxu1 %v1866_v30  ;;  %5874 = vmatprep.mubr.msk.f32.mxu0 %vm1188_vm13, %v7618_v21  ;;  %vm1192_vm13 = vcmp.eq.s32.totalorder %v672_v25, %v8151_v39  ;;  %v1905_v30 = vld [vmem:[%s7680_s30 + $0x450] sm:$0xff]  ;;  %v1936_v39 = vld [vmem:[%s7680_s30 + $0x548] sm:$0xff]  ;;  %v1895_v25 = vld [vmem:[%s7680_s30 + $0x400] sm:$0xff] }
  0xde   : > { %5882 = vmatprep.mubr.msk.f32.mxu1 %vm1190_vm14, %v7618_v21  ;;  %6241 = vmatprep.subr.mxu0 %v1849_v35  ;;  %vm1191_vm14 = vcmp.eq.s32.totalorder %v671_v28, %v8157_v47  ;;  %v1920_v35 = vld [vmem:[%s7680_s30 + $0x4c8] sm:$0xff]  ;;  %v1935_v47 = vld [vmem:[%s7680_s30 + $0x540] sm:$0xff]  ;;  %v1990_v28 = vld [vmem:[%s7680_s30 + $0x6f8] sm:$0xff] }
  0xdf   : > { %6285 = vmatprep.subr.mxu1 %v1881_v36  ;;  %5875 = vmatmul.mubr.msk.f32.gmra.mxu0 %vm1187_vm15, %v7618_v21  ;;  %v1952_v36 = vld [vmem:[%s7680_s30 + $0x5c8] sm:$0xff]  ;;  %vm1194_vm15 = vcmp.eq.s32.totalorder %v674_v31, %v8165_v44  ;;  %v1934_v44 = vld [vmem:[%s7680_s30 + $0x538] sm:$0xff] }
  0xe0   : > { %5883 = vmatmul.mubr.msk.f32.gmra.mxu1 %vm1189_vm0, %v7618_v21  ;;  %6242 = vmatpush3.msra.mxu0 %v1833_v10  ;;  %v673_v10 = vld [vmem:[#allocation2 + $0x220] sm:$0xff]  ;;  %v1974_v31 = vld [vmem:[%s7680_s30 + $0x678] sm:$0xff] }
  0xe1   : > { %6286 = vmatpush3.msra.mxu1 %v1865_v38  ;;  %6243 = vmatprep.subr.mxu0 %v1848_v14  ;;  %v1904_v38 = vld [vmem:[%s7680_s30 + $0x448] sm:$0xff]  ;;  %v1919_v14 = vld [vmem:[%s7680_s30 + $0x4c0] sm:$0xff]  ;;  %vm1193_vm0 = vcmp.eq.s32.totalorder %v673_v10, %v8171_v49  ;;  %v1933_v49 = vld [vmem:[%s7680_s30 + $0x530] sm:$0xff] }
  0xe2   : > { %6287 = vmatprep.subr.mxu1 %v1880_v15  ;;  %6244 = vmatpush3.msra.mxu0 %v1832_v41  ;;  %v1951_v15 = vld [vmem:[%s7680_s30 + $0x5c0] sm:$0xff]  ;;  %v1918_v41 = vld [vmem:[%s7680_s30 + $0x4b8] sm:$0xff]  ;;  %v2021_v10 = vld [vmem:[%s7680_s30 + $0x7f0] sm:$0xff] }
  0xe3   : > { %6288 = vmatpush3.msra.mxu1 %v1864_v42  ;;  %6245 = vmatprep.subr.mxu0 %v1847_v45  ;;  %v1950_v42 = vld [vmem:[%s7680_s30 + $0x5b8] sm:$0xff]  ;;  %v1917_v45 = vld [vmem:[%s7680_s30 + $0x4b0] sm:$0xff] }
  0xe4   : > { %6289 = vmatprep.subr.mxu1 %v1879_v46  ;;  %6246 = vmatpush3.msra.mxu0 %v1831_v50  ;;  %v1949_v46 = vld [vmem:[%s7680_s30 + $0x5b0] sm:$0xff]  ;;  %v1916_v50 = vld [vmem:[%s7680_s30 + $0x4a8] sm:$0xff] }
  0xe5   : > { %5884 = vmatprep.mubr.msk.f32.mxu0 %vm1000_vm1, %v7618_v21  ;;  %6290 = vmatpush3.msra.mxu1 %v1863_v52  ;;  %v1900_v52 = vld [vmem:[%s7680_s30 + $0x428] sm:$0xff] }
  0xe6   : > { %5885 = vmatmul.mubr.msk.f32.vlgmr.msra.gmra.mxu0 %vm999_vm2, %v7618_v21  ;;  %5892 = vmatprep.mubr.msk.f32.mxu1 %vm1002_vm3, %v7618_v21 }
  0xe7   : > { %6303 = vmatprep.subr.mxu0 %v1926_v59  ;;  %6347 = vmatprep.subr.mxu1 %v1958_v53  ;;  %v1932_v59 = vld [vmem:[%s7680_s30 + $0x528] sm:$0xff]  ;;  %v1915_v53 = vld [vmem:[%s7680_s30 + $0x4a0] sm:$0xff] }
  0xe8   : > { %5893 = vmatmul.mubr.msk.f32.vlgmr.msra.gmra.mxu1 %vm1001_vm4, %v7618_v21  ;;  %6304 = vmatpush3.msra.mxu0 %v1910_v55  ;;  %v1899_v55 = vld [vmem:[%s7680_s30 + $0x420] sm:$0xff] }
  0xe9   : > { %6348 = vmatpush3.msra.mxu1 %v1942_v57  ;;  %6305 = vmatprep.subr.mxu0 %v1925_v61  ;;  %v1931_v57 = vld [vmem:[%s7680_s30 + $0x520] sm:$0xff]  ;;  %v1946_v61 = vld [vmem:[%s7680_s30 + $0x598] sm:$0xff] }
  0xea   : > { %6349 = vmatprep.subr.mxu1 %v1957_v62  ;;  %5886 = vmatprep.mubr.msk.f32.mxu0 %vm1064_vm5, %v7618_v21  ;;  %v8258_v62 = vld [vmem:[%s7670_s22 + $0x8] sm:$0xff] }
  0xeb   : > { %6306 = vmatpush3.msra.mxu0 %v1909_v1  ;;  %6350 = vmatpush3.msra.mxu1 %v1941_v3  ;;  %v1898_v1 = vld [vmem:[%s7680_s30 + $0x418] sm:$0xff]  ;;  %v1913_v3 = vld [vmem:[%s7680_s30 + $0x490] sm:$0xff]  ;;  %v8274_v13 = vrot.slane %v8258_v62, %v8018_v63 }
  0xec   : > { %5887 = vmatmul.mubr.msk.f32.gmra.mxu0 %vm1063_vm6, %v7618_v21  ;;  %6307 = vmatprep.subr.mxu0 %v1924_v4  ;;  %v1945_v4 = vld [vmem:[%s7680_s30 + $0x590] sm:$0xff] }
  0xed   : > { %6351 = vmatprep.subr.mxu1 %v1956_v5  ;;  %5894 = vmatprep.mubr.msk.f32.mxu1 %vm1066_vm7, %v7618_v21  ;;  %v1897_v5 = vld [vmem:[%s7680_s30 + $0x410] sm:$0xff]  ;;  %vm1003_vm2 = vcmp.eq.s32.totalorder %v483_v18, %v8274_v13  ;;  %v2014_v18 = vld [vmem:[%s7680_s30 + $0x7b8] sm:$0xff] }
  0xee   : > { %6308 = vmatpush3.msra.mxu0 %v1908_v8  ;;  %6352 = vmatpush3.msra.mxu1 %v1940_v11  ;;  %v8268_v8 = vrot.slane %v8258_v62, %v8005_v56  ;;  %v1944_v11 = vld [vmem:[%s7680_s30 + $0x588] sm:$0xff] }
  0xef   : > { %6309 = vmatprep.subr.mxu0 %v1923_v12  ;;  %5895 = vmatmul.mubr.msk.f32.gmra.mxu1 %vm1065_vm8, %v7618_v21  ;;  %v484_v12 = vld [vmem:[#allocation2 + $0x110] sm:$0xff] }
  0xf0   : > { %6353 = vmatprep.subr.mxu1 %v1955_v16  ;;  %5888 = vmatprep.mubr.msk.f32.mxu0 %vm1128_vm9, %v7618_v21  ;;  %v1896_v16 = vld [vmem:[%s7680_s30 + $0x408] sm:$0xff]  ;;  %vm1004_vm1 = vcmp.eq.s32.totalorder %v484_v12, %v8268_v8  ;;  %v2015_v12 = vld [vmem:[%s7680_s30 + $0x7c0] sm:$0xff] }
  0xf1   : > { %6310 = vmatpush3.msra.mxu0 %v1907_v17  ;;  %6354 = vmatpush3.msra.mxu1 %v1939_v19  ;;  %v1928_v17 = vld [vmem:[%s7680_s30 + $0x508] sm:$0xff]  ;;  %v8280_v19 = vrot.slane %v8258_v62, %v8013_v60 }
  0xf2   : > { %5889 = vmatmul.mubr.msk.f32.gmra.mxu0 %vm1127_vm10, %v7618_v21  ;;  %6311 = vmatprep.subr.mxu0 %v1922_v20  ;;  %v1911_v20 = vld [vmem:[%s7680_s30 + $0x480] sm:$0xff] }
  0xf3   : > { %6355 = vmatprep.subr.mxu1 %v1954_v22  ;;  %5896 = vmatprep.mubr.msk.f32.mxu1 %vm1130_vm11, %v7618_v21  ;;  %v1943_v22 = vld [vmem:[%s7680_s30 + $0x580] sm:$0xff]  ;;  %vm1006_vm3 = vcmp.eq.s32.totalorder %v486_v23, %v8280_v19  ;;  %v2013_v23 = vld [vmem:[%s7680_s30 + $0x7b0] sm:$0xff] }
  0xf4   : > { %6312 = vmatpush3.msra.mxu0 %v1906_v24  ;;  %6356 = vmatpush3.msra.mxu1 %v1938_v26  ;;  %v8286_v24 = vrot.slane %v8258_v62, %v8021_v0  ;;  %v485_v26 = vld [vmem:[#allocation2 + $0x518] sm:$0xff] }
  0xf5   : > { %6313 = vmatprep.subr.mxu0 %v1921_v27  ;;  %5897 = vmatmul.mubr.msk.f32.gmra.mxu1 %vm1129_vm12, %v7618_v21  ;;  %v1927_v27 = vld [vmem:[%s7680_s30 + $0x500] sm:$0xff] }
  0xf6   : > { %6357 = vmatprep.subr.mxu1 %v1953_v29  ;;  %5890 = vmatprep.mubr.msk.f32.mxu0 %vm1192_vm13, %v7618_v21  ;;  %v2022_v29 = vld [vmem:[%s7680_s30 + $0x7f8] sm:$0xff]  ;;  %vm1005_vm4 = vcmp.eq.s32.totalorder %v485_v26, %v8286_v24  ;;  %v1980_v26 = vld [vmem:[%s7680_s30 + $0x6a8] sm:$0xff] }
  0xf7   : > { %6314 = vmatpush3.msra.mxu0 %v1905_v30  ;;  %6358 = vmatpush3.msra.mxu1 %v1937_v32  ;;  %v548_v30 = vld [vmem:[#allocation2 + $0x2f8] sm:$0xff] }
  0xf8   : > { %5891 = vmatmul.mubr.msk.f32.gmra.mxu0 %vm1191_vm14, %v7618_v21  ;;  %6315 = vmatprep.subr.mxu0 %v1920_v35  ;;  %v2006_v32 = vld [vmem:[%s7680_s30 + $0x778] sm:$0xff]  ;;  %v547_v35 = vld [vmem:[#allocation2 + $0x6f0] sm:$0xff]  ;;  %vm1068_vm5 = vcmp.eq.s32.totalorder %v548_v30, %v8268_v8  ;;  %v1979_v30 = vld [vmem:[%s7680_s30 + $0x6a0] sm:$0xff] }
  0xf9   : > { %6359 = vmatprep.subr.mxu1 %v1952_v36  ;;  %5898 = vmatprep.mubr.msk.f32.mxu1 %vm1194_vm15, %v7618_v21  ;;  %v1989_v36 = vld [vmem:[%s7680_s30 + $0x6f0] sm:$0xff]  ;;  %vm1067_vm6 = vcmp.eq.s32.totalorder %v547_v35, %v8274_v13  ;;  %v1995_v35 = vld [vmem:[%s7680_s30 + $0x720] sm:$0xff] }
  0xfa   : > { %6316 = vmatpush3.msra.mxu0 %v1904_v38  ;;  %6360 = vmatpush3.msra.mxu1 %v1936_v39  ;;  %v1973_v38 = vld [vmem:[%s7680_s30 + $0x670] sm:$0xff]  ;;  %v550_v39 = vld [vmem:[#allocation2 + $0x178] sm:$0xff] }
  0xfb   : > { %6317 = vmatprep.subr.mxu0 %v1919_v14  ;;  %5899 = vmatmul.mubr.msk.f32.gmra.mxu1 %vm1193_vm0, %v7618_v21  ;;  %v2005_v14 = vld [vmem:[%s7680_s30 + $0x770] sm:$0xff]  ;;  %vm1070_vm7 = vcmp.eq.s32.totalorder %v550_v39, %v8280_v19  ;;  %v1994_v39 = vld [vmem:[%s7680_s30 + $0x718] sm:$0xff] }
  0xfc   : > { %6361 = vmatprep.subr.mxu1 %v1951_v15  ;;  %6318 = vmatpush3.msra.mxu0 %v1903_v40  ;;  %v1988_v15 = vld [vmem:[%s7680_s30 + $0x6e8] sm:$0xff] }
  0xfd   : > { %6362 = vmatpush3.msra.mxu1 %v1935_v47  ;;  %6319 = vmatprep.subr.mxu0 %v1918_v41  ;;  %v2020_v40 = vld [vmem:[%s7680_s30 + $0x7e8] sm:$0xff]  ;;  %v549_v47 = vld [vmem:[#allocation2 + $0x758] sm:$0xff] }
  0xfe   : > { %6363 = vmatprep.subr.mxu1 %v1950_v42  ;;  %6320 = vmatpush3.msra.mxu0 %v1902_v43  ;;  %v1972_v41 = vld [vmem:[%s7680_s30 + $0x668] sm:$0xff]  ;;  %vm1069_vm8 = vcmp.eq.s32.totalorder %v549_v47, %v8286_v24  ;;  %v1993_v47 = vld [vmem:[%s7680_s30 + $0x710] sm:$0xff] }
  0xff   : > { %6364 = vmatpush3.msra.mxu1 %v1934_v44  ;;  %6321 = vmatprep.subr.mxu0 %v1917_v45  ;;  %v612_v42 = vld [vmem:[#allocation2 + $0x1e8] sm:$0xff]  ;;  %v1987_v44 = vld [vmem:[%s7680_s30 + $0x6e0] sm:$0xff] }
 0x100   : > { %6365 = vmatprep.subr.mxu1 %v1949_v46  ;;  %6322 = vmatpush3.msra.mxu0 %v1901_v48  ;;  %v2004_v43 = vld [vmem:[%s7680_s30 + $0x768] sm:$0xff]  ;;  %v2019_v46 = vld [vmem:[%s7680_s30 + $0x7e0] sm:$0xff]  ;;  %vm1132_vm9 = vcmp.eq.s32.totalorder %v612_v42, %v8268_v8 }
 0x101   : > { %6366 = vmatpush3.msra.mxu1 %v1933_v49  ;;  %6323 = vmatprep.subr.mxu0 %v1916_v50  ;;  %v611_v45 = vld [vmem:[#allocation2 + $0x3c8] sm:$0xff]  ;;  %v1971_v48 = vld [vmem:[%s7680_s30 + $0x660] sm:$0xff] }
 0x102   : > { %6367 = vmatprep.subr.mxu1 %v1948_v51  ;;  %6324 = vmatpush3.msra.mxu0 %v1900_v52  ;;  %v614_v49 = vld [vmem:[#allocation2 + $0x688] sm:$0xff]  ;;  %v2003_v50 = vld [vmem:[%s7680_s30 + $0x760] sm:$0xff]  ;;  %vm1131_vm10 = vcmp.eq.s32.totalorder %v611_v45, %v8274_v13  ;;  %v1986_v51 = vld [vmem:[%s7680_s30 + $0x6d8] sm:$0xff]  ;;  %v8386_v45 = vrot.slane %v8258_v62, %v8133_v34 }
 0x103   : > { %6368 = vmatpush3.msra.mxu1 %v1932_v59  ;;  %6325 = vmatprep.subr.mxu0 %v1915_v53  ;;  %v2018_v52 = vld [vmem:[%s7680_s30 + $0x7d8] sm:$0xff]  ;;  %v613_v59 = vld [vmem:[#allocation2 + $0x6d0] sm:$0xff]  ;;  %vm1134_vm11 = vcmp.eq.s32.totalorder %v614_v49, %v8280_v19  ;;  %v1976_v42 = vld [vmem:[%s7680_s30 + $0x688] sm:$0xff] }
 0x104   : > { %6369 = vmatprep.subr.mxu1 %v1947_v54  ;;  %6326 = vmatpush3.msra.mxu0 %v1899_v55  ;;  %v1970_v53 = vld [vmem:[%s7680_s30 + $0x658] sm:$0xff]  ;;  %v676_v54 = vld [vmem:[#allocation2 + $0x8] sm:$0xff]  ;;  %vm1133_vm12 = vcmp.eq.s32.totalorder %v613_v59, %v8286_v24  ;;  %v487_v49 = vld [vmem:[#allocation2 + $0x320] sm:$0xff] }
 0x105   : > { %6370 = vmatpush3.msra.mxu1 %v1931_v57  ;;  %6327 = vmatprep.subr.mxu0 %v1914_v58  ;;  %v2002_v55 = vld [vmem:[%s7680_s30 + $0x758] sm:$0xff]  ;;  %v1985_v57 = vld [vmem:[%s7680_s30 + $0x6d0] sm:$0xff]  ;;  %v675_v58 = vld [vmem:[#allocation2 + $0x708] sm:$0xff]  ;;  %vm1196_vm13 = vcmp.eq.s32.totalorder %v676_v54, %v8268_v8 }
 0x106   : > { %6371 = vmatprep.subr.mxu1 %v1946_v61  ;;  %6328 = vmatpush3.msra.mxu0 %v1898_v1  ;;  %v2017_v61 = vld [vmem:[%s7680_s30 + $0x7d0] sm:$0xff]  ;;  %vm1195_vm14 = vcmp.eq.s32.totalorder %v675_v58, %v8274_v13  ;;  %v1968_v8 = vld [vmem:[%s7680_s30 + $0x648] sm:$0xff]  ;;  %v1967_v13 = vld [vmem:[%s7680_s30 + $0x640] sm:$0xff] }
 0x107   : > { %6372 = vmatpush3.msra.mxu1 %v1930_v2  ;;  %6329 = vmatprep.subr.mxu0 %v1913_v3  ;;  %v1969_v1 = vld [vmem:[%s7680_s30 + $0x650] sm:$0xff]  ;;  %v490_v59 = vld [vmem:[#allocation2 + $0x720] sm:$0xff]  ;;  %v2086_v58 = vld [vmem:[%s7680_s30 + $0x9f8] sm:$0xff] }
 0x108   : > { %6373 = vmatprep.subr.mxu1 %v1945_v4  ;;  %6330 = vmatpush3.msra.mxu0 %v1897_v5  ;;  %v678_v2 = vld [vmem:[#allocation2 + $0x170] sm:$0xff]  ;;  %v1984_v4 = vld [vmem:[%s7680_s30 + $0x6c8] sm:$0xff]  ;;  %v1959_v54 = vld [vmem:[%s7680_s30 + $0x600] sm:$0xff] }
 0x109   : > { %6374 = vmatpush3.msra.mxu1 %v1929_v7  ;;  %6331 = vmatprep.subr.mxu0 %v1912_v9  ;;  %v2001_v3 = vld [vmem:[%s7680_s30 + $0x750] sm:$0xff]  ;;  %v2016_v5 = vld [vmem:[%s7680_s30 + $0x7c8] sm:$0xff]  ;;  %vm1198_vm15 = vcmp.eq.s32.totalorder %v678_v2, %v8280_v19  ;;  %v1966_v19 = vld [vmem:[%s7680_s30 + $0x638] sm:$0xff] }
 0x10a   : > { %6375 = vmatprep.subr.mxu1 %v1944_v11  ;;  %6332 = vmatpush3.msra.mxu0 %v1896_v16  ;;  %v677_v7 = vld [vmem:[#allocation2 + $0x428] sm:$0xff]  ;;  %v1983_v11 = vld [vmem:[%s7680_s30 + $0x6c0] sm:$0xff]  ;;  %v2070_v2 = vld [vmem:[%s7680_s30 + $0x978] sm:$0xff] }
 0x10b   : > { %6376 = vmatpush3.msra.mxu1 %v1928_v17  ;;  %6333 = vmatprep.subr.mxu0 %v1911_v20  ;;  %v2000_v9 = vld [vmem:[%s7680_s30 + $0x748] sm:$0xff]  ;;  %vm1197_vm0 = vcmp.eq.s32.totalorder %v677_v7, %v8286_v24  ;;  %v1999_v16 = vld [vmem:[%s7680_s30 + $0x740] sm:$0xff]  ;;  %v1982_v17 = vld [vmem:[%s7680_s30 + $0x6b8] sm:$0xff] }
 0x10c   : > { %6377 = vmatprep.subr.mxu1 %v1943_v22  ;;  %6334 = vmatpush3.msra.mxu0 %v1895_v25  ;;  %v1998_v20 = vld [vmem:[%s7680_s30 + $0x738] sm:$0xff]  ;;  %v1981_v22 = vld [vmem:[%s7680_s30 + $0x6b0] sm:$0xff] }
 0x10d   : > { %5900 = vmatprep.mubr.msk.f32.mxu0 %vm1004_vm1, %v7618_v21  ;;  %6378 = vmatpush3.msra.mxu1 %v1927_v27  ;;  %v1965_v24 = vld [vmem:[%s7680_s30 + $0x630] sm:$0xff]  ;;  %v2012_v27 = vld [vmem:[%s7680_s30 + $0x7a8] sm:$0xff] }
 0x10e   : > { %5901 = vmatmul.mubr.msk.f32.vlgmr.msra.gmra.mxu0 %vm1003_vm2, %v7618_v21  ;;  %5908 = vmatprep.mubr.msk.f32.mxu1 %vm1006_vm3, %v7618_v21  ;;  %v1997_v25 = vld [vmem:[%s7680_s30 + $0x730] sm:$0xff]  ;;  %vm1007_vm2 = vcmp.eq.s32.totalorder %v487_v49, %v8386_v45  ;;  %v2030_v49 = vld [vmem:[%s7680_s30 + $0x838] sm:$0xff] }
 0x10f   : > { %6391 = vmatprep.subr.mxu0 %v1990_v28  ;;  %6435 = vmatprep.subr.mxu1 %v2022_v29  ;;  %v1964_v28 = vld [vmem:[%s7680_s30 + $0x628] sm:$0xff]  ;;  %v2037_v7 = vld [vmem:[%s7680_s30 + $0x870] sm:$0xff] }
 0x110   : > { %5909 = vmatmul.mubr.msk.f32.vlgmr.msra.gmra.mxu1 %vm1005_vm4, %v7618_v21  ;;  %6392 = vmatpush3.msra.mxu0 %v1974_v31  ;;  %v1996_v29 = vld [vmem:[%s7680_s30 + $0x728] sm:$0xff]  ;;  %v2011_v31 = vld [vmem:[%s7680_s30 + $0x7a0] sm:$0xff] }
 0x111   : > { %6436 = vmatpush3.msra.mxu1 %v2006_v32  ;;  %6393 = vmatprep.subr.mxu0 %v1989_v36  ;;  %v1963_v32 = vld [vmem:[%s7680_s30 + $0x620] sm:$0xff]  ;;  %v1978_v36 = vld [vmem:[%s7680_s30 + $0x698] sm:$0xff] }
 0x112   : > { %6437 = vmatprep.subr.mxu1 %v2021_v10  ;;  %5902 = vmatprep.mubr.msk.f32.mxu0 %vm1068_vm5, %v7618_v21  ;;  %v2010_v10 = vld [vmem:[%s7680_s30 + $0x798] sm:$0xff] }
 0x113   : > { %6394 = vmatpush3.msra.mxu0 %v1973_v38  ;;  %6438 = vmatpush3.msra.mxu1 %v2005_v14  ;;  %v1962_v38 = vld [vmem:[%s7680_s30 + $0x618] sm:$0xff]  ;;  %v1977_v14 = vld [vmem:[%s7680_s30 + $0x690] sm:$0xff] }
 0x114   : > { %5903 = vmatmul.mubr.msk.f32.gmra.mxu0 %vm1067_vm6, %v7618_v21  ;;  %6395 = vmatprep.subr.mxu0 %v1988_v15  ;;  %v2009_v15 = vld [vmem:[%s7680_s30 + $0x790] sm:$0xff] }
 0x115   : > { %6439 = vmatprep.subr.mxu1 %v2020_v40  ;;  %5910 = vmatprep.mubr.msk.f32.mxu1 %vm1070_vm7, %v7618_v21  ;;  %v1961_v40 = vld [vmem:[%s7680_s30 + $0x610] sm:$0xff] }
 0x116   : > { %6396 = vmatpush3.msra.mxu0 %v1972_v41  ;;  %6440 = vmatpush3.msra.mxu1 %v2004_v43  ;;  %v8380_v41 = vrot.slane %v8258_v62, %v8128_v33  ;;  %v2008_v43 = vld [vmem:[%s7680_s30 + $0x788] sm:$0xff] }
 0x117   : > { %6397 = vmatprep.subr.mxu0 %v1987_v44  ;;  %5911 = vmatmul.mubr.msk.f32.gmra.mxu1 %vm1069_vm8, %v7618_v21  ;;  %v488_v44 = vld [vmem:[#allocation2 + $0x550] sm:$0xff] }
 0x118   : > { %6441 = vmatprep.subr.mxu1 %v2019_v46  ;;  %5904 = vmatprep.mubr.msk.f32.mxu0 %vm1132_vm9, %v7618_v21  ;;  %v1960_v46 = vld [vmem:[%s7680_s30 + $0x608] sm:$0xff]  ;;  %vm1008_vm1 = vcmp.eq.s32.totalorder %v488_v44, %v8380_v41  ;;  %v2031_v44 = vld [vmem:[%s7680_s30 + $0x840] sm:$0xff] }
 0x119   : > { %6398 = vmatpush3.msra.mxu0 %v1971_v48  ;;  %6442 = vmatpush3.msra.mxu1 %v2003_v50  ;;  %v1992_v48 = vld [vmem:[%s7680_s30 + $0x708] sm:$0xff]  ;;  %v8392_v50 = vrot.slane %v8258_v62, %v8138_v37 }
 0x11a   : > { %5905 = vmatmul.mubr.msk.f32.gmra.mxu0 %vm1131_vm10, %v7618_v21  ;;  %6399 = vmatprep.subr.mxu0 %v1986_v51  ;;  %v1975_v51 = vld [vmem:[%s7680_s30 + $0x680] sm:$0xff] }
 0x11b   : > { %6443 = vmatprep.subr.mxu1 %v2018_v52  ;;  %5912 = vmatprep.mubr.msk.f32.mxu1 %vm1134_vm11, %v7618_v21  ;;  %v2007_v52 = vld [vmem:[%s7680_s30 + $0x780] sm:$0xff]  ;;  %vm1010_vm3 = vcmp.eq.s32.totalorder %v490_v59, %v8392_v50  ;;  %v2029_v59 = vld [vmem:[%s7680_s30 + $0x830] sm:$0xff] }
 0x11c   : > { %6400 = vmatpush3.msra.mxu0 %v1970_v53  ;;  %6444 = vmatpush3.msra.mxu1 %v2002_v55  ;;  %v8398_v53 = vrot.slane %v8258_v62, %v8143_v6  ;;  %v489_v55 = vld [vmem:[#allocation2 + $0x508] sm:$0xff]  ;;  %v2054_v62 = vld [vmem:[%s7680_s30 + $0x8f8] sm:$0xff] }
 0x11d   : > { %6401 = vmatprep.subr.mxu0 %v1985_v57  ;;  %5913 = vmatmul.mubr.msk.f32.gmra.mxu1 %vm1133_vm12, %v7618_v21  ;;  %v1991_v57 = vld [vmem:[%s7680_s30 + $0x700] sm:$0xff] }
 0x11e   : > { %6445 = vmatprep.subr.mxu1 %v2017_v61  ;;  %5906 = vmatprep.mubr.msk.f32.mxu0 %vm1196_vm13, %v7618_v21  ;;  %vm1009_vm4 = vcmp.eq.s32.totalorder %v489_v55, %v8398_v53  ;;  %v552_v61 = vld [vmem:[#allocation2 + $0x598] sm:$0xff]  ;;  %v2076_v55 = vld [vmem:[%s7680_s30 + $0x9a8] sm:$0xff] }
 0x11f   : > { %6402 = vmatpush3.msra.mxu0 %v1969_v1  ;;  %6446 = vmatpush3.msra.mxu1 %v2001_v3  ;;  %v2038_v1 = vld [vmem:[%s7680_s30 + $0x878] sm:$0xff]  ;;  %vm1072_vm5 = vcmp.eq.s32.totalorder %v552_v61, %v8380_v41  ;;  %v2075_v61 = vld [vmem:[%s7680_s30 + $0x9a0] sm:$0xff] }
 0x120   : > { %5907 = vmatmul.mubr.msk.f32.gmra.mxu0 %vm1195_vm14, %v7618_v21  ;;  %6403 = vmatprep.subr.mxu0 %v1984_v4  ;;  %v551_v3 = vld [vmem:[#allocation2 + $0x738] sm:$0xff]  ;;  %v2053_v4 = vld [vmem:[%s7680_s30 + $0x8f0] sm:$0xff] }
 0x121   : > { %6447 = vmatprep.subr.mxu1 %v2016_v5  ;;  %5914 = vmatprep.mubr.msk.f32.mxu1 %vm1198_vm15, %v7618_v21  ;;  %v2085_v5 = vld [vmem:[%s7680_s30 + $0x9f0] sm:$0xff]  ;;  %vm1071_vm6 = vcmp.eq.s32.totalorder %v551_v3, %v8386_v45  ;;  %v2042_v3 = vld [vmem:[%s7680_s30 + $0x898] sm:$0xff] }
 0x122   : > { %6404 = vmatpush3.msra.mxu0 %v1968_v8  ;;  %6448 = vmatpush3.msra.mxu1 %v2000_v9  ;;  %v554_v8 = vld [vmem:[#allocation2 + $0x6d8] sm:$0xff]  ;;  %v2069_v9 = vld [vmem:[%s7680_s30 + $0x970] sm:$0xff] }
 0x123   : > { %6405 = vmatprep.subr.mxu0 %v1983_v11  ;;  %5915 = vmatmul.mubr.msk.f32.gmra.mxu1 %vm1197_vm0, %v7618_v21  ;;  %v2052_v11 = vld [vmem:[%s7680_s30 + $0x8e8] sm:$0xff]  ;;  %vm1074_vm7 = vcmp.eq.s32.totalorder %v554_v8, %v8392_v50  ;;  %v2058_v8 = vld [vmem:[%s7680_s30 + $0x918] sm:$0xff] }
 0x124   : > { %6449 = vmatprep.subr.mxu1 %v2015_v12  ;;  %6406 = vmatpush3.msra.mxu0 %v1967_v13  ;;  %v2084_v12 = vld [vmem:[%s7680_s30 + $0x9e8] sm:$0xff]  ;;  %v553_v13 = vld [vmem:[#allocation2 + $0x7d8] sm:$0xff] }
 0x125   : > { %6450 = vmatpush3.msra.mxu1 %v1999_v16  ;;  %6407 = vmatprep.subr.mxu0 %v1982_v17  ;;  %v2036_v16 = vld [vmem:[%s7680_s30 + $0x868] sm:$0xff]  ;;  %v616_v17 = vld [vmem:[#allocation2 + $0x658] sm:$0xff]  ;;  %vm1073_vm8 = vcmp.eq.s32.totalorder %v553_v13, %v8398_v53  ;;  %v2057_v13 = vld [vmem:[%s7680_s30 + $0x910] sm:$0xff] }
 0x126   : > { %6451 = vmatprep.subr.mxu1 %v2014_v18  ;;  %6408 = vmatpush3.msra.mxu0 %v1966_v19  ;;  %v2068_v18 = vld [vmem:[%s7680_s30 + $0x968] sm:$0xff]  ;;  %v2051_v19 = vld [vmem:[%s7680_s30 + $0x8e0] sm:$0xff]  ;;  %vm1136_vm9 = vcmp.eq.s32.totalorder %v616_v17, %v8380_v41 }
 0x127   : > { %6452 = vmatpush3.msra.mxu1 %v1998_v20  ;;  %6409 = vmatprep.subr.mxu0 %v1981_v22  ;;  %v615_v20 = vld [vmem:[#allocation2 + $0x730] sm:$0xff]  ;;  %v2083_v22 = vld [vmem:[%s7680_s30 + $0x9e0] sm:$0xff]  ;;  %v2040_v17 = vld [vmem:[%s7680_s30 + $0x888] sm:$0xff] }
 0x128   : > { %6453 = vmatprep.subr.mxu1 %v2013_v23  ;;  %6410 = vmatpush3.msra.mxu0 %v1965_v24  ;;  %v2035_v23 = vld [vmem:[%s7680_s30 + $0x860] sm:$0xff]  ;;  %v618_v24 = vld [vmem:[#allocation2 + $0x1b8] sm:$0xff]  ;;  %vm1135_vm10 = vcmp.eq.s32.totalorder %v615_v20, %v8386_v45 }
 0x129   : > { %6454 = vmatpush3.msra.mxu1 %v1997_v25  ;;  %6411 = vmatprep.subr.mxu0 %v1980_v26  ;;  %v2067_v25 = vld [vmem:[%s7680_s30 + $0x960] sm:$0xff]  ;;  %v2050_v26 = vld [vmem:[%s7680_s30 + $0x8d8] sm:$0xff]  ;;  %vm1138_vm11 = vcmp.eq.s32.totalorder %v618_v24, %v8392_v50 }
 0x12a   : > { %6455 = vmatprep.subr.mxu1 %v2012_v27  ;;  %6412 = vmatpush3.msra.mxu0 %v1964_v28  ;;  %v2082_v27 = vld [vmem:[%s7680_s30 + $0x9d8] sm:$0xff]  ;;  %v491_v24 = vld [vmem:[#allocation2 + $0x6e0] sm:$0xff] }
 0x12b   : > { %6456 = vmatpush3.msra.mxu1 %v1996_v29  ;;  %6413 = vmatprep.subr.mxu0 %v1979_v30  ;;  %v617_v28 = vld [vmem:[#allocation2 + $0x458] sm:$0xff]  ;;  %v680_v30 = vld [vmem:[#allocation2 + $0x20] sm:$0xff] }
 0x12c   : > { %6457 = vmatprep.subr.mxu1 %v2011_v31  ;;  %6414 = vmatpush3.msra.mxu0 %v1963_v32  ;;  %v2034_v29 = vld [vmem:[%s7680_s30 + $0x858] sm:$0xff]  ;;  %v2049_v32 = vld [vmem:[%s7680_s30 + $0x8d0] sm:$0xff]  ;;  %vm1137_vm12 = vcmp.eq.s32.totalorder %v617_v28, %v8398_v53  ;;  %vm1200_vm13 = vcmp.eq.s32.totalorder %v680_v30, %v8380_v41  ;;  %v2064_v41 = vld [vmem:[%s7680_s30 + $0x948] sm:$0xff] }
 0x12d   : > { %6458 = vmatpush3.msra.mxu1 %v1995_v35  ;;  %6415 = vmatprep.subr.mxu0 %v1978_v36  ;;  %v2066_v31 = vld [vmem:[%s7680_s30 + $0x958] sm:$0xff]  ;;  %v679_v35 = vld [vmem:[#allocation2 + $0x7e0] sm:$0xff]  ;;  %v2081_v36 = vld [vmem:[%s7680_s30 + $0x9d0] sm:$0xff] }
 0x12e   : > { %6459 = vmatprep.subr.mxu1 %v2010_v10  ;;  %6416 = vmatpush3.msra.mxu0 %v1962_v38  ;;  %v2033_v10 = vld [vmem:[%s7680_s30 + $0x850] sm:$0xff]  ;;  %v682_v38 = vld [vmem:[#allocation2 + $0x88] sm:$0xff]  ;;  %vm1199_vm14 = vcmp.eq.s32.totalorder %v679_v35, %v8386_v45  ;;  %v2063_v45 = vld [vmem:[%s7680_s30 + $0x940] sm:$0xff] }
 0x12f   : > { %6460 = vmatpush3.msra.mxu1 %v1994_v39  ;;  %6417 = vmatprep.subr.mxu0 %v1977_v14  ;;  %v2065_v39 = vld [vmem:[%s7680_s30 + $0x950] sm:$0xff]  ;;  %v2048_v14 = vld [vmem:[%s7680_s30 + $0x8c8] sm:$0xff]  ;;  %vm1202_vm15 = vcmp.eq.s32.totalorder %v682_v38, %v8392_v50  ;;  %v2062_v50 = vld [vmem:[%s7680_s30 + $0x938] sm:$0xff] }
 0x130   : > { %6461 = vmatprep.subr.mxu1 %v2009_v15  ;;  %6418 = vmatpush3.msra.mxu0 %v1961_v40  ;;  %v2080_v15 = vld [vmem:[%s7680_s30 + $0x9c8] sm:$0xff]  ;;  %v494_v28 = vld [vmem:[#allocation2 + $0x740] sm:$0xff]  ;;  %v2118_v35 = vld [vmem:[%s7680_s30 + $0xaf8] sm:$0xff] }
 0x131   : > { %6462 = vmatpush3.msra.mxu1 %v1993_v47  ;;  %6419 = vmatprep.subr.mxu0 %v1976_v42  ;;  %v681_v40 = vld [vmem:[#allocation2 + $0x308] sm:$0xff]  ;;  %v2047_v42 = vld [vmem:[%s7680_s30 + $0x8c0] sm:$0xff]  ;;  %v2102_v38 = vld [vmem:[%s7680_s30 + $0xa78] sm:$0xff] }
 0x132   : > { %6463 = vmatprep.subr.mxu1 %v2008_v43  ;;  %6420 = vmatpush3.msra.mxu0 %v1960_v46  ;;  %v2032_v47 = vld [vmem:[%s7680_s30 + $0x848] sm:$0xff]  ;;  %vm1201_vm0 = vcmp.eq.s32.totalorder %v681_v40, %v8398_v53  ;;  %v2079_v43 = vld [vmem:[%s7680_s30 + $0x9c0] sm:$0xff]  ;;  %v2046_v46 = vld [vmem:[%s7680_s30 + $0x8b8] sm:$0xff] }
 0x133   : > { %6464 = vmatpush3.msra.mxu1 %v1992_v48  ;;  %6421 = vmatprep.subr.mxu0 %v1975_v51  ;;  %v2078_v48 = vld [vmem:[%s7680_s30 + $0x9b8] sm:$0xff]  ;;  %v2045_v51 = vld [vmem:[%s7680_s30 + $0x8b0] sm:$0xff]  ;;  %v2023_v30 = vld [vmem:[%s7680_s30 + $0x800] sm:$0xff] }
 0x134   : > { %6465 = vmatprep.subr.mxu1 %v2007_v52  ;;  %6422 = vmatpush3.msra.mxu0 %v1959_v54  ;;  %v2077_v52 = vld [vmem:[%s7680_s30 + $0x9b0] sm:$0xff]  ;;  %v2044_v54 = vld [vmem:[%s7680_s30 + $0x8a8] sm:$0xff] }
 0x135   : > { %5916 = vmatprep.mubr.msk.f32.mxu0 %vm1008_vm1, %v7618_v21  ;;  %6466 = vmatpush3.msra.mxu1 %v1991_v57  ;;  %v2061_v53 = vld [vmem:[%s7680_s30 + $0x930] sm:$0xff]  ;;  %v2028_v57 = vld [vmem:[%s7680_s30 + $0x828] sm:$0xff] }
 0x136   : > { %5917 = vmatmul.mubr.msk.f32.vlgmr.msra.gmra.mxu0 %vm1007_vm2, %v7618_v21  ;;  %5924 = vmatprep.mubr.msk.f32.mxu1 %vm1010_vm3, %v7618_v21  ;;  %v2149_v40 = vld [vmem:[%s7680_s30 + $0xbf0] sm:$0xff] }
 0x137   : > { %6479 = vmatprep.subr.mxu0 %v2054_v62  ;;  %6523 = vmatprep.subr.mxu1 %v2086_v58  ;;  %v2060_v62 = vld [vmem:[%s7680_s30 + $0x928] sm:$0xff]  ;;  %v2043_v58 = vld [vmem:[%s7680_s30 + $0x8a0] sm:$0xff] }
 0x138   : > { %5925 = vmatmul.mubr.msk.f32.vlgmr.msra.gmra.mxu1 %vm1009_vm4, %v7618_v21  ;;  %6480 = vmatpush3.msra.mxu0 %v2038_v1  ;;  %v2027_v1 = vld [vmem:[%s7680_s30 + $0x820] sm:$0xff] }
 0x139   : > { %6524 = vmatpush3.msra.mxu1 %v2070_v2  ;;  %6481 = vmatprep.subr.mxu0 %v2053_v4  ;;  %v2059_v2 = vld [vmem:[%s7680_s30 + $0x920] sm:$0xff]  ;;  %v2074_v4 = vld [vmem:[%s7680_s30 + $0x998] sm:$0xff] }
 0x13a   : > { %6525 = vmatprep.subr.mxu1 %v2085_v5  ;;  %5918 = vmatprep.mubr.msk.f32.mxu0 %vm1072_vm5, %v7618_v21  ;;  %v8485_v5 = vld [vmem:[%s7670_s22 + $0x10] sm:$0xff] }
 0x13b   : > { %6482 = vmatpush3.msra.mxu0 %v2037_v7  ;;  %6526 = vmatpush3.msra.mxu1 %v2069_v9  ;;  %v2026_v7 = vld [vmem:[%s7680_s30 + $0x818] sm:$0xff]  ;;  %v2041_v9 = vld [vmem:[%s7680_s30 + $0x890] sm:$0xff]  ;;  %v8501_v20 = vrot.slane %v8485_v5, %v8018_v63 }
 0x13c   : > { %5919 = vmatmul.mubr.msk.f32.gmra.mxu0 %vm1071_vm6, %v7618_v21  ;;  %6483 = vmatprep.subr.mxu0 %v2052_v11  ;;  %v2073_v11 = vld [vmem:[%s7680_s30 + $0x990] sm:$0xff] }
 0x13d   : > { %6527 = vmatprep.subr.mxu1 %v2084_v12  ;;  %5926 = vmatprep.mubr.msk.f32.mxu1 %vm1074_vm7, %v7618_v21  ;;  %v2025_v12 = vld [vmem:[%s7680_s30 + $0x810] sm:$0xff]  ;;  %vm1011_vm2 = vcmp.eq.s32.totalorder %v491_v24, %v8501_v20  ;;  %v2142_v24 = vld [vmem:[%s7680_s30 + $0xbb8] sm:$0xff] }
 0x13e   : > { %6484 = vmatpush3.msra.mxu0 %v2036_v16  ;;  %6528 = vmatpush3.msra.mxu1 %v2068_v18  ;;  %v8495_v16 = vrot.slane %v8485_v5, %v8005_v56  ;;  %v2072_v18 = vld [vmem:[%s7680_s30 + $0x988] sm:$0xff] }
 0x13f   : > { %6485 = vmatprep.subr.mxu0 %v2051_v19  ;;  %5927 = vmatmul.mubr.msk.f32.gmra.mxu1 %vm1073_vm8, %v7618_v21  ;;  %v492_v19 = vld [vmem:[#allocation2 + $0x788] sm:$0xff] }
 0x140   : > { %6529 = vmatprep.subr.mxu1 %v2083_v22  ;;  %5920 = vmatprep.mubr.msk.f32.mxu0 %vm1136_vm9, %v7618_v21  ;;  %v2024_v22 = vld [vmem:[%s7680_s30 + $0x808] sm:$0xff]  ;;  %vm1012_vm1 = vcmp.eq.s32.totalorder %v492_v19, %v8495_v16  ;;  %v2143_v19 = vld [vmem:[%s7680_s30 + $0xbc0] sm:$0xff] }
 0x141   : > { %6486 = vmatpush3.msra.mxu0 %v2035_v23  ;;  %6530 = vmatpush3.msra.mxu1 %v2067_v25  ;;  %v2056_v23 = vld [vmem:[%s7680_s30 + $0x908] sm:$0xff]  ;;  %v8507_v25 = vrot.slane %v8485_v5, %v8013_v60 }
 0x142   : > { %5921 = vmatmul.mubr.msk.f32.gmra.mxu0 %vm1135_vm10, %v7618_v21  ;;  %6487 = vmatprep.subr.mxu0 %v2050_v26  ;;  %v2039_v26 = vld [vmem:[%s7680_s30 + $0x880] sm:$0xff] }
 0x143   : > { %6531 = vmatprep.subr.mxu1 %v2082_v27  ;;  %5928 = vmatprep.mubr.msk.f32.mxu1 %vm1138_vm11, %v7618_v21  ;;  %v2071_v27 = vld [vmem:[%s7680_s30 + $0x980] sm:$0xff]  ;;  %vm1014_vm3 = vcmp.eq.s32.totalorder %v494_v28, %v8507_v25  ;;  %v2141_v28 = vld [vmem:[%s7680_s30 + $0xbb0] sm:$0xff] }
 0x144   : > { %6488 = vmatpush3.msra.mxu0 %v2034_v29  ;;  %6532 = vmatpush3.msra.mxu1 %v2066_v31  ;;  %v8513_v29 = vrot.slane %v8485_v5, %v8021_v0  ;;  %v493_v31 = vld [vmem:[#allocation2 + $0x338] sm:$0xff] }
 0x145   : > { %6489 = vmatprep.subr.mxu0 %v2049_v32  ;;  %5929 = vmatmul.mubr.msk.f32.gmra.mxu1 %vm1137_vm12, %v7618_v21  ;;  %v2055_v32 = vld [vmem:[%s7680_s30 + $0x900] sm:$0xff] }
 0x146   : > { %6533 = vmatprep.subr.mxu1 %v2081_v36  ;;  %5922 = vmatprep.mubr.msk.f32.mxu0 %vm1200_vm13, %v7618_v21  ;;  %v2150_v36 = vld [vmem:[%s7680_s30 + $0xbf8] sm:$0xff]  ;;  %vm1013_vm4 = vcmp.eq.s32.totalorder %v493_v31, %v8513_v29  ;;  %v2108_v31 = vld [vmem:[%s7680_s30 + $0xaa8] sm:$0xff] }
 0x147   : > { %6490 = vmatpush3.msra.mxu0 %v2033_v10  ;;  %6534 = vmatpush3.msra.mxu1 %v2065_v39  ;;  %v556_v10 = vld [vmem:[#allocation2 + $0x1a8] sm:$0xff]  ;;  %v2134_v39 = vld [vmem:[%s7680_s30 + $0xb78] sm:$0xff] }
 0x148   : > { %5923 = vmatmul.mubr.msk.f32.gmra.mxu0 %vm1199_vm14, %v7618_v21  ;;  %6491 = vmatprep.subr.mxu0 %v2048_v14  ;;  %v555_v14 = vld [vmem:[#allocation2 + $0x398] sm:$0xff]  ;;  %vm1076_vm5 = vcmp.eq.s32.totalorder %v556_v10, %v8495_v16  ;;  %v2107_v10 = vld [vmem:[%s7680_s30 + $0xaa0] sm:$0xff] }
 0x149   : > { %6535 = vmatprep.subr.mxu1 %v2080_v15  ;;  %5930 = vmatprep.mubr.msk.f32.mxu1 %vm1202_vm15, %v7618_v21  ;;  %v2117_v15 = vld [vmem:[%s7680_s30 + $0xaf0] sm:$0xff]  ;;  %vm1075_vm6 = vcmp.eq.s32.totalorder %v555_v14, %v8501_v20  ;;  %v2123_v14 = vld [vmem:[%s7680_s30 + $0xb20] sm:$0xff] }
 0x14a   : > { %6492 = vmatpush3.msra.mxu0 %v2032_v47  ;;  %6536 = vmatpush3.msra.mxu1 %v2064_v41  ;;  %v2101_v47 = vld [vmem:[%s7680_s30 + $0xa70] sm:$0xff]  ;;  %v558_v41 = vld [vmem:[#allocation2 + $0x3b8] sm:$0xff] }
 0x14b   : > { %6493 = vmatprep.subr.mxu0 %v2047_v42  ;;  %5931 = vmatmul.mubr.msk.f32.gmra.mxu1 %vm1201_vm0, %v7618_v21  ;;  %v2133_v42 = vld [vmem:[%s7680_s30 + $0xb70] sm:$0xff]  ;;  %vm1078_vm7 = vcmp.eq.s32.totalorder %v558_v41, %v8507_v25  ;;  %v2122_v41 = vld [vmem:[%s7680_s30 + $0xb18] sm:$0xff] }
 0x14c   : > { %6537 = vmatprep.subr.mxu1 %v2079_v43  ;;  %6494 = vmatpush3.msra.mxu0 %v2031_v44  ;;  %v2116_v43 = vld [vmem:[%s7680_s30 + $0xae8] sm:$0xff] }
 0x14d   : > { %6538 = vmatpush3.msra.mxu1 %v2063_v45  ;;  %6495 = vmatprep.subr.mxu0 %v2046_v46  ;;  %v2148_v44 = vld [vmem:[%s7680_s30 + $0xbe8] sm:$0xff]  ;;  %v557_v45 = vld [vmem:[#allocation2 + $0x698] sm:$0xff] }
 0x14e   : > { %6539 = vmatprep.subr.mxu1 %v2078_v48  ;;  %6496 = vmatpush3.msra.mxu0 %v2030_v49  ;;  %v2100_v46 = vld [vmem:[%s7680_s30 + $0xa68] sm:$0xff]  ;;  %v620_v48 = vld [vmem:[#allocation2 + $0x4f0] sm:$0xff]  ;;  %vm1077_vm8 = vcmp.eq.s32.totalorder %v557_v45, %v8513_v29 }
 0x14f   : > { %6540 = vmatpush3.msra.mxu1 %v2062_v50  ;;  %6497 = vmatprep.subr.mxu0 %v2045_v51  ;;  %v2132_v49 = vld [vmem:[%s7680_s30 + $0xb68] sm:$0xff]  ;;  %v2115_v50 = vld [vmem:[%s7680_s30 + $0xae0] sm:$0xff]  ;;  %vm1140_vm9 = vcmp.eq.s32.totalorder %v620_v48, %v8495_v16  ;;  %v2121_v45 = vld [vmem:[%s7680_s30 + $0xb10] sm:$0xff] }
 0x150   : > { %6541 = vmatprep.subr.mxu1 %v2077_v52  ;;  %6498 = vmatpush3.msra.mxu0 %v2029_v59  ;;  %v619_v51 = vld [vmem:[#allocation2 + $0x460] sm:$0xff]  ;;  %v2104_v48 = vld [vmem:[%s7680_s30 + $0xa88] sm:$0xff] }
 0x151   : > { %6542 = vmatpush3.msra.mxu1 %v2061_v53  ;;  %6499 = vmatprep.subr.mxu0 %v2044_v54  ;;  %v2147_v52 = vld [vmem:[%s7680_s30 + $0xbe0] sm:$0xff]  ;;  %v622_v53 = vld [vmem:[#allocation2 + $0x258] sm:$0xff]  ;;  %vm1139_vm10 = vcmp.eq.s32.totalorder %v619_v51, %v8501_v20  ;;  %v8613_v51 = vrot.slane %v8485_v5, %v8133_v34 }
 0x152   : > { %6543 = vmatprep.subr.mxu1 %v2076_v55  ;;  %6500 = vmatpush3.msra.mxu0 %v2028_v57  ;;  %v2099_v59 = vld [vmem:[%s7680_s30 + $0xa60] sm:$0xff]  ;;  %v2114_v55 = vld [vmem:[%s7680_s30 + $0xad8] sm:$0xff]  ;;  %vm1142_vm11 = vcmp.eq.s32.totalorder %v622_v53, %v8507_v25  ;;  %v2088_v53 = vld [vmem:[%s7680_s30 + $0xa08] sm:$0xff] }
 0x153   : > { %6544 = vmatpush3.msra.mxu1 %v2060_v62  ;;  %6501 = vmatprep.subr.mxu0 %v2043_v58  ;;  %v2131_v54 = vld [vmem:[%s7680_s30 + $0xb60] sm:$0xff]  ;;  %v2146_v57 = vld [vmem:[%s7680_s30 + $0xbd8] sm:$0xff]  ;;  %v621_v62 = vld [vmem:[#allocation2 + $0x528] sm:$0xff] }
 0x154   : > { %6545 = vmatprep.subr.mxu1 %v2075_v61  ;;  %6502 = vmatpush3.msra.mxu0 %v2027_v1  ;;  %v2098_v58 = vld [vmem:[%s7680_s30 + $0xa58] sm:$0xff]  ;;  %v684_v61 = vld [vmem:[#allocation2 + $0x6b0] sm:$0xff]  ;;  %vm1141_vm12 = vcmp.eq.s32.totalorder %v621_v62, %v8513_v29  ;;  %v2103_v62 = vld [vmem:[%s7680_s30 + $0xa80] sm:$0xff] }
 0x155   : > { %6546 = vmatpush3.msra.mxu1 %v2059_v2  ;;  %6503 = vmatprep.subr.mxu0 %v2042_v3  ;;  %v2130_v1 = vld [vmem:[%s7680_s30 + $0xb58] sm:$0xff]  ;;  %v2113_v2 = vld [vmem:[%s7680_s30 + $0xad0] sm:$0xff]  ;;  %v683_v3 = vld [vmem:[#allocation2 + $0x6e8] sm:$0xff]  ;;  %vm1204_vm13 = vcmp.eq.s32.totalorder %v684_v61, %v8495_v16 }
 0x156   : > { %6547 = vmatprep.subr.mxu1 %v2074_v4  ;;  %6504 = vmatpush3.msra.mxu0 %v2026_v7  ;;  %v2145_v4 = vld [vmem:[%s7680_s30 + $0xbd0] sm:$0xff]  ;;  %vm1203_vm14 = vcmp.eq.s32.totalorder %v683_v3, %v8501_v20  ;;  %v2096_v16 = vld [vmem:[%s7680_s30 + $0xa48] sm:$0xff]  ;;  %v2095_v20 = vld [vmem:[%s7680_s30 + $0xa40] sm:$0xff] }
 0x157   : > { %6548 = vmatpush3.msra.mxu1 %v2058_v8  ;;  %6505 = vmatprep.subr.mxu0 %v2041_v9  ;;  %v2097_v7 = vld [vmem:[%s7680_s30 + $0xa50] sm:$0xff]  ;;  %v686_v8 = vld [vmem:[#allocation2 + $0x108] sm:$0xff] }
 0x158   : > { %6549 = vmatprep.subr.mxu1 %v2073_v11  ;;  %6506 = vmatpush3.msra.mxu0 %v2025_v12  ;;  %v2129_v9 = vld [vmem:[%s7680_s30 + $0xb50] sm:$0xff]  ;;  %v2112_v11 = vld [vmem:[%s7680_s30 + $0xac8] sm:$0xff]  ;;  %vm1206_vm15 = vcmp.eq.s32.totalorder %v686_v8, %v8507_v25  ;;  %v2094_v25 = vld [vmem:[%s7680_s30 + $0xa38] sm:$0xff] }
 0x159   : > { %6550 = vmatpush3.msra.mxu1 %v2057_v13  ;;  %6507 = vmatprep.subr.mxu0 %v2040_v17  ;;  %v2144_v12 = vld [vmem:[%s7680_s30 + $0xbc8] sm:$0xff]  ;;  %v685_v13 = vld [vmem:[#allocation2 + $0x300] sm:$0xff] }
 0x15a   : > { %6551 = vmatprep.subr.mxu1 %v2072_v18  ;;  %6508 = vmatpush3.msra.mxu0 %v2024_v22  ;;  %v2128_v17 = vld [vmem:[%s7680_s30 + $0xb48] sm:$0xff]  ;;  %v2111_v18 = vld [vmem:[%s7680_s30 + $0xac0] sm:$0xff]  ;;  %vm1205_vm0 = vcmp.eq.s32.totalorder %v685_v13, %v8513_v29  ;;  %v2093_v29 = vld [vmem:[%s7680_s30 + $0xa30] sm:$0xff] }
 0x15b   : > { %6552 = vmatpush3.msra.mxu1 %v2056_v23  ;;  %6509 = vmatprep.subr.mxu0 %v2039_v26  ;;  %v2127_v22 = vld [vmem:[%s7680_s30 + $0xb40] sm:$0xff]  ;;  %v2110_v23 = vld [vmem:[%s7680_s30 + $0xab8] sm:$0xff]  ;;  %v498_v61 = vld [vmem:[#allocation2 + $0x568] sm:$0xff] }
 0x15c   : > { %6553 = vmatprep.subr.mxu1 %v2071_v27  ;;  %6510 = vmatpush3.msra.mxu0 %v2023_v30  ;;  %v2126_v26 = vld [vmem:[%s7680_s30 + $0xb38] sm:$0xff]  ;;  %v2109_v27 = vld [vmem:[%s7680_s30 + $0xab0] sm:$0xff] }
 0x15d   : > { %5932 = vmatprep.mubr.msk.f32.mxu0 %vm1012_vm1, %v7618_v21  ;;  %6554 = vmatpush3.msra.mxu1 %v2055_v32  ;;  %v2125_v30 = vld [vmem:[%s7680_s30 + $0xb30] sm:$0xff]  ;;  %v2140_v32 = vld [vmem:[%s7680_s30 + $0xba8] sm:$0xff]  ;;  %v2214_v13 = vld [vmem:[%s7680_s30 + $0xdf8] sm:$0xff] }
 0x15e   : > { %5933 = vmatmul.mubr.msk.f32.vlgmr.msra.gmra.mxu0 %vm1011_vm2, %v7618_v21  ;;  %5940 = vmatprep.mubr.msk.f32.mxu1 %vm1014_vm3, %v7618_v21 }
 0x15f   : > { %6567 = vmatprep.subr.mxu0 %v2118_v35  ;;  %6611 = vmatprep.subr.mxu1 %v2150_v36  ;;  %v2092_v35 = vld [vmem:[%s7680_s30 + $0xa28] sm:$0xff] }
 0x160   : > { %5941 = vmatmul.mubr.msk.f32.vlgmr.msra.gmra.mxu1 %vm1013_vm4, %v7618_v21  ;;  %6568 = vmatpush3.msra.mxu0 %v2102_v38  ;;  %v2124_v36 = vld [vmem:[%s7680_s30 + $0xb28] sm:$0xff]  ;;  %v2139_v38 = vld [vmem:[%s7680_s30 + $0xba0] sm:$0xff] }
 0x161   : > { %6612 = vmatpush3.msra.mxu1 %v2134_v39  ;;  %6569 = vmatprep.subr.mxu0 %v2117_v15  ;;  %v2091_v39 = vld [vmem:[%s7680_s30 + $0xa20] sm:$0xff]  ;;  %v2106_v15 = vld [vmem:[%s7680_s30 + $0xa98] sm:$0xff] }
 0x162   : > { %6613 = vmatprep.subr.mxu1 %v2149_v40  ;;  %5934 = vmatprep.mubr.msk.f32.mxu0 %vm1076_vm5, %v7618_v21  ;;  %v2138_v40 = vld [vmem:[%s7680_s30 + $0xb98] sm:$0xff] }
 0x163   : > { %6570 = vmatpush3.msra.mxu0 %v2101_v47  ;;  %6614 = vmatpush3.msra.mxu1 %v2133_v42  ;;  %v2090_v47 = vld [vmem:[%s7680_s30 + $0xa18] sm:$0xff]  ;;  %v2105_v42 = vld [vmem:[%s7680_s30 + $0xa90] sm:$0xff] }
 0x164   : > { %5935 = vmatmul.mubr.msk.f32.gmra.mxu0 %vm1075_vm6, %v7618_v21  ;;  %6571 = vmatprep.subr.mxu0 %v2116_v43  ;;  %v2137_v43 = vld [vmem:[%s7680_s30 + $0xb90] sm:$0xff] }
 0x165   : > { %6615 = vmatprep.subr.mxu1 %v2148_v44  ;;  %5942 = vmatprep.mubr.msk.f32.mxu1 %vm1078_vm7, %v7618_v21  ;;  %v2089_v44 = vld [vmem:[%s7680_s30 + $0xa10] sm:$0xff] }
 0x166   : > { %6572 = vmatpush3.msra.mxu0 %v2100_v46  ;;  %6616 = vmatpush3.msra.mxu1 %v2132_v49  ;;  %v8607_v46 = vrot.slane %v8485_v5, %v8128_v33  ;;  %v2136_v49 = vld [vmem:[%s7680_s30 + $0xb88] sm:$0xff] }
 0x167   : > { %6573 = vmatprep.subr.mxu0 %v2115_v50  ;;  %5943 = vmatmul.mubr.msk.f32.gmra.mxu1 %vm1077_vm8, %v7618_v21  ;;  %v496_v50 = vld [vmem:[#allocation2 + $0x5a8] sm:$0xff] }
 0x168   : > { %6617 = vmatprep.subr.mxu1 %v2147_v52  ;;  %5936 = vmatprep.mubr.msk.f32.mxu0 %vm1140_vm9, %v7618_v21  ;;  %vm1016_vm1 = vcmp.eq.s32.totalorder %v496_v50, %v8607_v46 }
 0x169   : > { %6574 = vmatpush3.msra.mxu0 %v2099_v59  ;;  %6618 = vmatpush3.msra.mxu1 %v2131_v54  ;;  %v2120_v54 = vld [vmem:[%s7680_s30 + $0xb08] sm:$0xff] }
 0x16a   : > { %5937 = vmatmul.mubr.msk.f32.gmra.mxu0 %vm1139_vm10, %v7618_v21  ;;  %6575 = vmatprep.subr.mxu0 %v2114_v55  ;;  %v495_v55 = vld [vmem:[#allocation2 + $0x2e0] sm:$0xff] }
 0x16b   : > { %6619 = vmatprep.subr.mxu1 %v2146_v57  ;;  %5944 = vmatprep.mubr.msk.f32.mxu1 %vm1142_vm11, %v7618_v21  ;;  %v8619_v57 = vrot.slane %v8485_v5, %v8138_v37  ;;  %vm1015_vm2 = vcmp.eq.s32.totalorder %v495_v55, %v8613_v51  ;;  %v689_v55 = vld [vmem:[#allocation2 + $0x570] sm:$0xff] }
 0x16c   : > { %6576 = vmatpush3.msra.mxu0 %v2098_v58  ;;  %6620 = vmatpush3.msra.mxu1 %v2130_v1  ;;  %v2135_v58 = vld [vmem:[%s7680_s30 + $0xb80] sm:$0xff]  ;;  %v8625_v1 = vrot.slane %v8485_v5, %v8143_v6  ;;  %v2182_v5 = vld [vmem:[%s7680_s30 + $0xcf8] sm:$0xff] }
 0x16d   : > { %6577 = vmatprep.subr.mxu0 %v2113_v2  ;;  %5945 = vmatmul.mubr.msk.f32.gmra.mxu1 %vm1141_vm12, %v7618_v21  ;;  %vm1018_vm3 = vcmp.eq.s32.totalorder %v498_v61, %v8619_v57 }
 0x16e   : > { %6621 = vmatprep.subr.mxu1 %v2145_v4  ;;  %5938 = vmatprep.mubr.msk.f32.mxu0 %vm1204_vm13, %v7618_v21  ;;  %v2087_v4 = vld [vmem:[%s7680_s30 + $0xa00] sm:$0xff] }
 0x16f   : > { %6578 = vmatpush3.msra.mxu0 %v2097_v7  ;;  %6622 = vmatpush3.msra.mxu1 %v2129_v9  ;;  %v497_v7 = vld [vmem:[#allocation2 + $0x5b8] sm:$0xff] }
 0x170   : > { %5939 = vmatmul.mubr.msk.f32.gmra.mxu0 %vm1203_vm14, %v7618_v21  ;;  %6579 = vmatprep.subr.mxu0 %v2112_v11  ;;  %v2119_v11 = vld [vmem:[%s7680_s30 + $0xb00] sm:$0xff]  ;;  %vm1017_vm4 = vcmp.eq.s32.totalorder %v497_v7, %v8625_v1 }
 0x171   : > { %6623 = vmatprep.subr.mxu1 %v2144_v12  ;;  %5946 = vmatprep.mubr.msk.f32.mxu1 %vm1206_vm15, %v7618_v21 }
 0x172   : > { %6580 = vmatpush3.msra.mxu0 %v2096_v16  ;;  %6624 = vmatpush3.msra.mxu1 %v2128_v17  ;;  %v560_v16 = vld [vmem:[#allocation2 + $0x610] sm:$0xff]  ;;  %v2166_v17 = vld [vmem:[%s7680_s30 + $0xc78] sm:$0xff] }
 0x173   : > { %6581 = vmatprep.subr.mxu0 %v2111_v18  ;;  %5947 = vmatmul.mubr.msk.f32.gmra.mxu1 %vm1205_vm0, %v7618_v21  ;;  %v2198_v18 = vld [vmem:[%s7680_s30 + $0xd78] sm:$0xff]  ;;  %vm1080_vm5 = vcmp.eq.s32.totalorder %v560_v16, %v8607_v46  ;;  %vm1209_vm0 = vcmp.eq.s32.totalorder %v689_v55, %v8625_v1  ;;  %v2200_v55 = vld [vmem:[%s7680_s30 + $0xd88] sm:$0xff] }
 0x174   : > { %6625 = vmatprep.subr.mxu1 %v2143_v19  ;;  %6582 = vmatpush3.msra.mxu0 %v2095_v20  ;;  %v559_v19 = vld [vmem:[#allocation2 + $0x5d8] sm:$0xff]  ;;  %v2181_v20 = vld [vmem:[%s7680_s30 + $0xcf0] sm:$0xff] }
 0x175   : > { %6626 = vmatpush3.msra.mxu1 %v2127_v22  ;;  %6583 = vmatprep.subr.mxu0 %v2110_v23  ;;  %v2213_v22 = vld [vmem:[%s7680_s30 + $0xdf0] sm:$0xff]  ;;  %vm1079_vm6 = vcmp.eq.s32.totalorder %v559_v19, %v8613_v51  ;;  %v2190_v16 = vld [vmem:[%s7680_s30 + $0xd38] sm:$0xff] }
 0x176   : > { %6627 = vmatprep.subr.mxu1 %v2142_v24  ;;  %6584 = vmatpush3.msra.mxu0 %v2094_v25  ;;  %v2165_v23 = vld [vmem:[%s7680_s30 + $0xc70] sm:$0xff]  ;;  %v562_v24 = vld [vmem:[#allocation2 + $0x1d8] sm:$0xff] }
 0x177   : > { %6628 = vmatpush3.msra.mxu1 %v2126_v26  ;;  %6585 = vmatprep.subr.mxu0 %v2109_v27  ;;  %v2197_v25 = vld [vmem:[%s7680_s30 + $0xd70] sm:$0xff]  ;;  %v2180_v26 = vld [vmem:[%s7680_s30 + $0xce8] sm:$0xff]  ;;  %vm1082_vm7 = vcmp.eq.s32.totalorder %v562_v24, %v8619_v57 }
 0x178   : > { %6629 = vmatprep.subr.mxu1 %v2141_v28  ;;  %6586 = vmatpush3.msra.mxu0 %v2093_v29  ;;  %v2212_v27 = vld [vmem:[%s7680_s30 + $0xde8] sm:$0xff]  ;;  %v561_v28 = vld [vmem:[#allocation2 + $0x218] sm:$0xff]  ;;  %v2173_v19 = vld [vmem:[%s7680_s30 + $0xcb0] sm:$0xff] }
 0x179   : > { %6630 = vmatpush3.msra.mxu1 %v2125_v30  ;;  %6587 = vmatprep.subr.mxu0 %v2108_v31  ;;  %v2164_v29 = vld [vmem:[%s7680_s30 + $0xc68] sm:$0xff]  ;;  %v624_v30 = vld [vmem:[#allocation2 + $0x4f8] sm:$0xff]  ;;  %vm1081_vm8 = vcmp.eq.s32.totalorder %v561_v28, %v8625_v1  ;;  %v2157_v24 = vld [vmem:[%s7680_s30 + $0xc30] sm:$0xff] }
 0x17a   : > { %6631 = vmatprep.subr.mxu1 %v2140_v32  ;;  %6588 = vmatpush3.msra.mxu0 %v2092_v35  ;;  %v2196_v31 = vld [vmem:[%s7680_s30 + $0xd68] sm:$0xff]  ;;  %v2179_v32 = vld [vmem:[%s7680_s30 + $0xce0] sm:$0xff]  ;;  %v623_v35 = vld [vmem:[#allocation2 + $0x4d0] sm:$0xff]  ;;  %vm1144_vm9 = vcmp.eq.s32.totalorder %v624_v30, %v8607_v46 }
 0x17b   : > { %6632 = vmatpush3.msra.mxu1 %v2124_v36  ;;  %6589 = vmatprep.subr.mxu0 %v2107_v10  ;;  %v2211_v36 = vld [vmem:[%s7680_s30 + $0xde0] sm:$0xff]  ;;  %vm1143_vm10 = vcmp.eq.s32.totalorder %v623_v35, %v8613_v51  ;;  %v2188_v30 = vld [vmem:[%s7680_s30 + $0xd28] sm:$0xff] }
 0x17c   : > { %6633 = vmatprep.subr.mxu1 %v2139_v38  ;;  %6590 = vmatpush3.msra.mxu0 %v2091_v39  ;;  %v2163_v10 = vld [vmem:[%s7680_s30 + $0xc60] sm:$0xff] }
 0x17d   : > { %6634 = vmatpush3.msra.mxu1 %v2123_v14  ;;  %6591 = vmatprep.subr.mxu0 %v2106_v15  ;;  %v626_v38 = vld [vmem:[#allocation2 + $0x2a0] sm:$0xff]  ;;  %v2178_v14 = vld [vmem:[%s7680_s30 + $0xcd8] sm:$0xff] }
 0x17e   : > { %6635 = vmatprep.subr.mxu1 %v2138_v40  ;;  %6592 = vmatpush3.msra.mxu0 %v2090_v47  ;;  %v6159_v52 = vpop.f32.mrf.mxu0  ;;  %v2195_v39 = vld [vmem:[%s7680_s30 + $0xd60] sm:$0xff]  ;;  %v2210_v15 = vld [vmem:[%s7680_s30 + $0xdd8] sm:$0xff]  ;;  %vm1146_vm11 = vcmp.eq.s32.totalorder %v626_v38, %v8619_v57 }
 0x17f   : > { %6636 = vmatpush3.msra.mxu1 %v2122_v41  ;;  %v6203_v59 = vpop.f32.mrf.mxu1  ;;  %6593 = vmatprep.subr.mxu0 %v2105_v42  ;;  %v625_v40 = vld [vmem:[#allocation2 + $0x78] sm:$0xff]  ;;  %v688_v41 = vld [vmem:[#allocation2 + $0x490] sm:$0xff]  ;;  %v2171_v35 = vld [vmem:[%s7680_s30 + $0xca0] sm:$0xff] }
 0x180   : > { %6637 = vmatprep.subr.mxu1 %v2137_v43  ;;  %6594 = vmatpush3.msra.mxu0 %v2089_v44  ;;  %v6160_v2 = vpop.f32.mrf.mxu0  ;;  %v2162_v47 = vld [vmem:[%s7680_s30 + $0xc58] sm:$0xff]  ;;  %v2177_v43 = vld [vmem:[%s7680_s30 + $0xcd0] sm:$0xff]  ;;  %v687_v44 = vld [vmem:[#allocation2 + $0x180] sm:$0xff]  ;;  %vm1145_vm12 = vcmp.eq.s32.totalorder %v625_v40, %v8625_v1  ;;  %vm1208_vm13 = vcmp.eq.s32.totalorder %v688_v41, %v8607_v46 }
 0x181   : > { %6638 = vmatpush3.msra.mxu1 %v2121_v45  ;;  %v6204_v3 = vpop.f32.mrf.mxu1  ;;  %6595 = vmatprep.subr.mxu0 %v2104_v48  ;;  %v6161_v8 = vadd.f32 %v6160_v2, %v6159_v52  ;;  %v2194_v42 = vld [vmem:[%s7680_s30 + $0xd58] sm:$0xff]  ;;  %v2209_v45 = vld [vmem:[%s7680_s30 + $0xdd0] sm:$0xff]  ;;  %vm1207_vm14 = vcmp.eq.s32.totalorder %v687_v44, %v8613_v51  ;;  %v2160_v51 = vld [vmem:[%s7680_s30 + $0xc48] sm:$0xff] }
 0x182   : > { %6639 = vmatprep.subr.mxu1 %v2136_v49  ;;  %v6205_v9 = vadd.f32 %v6204_v3, %v6203_v59  ;;  %6596 = vmatpush3.msra.mxu0 %v2088_v53  ;;  %v2161_v48 = vld [vmem:[%s7680_s30 + $0xc50] sm:$0xff]  ;;  %v690_v49 = vld [vmem:[#allocation2 + $0x500] sm:$0xff]  ;;  %v2176_v53 = vld [vmem:[%s7680_s30 + $0xcc8] sm:$0xff] }
 0x183   : > { %6640 = vmatpush3.msra.mxu1 %v2120_v54  ;;  %6597 = vmatprep.subr.mxu0 %v2103_v62  ;;  %v2193_v59 = vld [vmem:[%s7680_s30 + $0xd50] sm:$0xff]  ;;  %v2208_v54 = vld [vmem:[%s7680_s30 + $0xdc8] sm:$0xff]  ;;  %vm1210_vm15 = vcmp.eq.s32.totalorder %v690_v49, %v8619_v57  ;;  %v2207_v46 = vld [vmem:[%s7680_s30 + $0xdc0] sm:$0xff] }
 0x184   : > { %6641 = vmatprep.subr.mxu1 %v2135_v58  ;;  %v8633_v12 = vadd.f32 %v6205_v9, %v6161_v8  ;;  %6598 = vmatpush3.msra.mxu0 %v2087_v4  ;;  %v2192_v3 = vld [vmem:[%s7680_s30 + $0xd48] sm:$0xff]  ;;  %v2175_v4 = vld [vmem:[%s7680_s30 + $0xcc0] sm:$0xff]  ;;  %v2158_v1 = vld [vmem:[%s7680_s30 + $0xc38] sm:$0xff] }
 0x185   : > { %5948 = vmatprep.mubr.msk.f32.mxu0 %vm1016_vm1, %v7618_v21  ;;  %6642 = vmatpush3.msra.mxu1 %v2119_v11  ;;  %v2159_v57 = vld [vmem:[%s7680_s30 + $0xc40] sm:$0xff]  ;;  %v2202_v40 = vld [vmem:[%s7680_s30 + $0xd98] sm:$0xff] }
 0x186   : > { %5949 = vmatmul.mubr.msk.f32.vlgmr.msra.gmra.mxu0 %vm1015_vm2, %v7618_v21  ;;  %5956 = vmatprep.mubr.msk.f32.mxu1 %vm1018_vm3, %v7618_v21  ;;  %v2191_v8 = vld [vmem:[%s7680_s30 + $0xd40] sm:$0xff]  ;;  %v2186_v44 = vld [vmem:[%s7680_s30 + $0xd18] sm:$0xff] }
 0x187   : > { %6655 = vmatprep.subr.mxu0 %v2182_v5  ;;  %6699 = vmatprep.subr.mxu1 %v2214_v13  ;;  %v2174_v5 = vld [vmem:[%s7680_s30 + $0xcb8] sm:$0xff]  ;;  %v2187_v38 = vld [vmem:[%s7680_s30 + $0xd20] sm:$0xff] }
 0x188   : > { %5957 = vmatmul.mubr.msk.f32.vlgmr.msra.gmra.mxu1 %vm1017_vm4, %v7618_v21  ;;  %6656 = vmatpush3.msra.mxu0 %v2166_v17  ;;  %v2206_v13 = vld [vmem:[%s7680_s30 + $0xdb8] sm:$0xff] }
 0x189   : > { %6700 = vmatpush3.msra.mxu1 %v2198_v18  ;;  %6657 = vmatprep.subr.mxu0 %v2181_v20  ;;  %v2205_v20 = vld [vmem:[%s7680_s30 + $0xdb0] sm:$0xff] }
 0x18a   : > { %6701 = vmatprep.subr.mxu1 %v2213_v22  ;;  %5950 = vmatprep.mubr.msk.f32.mxu0 %vm1080_vm5, %v7618_v21 }
 0x18b   : > { %6658 = vmatpush3.msra.mxu0 %v2165_v23  ;;  %6702 = vmatpush3.msra.mxu1 %v2197_v25  ;;  %v2189_v25 = vld [vmem:[%s7680_s30 + $0xd30] sm:$0xff] }
 0x18c   : > { %5951 = vmatmul.mubr.msk.f32.gmra.mxu0 %vm1079_vm6, %v7618_v21  ;;  %6659 = vmatprep.subr.mxu0 %v2180_v26  ;;  %v2172_v26 = vld [vmem:[%s7680_s30 + $0xca8] sm:$0xff] }
 0x18d   : > { %6703 = vmatprep.subr.mxu1 %v2212_v27  ;;  %5958 = vmatprep.mubr.msk.f32.mxu1 %vm1082_vm7, %v7618_v21  ;;  %v2204_v27 = vld [vmem:[%s7680_s30 + $0xda8] sm:$0xff] }
 0x18e   : > { %6660 = vmatpush3.msra.mxu0 %v2164_v29  ;;  %6704 = vmatpush3.msra.mxu1 %v2196_v31  ;;  %v2156_v29 = vld [vmem:[%s7680_s30 + $0xc28] sm:$0xff] }
 0x18f   : > { %6661 = vmatprep.subr.mxu0 %v2179_v32  ;;  %5959 = vmatmul.mubr.msk.f32.gmra.mxu1 %vm1081_vm8, %v7618_v21 }
 0x190   : > { %6705 = vmatprep.subr.mxu1 %v2211_v36  ;;  %5952 = vmatprep.mubr.msk.f32.mxu0 %vm1144_vm9, %v7618_v21  ;;  %v2203_v36 = vld [vmem:[%s7680_s30 + $0xda0] sm:$0xff] }
 0x191   : > { %6662 = vmatpush3.msra.mxu0 %v2163_v10  ;;  %6706 = vmatpush3.msra.mxu1 %v2195_v39  ;;  %v2155_v10 = vld [vmem:[%s7680_s30 + $0xc20] sm:$0xff] }
 0x192   : > { %5953 = vmatmul.mubr.msk.f32.gmra.mxu0 %vm1143_vm10, %v7618_v21  ;;  %6663 = vmatprep.subr.mxu0 %v2178_v14 }
 0x193   : > { %6707 = vmatprep.subr.mxu1 %v2210_v15  ;;  %5960 = vmatprep.mubr.msk.f32.mxu1 %vm1146_vm11, %v7618_v21  ;;  %v6162_v50 = vpop.f32.mrf.mxu0  ;;  %v2170_v15 = vld [vmem:[%s7680_s30 + $0xc98] sm:$0xff] }
 0x194   : > { %6664 = vmatpush3.msra.mxu0 %v2162_v47  ;;  %v6206_v52 = vpop.f32.mrf.mxu1  ;;  %6708 = vmatpush3.msra.mxu1 %v2194_v42  ;;  %v8720_v47 = vld [vmem:[%s7670_s22 + $0x18] sm:$0xff] }
 0x195   : > { %6665 = vmatprep.subr.mxu0 %v2177_v43  ;;  %5961 = vmatmul.mubr.msk.f32.gmra.mxu1 %vm1145_vm12, %v7618_v21  ;;  %v6163_v62 = vpop.f32.mrf.mxu0  ;;  %v2154_v43 = vld [vmem:[%s7680_s30 + $0xc18] sm:$0xff] }
 0x196   : > { %6709 = vmatprep.subr.mxu1 %v2209_v45  ;;  %v6207_v58 = vpop.f32.mrf.mxu1  ;;  %5954 = vmatprep.mubr.msk.f32.mxu0 %vm1208_vm13, %v7618_v21  ;;  %v6164_v61 = vadd.f32 %v6163_v62, %v6162_v50  ;;  %v2169_v45 = vld [vmem:[%s7680_s30 + $0xc90] sm:$0xff]  ;;  %v500_v62 = vld [vmem:[#allocation2 + $0x6f8] sm:$0xff] }
 0x197   : > { %6666 = vmatpush3.msra.mxu0 %v2161_v48  ;;  %v6208_v2 = vadd.f32 %v6207_v58, %v6206_v52  ;;  %6710 = vmatpush3.msra.mxu1 %v2193_v59  ;;  %v2201_v48 = vld [vmem:[%s7680_s30 + $0xd90] sm:$0xff]  ;;  %v8732_v59 = vrot.slane %v8720_v47, %v8005_v56  ;;  %v8738_v58 = vrot.slane %v8720_v47, %v8018_v63 }
 0x198   : > { %5955 = vmatmul.mubr.msk.f32.gmra.mxu0 %vm1207_vm14, %v7618_v21  ;;  %6667 = vmatprep.subr.mxu0 %v2176_v53  ;;  %v2153_v50 = vld [vmem:[%s7680_s30 + $0xc10] sm:$0xff] }
 0x199   : > { %6711 = vmatprep.subr.mxu1 %v2208_v54  ;;  %v8693_v7 = vadd.f32 %v6208_v2, %v6164_v61  ;;  %5962 = vmatprep.mubr.msk.f32.mxu1 %vm1210_vm15, %v7618_v21  ;;  %v6165_v9 = vpop.f32.mrf.mxu0  ;;  %v2185_v52 = vld [vmem:[%s7680_s30 + $0xd10] sm:$0xff]  ;;  %v2168_v54 = vld [vmem:[%s7680_s30 + $0xc88] sm:$0xff]  ;;  %vm1020_vm1 = vcmp.eq.s32.totalorder %v500_v62, %v8732_v59  ;;  %v2227_v62 = vld [vmem:[%s7680_s30 + $0xe60] sm:$0xff] }
 0x19a   : > { %6668 = vmatpush3.msra.mxu0 %v2160_v51  ;;  %v6209_v11 = vpop.f32.mrf.mxu1  ;;  %6712 = vmatpush3.msra.mxu1 %v2192_v3  ;;  %v2152_v51 = vld [vmem:[%s7680_s30 + $0xc08] sm:$0xff]  ;;  %v8744_v3 = vrot.slane %v8720_v47, %v8013_v60 }
 0x19b   : > { %6669 = vmatprep.subr.mxu0 %v2175_v4  ;;  %5963 = vmatmul.mubr.msk.f32.gmra.mxu1 %vm1209_vm0, %v7618_v21  ;;  %v6166_v17 = vpop.f32.mrf.mxu0  ;;  %v2184_v61 = vld [vmem:[%s7680_s30 + $0xd08] sm:$0xff] }
 0x19c   : > { %6713 = vmatprep.subr.mxu1 %v2207_v46  ;;  %v6210_v18 = vpop.f32.mrf.mxu1  ;;  %6670 = vmatpush3.msra.mxu0 %v2159_v57  ;;  %v6167_v22 = vadd.f32 %v6166_v17, %v6165_v9  ;;  %v499_v2 = vld [vmem:[#allocation2 + $0x3e8] sm:$0xff]  ;;  %v2167_v57 = vld [vmem:[%s7680_s30 + $0xc80] sm:$0xff] }
 0x19d   : > { %6714 = vmatpush3.msra.mxu1 %v2191_v8  ;;  %v6211_v23 = vadd.f32 %v6210_v18, %v6209_v11  ;;  %6671 = vmatprep.subr.mxu0 %v2174_v5  ;;  %v2199_v8 = vld [vmem:[%s7680_s30 + $0xd80] sm:$0xff]  ;;  %v502_v9 = vld [vmem:[#allocation2 + $0x368] sm:$0xff]  ;;  %v8750_v11 = vrot.slane %v8720_v47, %v8021_v0  ;;  %vm1019_vm2 = vcmp.eq.s32.totalorder %v499_v2, %v8738_v58 }
 0x19e   : > { %6715 = vmatprep.subr.mxu1 %v2206_v13  ;;  %6672 = vmatpush3.msra.mxu0 %v2158_v1  ;;  %v2151_v13 = vld [vmem:[%s7680_s30 + $0xc00] sm:$0xff]  ;;  %v501_v1 = vld [vmem:[#allocation2 + $0x690] sm:$0xff]  ;;  %vm1022_vm3 = vcmp.eq.s32.totalorder %v502_v9, %v8744_v3 }
 0x19f   : > { %6716 = vmatpush3.msra.mxu1 %v2190_v16  ;;  %v8709_v28 = vadd.f32 %v6211_v23, %v6167_v22  ;;  %6673 = vmatprep.subr.mxu0 %v2173_v19  ;;  %v6168_v31 = vpop.f32.mrf.mxu0  ;;  %v2183_v17 = vld [vmem:[%s7680_s30 + $0xd00] sm:$0xff]  ;;  %v2278_v23 = vld [vmem:[%s7680_s30 + $0xff8] sm:$0xff]  ;;  %vm1021_vm4 = vcmp.eq.s32.totalorder %v501_v1, %v8750_v11 }
 0x1a0   : > { %6717 = vmatprep.subr.mxu1 %v2205_v20  ;;  %v6212_v32 = vpop.f32.mrf.mxu1  ;;  %6674 = vmatpush3.msra.mxu0 %v2157_v24  ;;  %v2246_v20 = vld [vmem:[%s7680_s30 + $0xef8] sm:$0xff]  ;;  %v2259_v2 = vld [vmem:[%s7680_s30 + $0xf60] sm:$0xff] }
 0x1a1   : > { %6718 = vmatpush3.msra.mxu1 %v2189_v25  ;;  %6675 = vmatprep.subr.mxu0 %v2172_v26  ;;  %v6169_v39 = vpop.f32.mrf.mxu0  ;;  %v564_v24 = vld [vmem:[#allocation2 + $0x1f8] sm:$0xff] }
 0x1a2   : > { %6719 = vmatprep.subr.mxu1 %v2204_v27  ;;  %v6213_v14 = vpop.f32.mrf.mxu1  ;;  %6676 = vmatpush3.msra.mxu0 %v2156_v29  ;;  %v6170_v41 = vadd.f32 %v6169_v39, %v6168_v31  ;;  %v2262_v26 = vld [vmem:[%s7680_s30 + $0xf78] sm:$0xff]  ;;  %v563_v27 = vld [vmem:[#allocation2 + $0x628] sm:$0xff]  ;;  %v2277_v31 = vld [vmem:[%s7680_s30 + $0xff0] sm:$0xff]  ;;  %vm1084_vm5 = vcmp.eq.s32.totalorder %v564_v24, %v8732_v59 }
 0x1a3   : > { %6720 = vmatpush3.msra.mxu1 %v2188_v30  ;;  %v6214_v42 = vadd.f32 %v6213_v14, %v6212_v32  ;;  %6677 = vmatprep.subr.mxu0 %v2171_v35  ;;  %v2245_v30 = vld [vmem:[%s7680_s30 + $0xef0] sm:$0xff]  ;;  %vm1083_vm6 = vcmp.eq.s32.totalorder %v563_v27, %v8738_v58  ;;  %v2244_v14 = vld [vmem:[%s7680_s30 + $0xee8] sm:$0xff] }
 0x1a4   : > { %6721 = vmatprep.subr.mxu1 %v2203_v36  ;;  %6678 = vmatpush3.msra.mxu0 %v2155_v10  ;;  %v2229_v35 = vld [vmem:[%s7680_s30 + $0xe70] sm:$0xff]  ;;  %v566_v36 = vld [vmem:[#allocation2 + $0x278] sm:$0xff] }
 0x1a5   : > { %6722 = vmatpush3.msra.mxu1 %v2187_v38  ;;  %v8726_v49 = vadd.f32 %v6214_v42, %v6170_v41  ;;  %6679 = vmatprep.subr.mxu0 %v2170_v15  ;;  %v2261_v38 = vld [vmem:[%s7680_s30 + $0xf70] sm:$0xff]  ;;  %v2276_v15 = vld [vmem:[%s7680_s30 + $0xfe8] sm:$0xff]  ;;  %vm1086_vm7 = vcmp.eq.s32.totalorder %v566_v36, %v8744_v3  ;;  %v2239_v36 = vld [vmem:[%s7680_s30 + $0xec0] sm:$0xff] }
 0x1a6   : > { %6723 = vmatprep.subr.mxu1 %v2202_v40  ;;  %v6247_v53 = vpop.f32.mrf.mxu0  ;;  %6680 = vmatpush3.msra.mxu0 %v2154_v43  ;;  %v565_v40 = vld [vmem:[#allocation2 + $0x388] sm:$0xff]  ;;  %v2225_v24 = vld [vmem:[%s7680_s30 + $0xe50] sm:$0xff] }
 0x1a7   : > { %6724 = vmatpush3.msra.mxu1 %v2186_v44  ;;  %6681 = vmatprep.subr.mxu0 %v2169_v45  ;;  %v2228_v43 = vld [vmem:[%s7680_s30 + $0xe68] sm:$0xff]  ;;  %v628_v44 = vld [vmem:[#allocation2 + $0x778] sm:$0xff]  ;;  %vm1085_vm8 = vcmp.eq.s32.totalorder %v565_v40, %v8750_v11  ;;  %v2257_v27 = vld [vmem:[%s7680_s30 + $0xf50] sm:$0xff] }
 0x1a8   : > { %6725 = vmatprep.subr.mxu1 %v2201_v48  ;;  %v6291_v4 = vpop.f32.mrf.mxu1  ;;  %v6248_v46 = vpop.f32.mrf.mxu0  ;;  %6682 = vmatpush3.msra.mxu0 %v2153_v50  ;;  %v2260_v45 = vld [vmem:[%s7680_s30 + $0xf68] sm:$0xff]  ;;  %v2243_v48 = vld [vmem:[%s7680_s30 + $0xee0] sm:$0xff]  ;;  %v627_v50 = vld [vmem:[#allocation2 + $0x10] sm:$0xff]  ;;  %vm1148_vm9 = vcmp.eq.s32.totalorder %v628_v44, %v8732_v59 }
 0x1a9   : > { %6726 = vmatpush3.msra.mxu1 %v2185_v52  ;;  %v6249_v5 = vadd.f32 %v6248_v46, %v6247_v53  ;;  %6683 = vmatprep.subr.mxu0 %v2168_v54  ;;  %v2275_v53 = vld [vmem:[%s7680_s30 + $0xfe0] sm:$0xff]  ;;  %vm1147_vm10 = vcmp.eq.s32.totalorder %v627_v50, %v8738_v58  ;;  %v2242_v46 = vld [vmem:[%s7680_s30 + $0xed8] sm:$0xff]  ;;  %v2253_v44 = vld [vmem:[%s7680_s30 + $0xf30] sm:$0xff] }
 0x1aa   : > { %6727 = vmatprep.subr.mxu1 %v2200_v55  ;;  %v6292_v16 = vpop.f32.mrf.mxu1  ;;  %6684 = vmatpush3.msra.mxu0 %v2152_v51  ;;  %v630_v51 = vld [vmem:[#allocation2 + $0x530] sm:$0xff]  ;;  %v2254_v40 = vld [vmem:[%s7680_s30 + $0xf38] sm:$0xff]  ;;  %v2252_v50 = vld [vmem:[%s7680_s30 + $0xf28] sm:$0xff] }
 0x1ab   : > { %6728 = vmatpush3.msra.mxu1 %v2184_v61  ;;  %v3028_v18 = vadd.f32 %v6249_v5, %v8633_v12  ;;  %v6293_v19 = vadd.f32 %v6292_v16, %v6291_v4  ;;  %6685 = vmatprep.subr.mxu0 %v2167_v57  ;;  %v2230_v12 = vld [vmem:[%s7680_s30 + $0xe78] sm:$0xff]  ;;  %vm1150_vm11 = vcmp.eq.s32.totalorder %v630_v51, %v8744_v3 }
 0x1ac   : > { %6729 = vmatprep.subr.mxu1 %v2199_v8  ;;  %v6250_v22 = vpop.f32.mrf.mxu0  ;;  %6686 = vmatpush3.msra.mxu0 %v2151_v13  ;;  %v2274_v57 = vld [vmem:[%s7680_s30 + $0xfd8] sm:$0xff]  ;;  %v629_v8 = vld [vmem:[#allocation2 + $0x7a8] sm:$0xff] }
 0x1ad   : > { %5964 = vmatprep.mubr.msk.f32.mxu0 %vm1020_vm1, %v7618_v21  ;;  %v8762_v25 = vadd.f32 %v6293_v19, %v3028_v18  ;;  %6730 = vmatpush3.msra.mxu1 %v2183_v17  ;;  %v2226_v13 = vld [vmem:[%s7680_s30 + $0xe58] sm:$0xff]  ;;  %v2241_v17 = vld [vmem:[%s7680_s30 + $0xed0] sm:$0xff]  ;;  %v691_v18 = vld [vmem:[#allocation2 + $0xe8] sm:$0xff]  ;;  %vm1149_vm12 = vcmp.eq.s32.totalorder %v629_v8, %v8750_v11 }
 0x1ae   : > { %5965 = vmatmul.mubr.msk.f32.vlgmr.msra.gmra.mxu0 %vm1019_vm2, %v7618_v21  ;;  %v6251_v29 = vpop.f32.mrf.mxu0  ;;  %5972 = vmatprep.mubr.msk.f32.mxu1 %vm1022_vm3, %v7618_v21  ;;  %v2258_v16 = vld [vmem:[%s7680_s30 + $0xf58] sm:$0xff]  ;;  %vm1211_vm14 = vcmp.eq.s32.totalorder %v691_v18, %v8738_v58  ;;  %v2217_v8 = vld [vmem:[%s7680_s30 + $0xe10] sm:$0xff]  ;;  %v2216_v18 = vld [vmem:[%s7680_s30 + $0xe08] sm:$0xff] }
 0x1af   : > { %6743 = vmatprep.subr.mxu0 %v2246_v20  ;;  %v6252_v32 = vadd.f32 %v6251_v29, %v6250_v22  ;;  %6787 = vmatprep.subr.mxu1 %v2278_v23  ;;  %v6294_v10 = vpop.f32.mrf.mxu1  ;;  %v2273_v20 = vld [vmem:[%s7680_s30 + $0xfd0] sm:$0xff]  ;;  %v2234_v51 = vld [vmem:[%s7680_s30 + $0xe98] sm:$0xff] }
 0x1b0   : > { %5973 = vmatmul.mubr.msk.f32.vlgmr.msra.gmra.mxu1 %vm1021_vm4, %v7618_v21  ;;  %6744 = vmatpush3.msra.mxu0 %v2230_v12  ;;  %v694_v12 = vld [vmem:[#allocation2 + $0x360] sm:$0xff] }
 0x1b1   : > { %6788 = vmatpush3.msra.mxu1 %v2262_v26  ;;  %v3033_v39 = vadd.f32 %v6252_v32, %v8693_v7  ;;  %6745 = vmatprep.subr.mxu0 %v2245_v30  ;;  %v6295_v42 = vpop.f32.mrf.mxu1  ;;  %v2240_v30 = vld [vmem:[%s7680_s30 + $0xec8] sm:$0xff]  ;;  %vm1214_vm15 = vcmp.eq.s32.totalorder %v694_v12, %v8744_v3  ;;  %v2223_v3 = vld [vmem:[%s7680_s30 + $0xe40] sm:$0xff] }
 0x1b2   : > { %6789 = vmatprep.subr.mxu1 %v2277_v31  ;;  %v6253_v41 = vpop.f32.mrf.mxu0  ;;  %5966 = vmatprep.mubr.msk.f32.mxu0 %vm1084_vm5, %v7618_v21  ;;  %v6296_v7 = vadd.f32 %v6295_v42, %v6294_v10  ;;  %v2272_v31 = vld [vmem:[%s7680_s30 + $0xfc8] sm:$0xff]  ;;  %v2271_v10 = vld [vmem:[%s7680_s30 + $0xfc0] sm:$0xff]  ;;  %v2269_v42 = vld [vmem:[%s7680_s30 + $0xfb0] sm:$0xff] }
 0x1b3   : > { %6746 = vmatpush3.msra.mxu0 %v2229_v35  ;;  %6790 = vmatpush3.msra.mxu1 %v2261_v38  ;;  %v2224_v35 = vld [vmem:[%s7680_s30 + $0xe48] sm:$0xff] }
 0x1b4   : > { %5967 = vmatmul.mubr.msk.f32.gmra.mxu0 %vm1083_vm6, %v7618_v21  ;;  %v6254_v52 = vpop.f32.mrf.mxu0  ;;  %6747 = vmatprep.subr.mxu0 %v2244_v14  ;;  %v8790_v54 = vadd.f32 %v6296_v7, %v3033_v39  ;;  %v2255_v39 = vld [vmem:[%s7680_s30 + $0xf40] sm:$0xff]  ;;  %v2238_v14 = vld [vmem:[%s7680_s30 + $0xeb8] sm:$0xff]  ;;  %v2236_v7 = vld [vmem:[%s7680_s30 + $0xea8] sm:$0xff] }
 0x1b5   : > { %6791 = vmatprep.subr.mxu1 %v2276_v15  ;;  %v6255_v55 = vadd.f32 %v6254_v52, %v6253_v41  ;;  %5974 = vmatprep.mubr.msk.f32.mxu1 %vm1086_vm7, %v7618_v21  ;;  %v6297_v61 = vpop.f32.mrf.mxu1  ;;  %v2270_v15 = vld [vmem:[%s7680_s30 + $0xfb8] sm:$0xff]  ;;  %v2237_v41 = vld [vmem:[%s7680_s30 + $0xeb0] sm:$0xff]  ;;  %v2235_v52 = vld [vmem:[%s7680_s30 + $0xea0] sm:$0xff] }
 0x1b6   : > { %6748 = vmatpush3.msra.mxu0 %v2228_v43  ;;  %6792 = vmatpush3.msra.mxu1 %v2260_v45  ;;  %v2221_v43 = vld [vmem:[%s7680_s30 + $0xe30] sm:$0xff]  ;;  %v2268_v45 = vld [vmem:[%s7680_s30 + $0xfa8] sm:$0xff] }
 0x1b7   : > { %6749 = vmatprep.subr.mxu0 %v2243_v48  ;;  %v3038_v4 = vadd.f32 %v6255_v55, %v8709_v28  ;;  %5975 = vmatmul.mubr.msk.f32.gmra.mxu1 %vm1085_vm8, %v7618_v21  ;;  %v6298_v5 = vpop.f32.mrf.mxu1  ;;  %v692_v28 = vld [vmem:[#allocation2 + $0x2f0] sm:$0xff]  ;;  %v2220_v48 = vld [vmem:[%s7680_s30 + $0xe28] sm:$0xff]  ;;  %v2219_v55 = vld [vmem:[%s7680_s30 + $0xe20] sm:$0xff] }
 0x1b8   : > { %6793 = vmatprep.subr.mxu1 %v2275_v53  ;;  %v6256_v9 = vpop.f32.mrf.mxu0  ;;  %5968 = vmatprep.mubr.msk.f32.mxu0 %vm1148_vm9, %v7618_v21  ;;  %v6299_v1 = vadd.f32 %v6298_v5, %v6297_v61  ;;  %vm1212_vm13 = vcmp.eq.s32.totalorder %v692_v28, %v8732_v59  ;;  %v693_v59 = vld [vmem:[#allocation2 + $0x7e8] sm:$0xff]  ;;  %v2267_v53 = vld [vmem:[%s7680_s30 + $0xfa0] sm:$0xff]  ;;  %v2266_v61 = vld [vmem:[%s7680_s30 + $0xf98] sm:$0xff]  ;;  %v8868_v5 = vrot.slane %v8720_v47, %v8128_v33 }
 0x1b9   : > { %6750 = vmatpush3.msra.mxu0 %v2227_v62  ;;  %6794 = vmatpush3.msra.mxu1 %v2259_v2  ;;  %vm1213_vm0 = vcmp.eq.s32.totalorder %v693_v59, %v8750_v11  ;;  %v2222_v11 = vld [vmem:[%s7680_s30 + $0xe38] sm:$0xff]  ;;  %v2251_v62 = vld [vmem:[%s7680_s30 + $0xf20] sm:$0xff]  ;;  %v2232_v28 = vld [vmem:[%s7680_s30 + $0xe88] sm:$0xff] }
 0x1ba   : > { %5969 = vmatmul.mubr.msk.f32.gmra.mxu0 %vm1147_vm10, %v7618_v21  ;;  %v6257_v19 = vpop.f32.mrf.mxu0  ;;  %6751 = vmatprep.subr.mxu0 %v2242_v46  ;;  %v8815_v22 = vadd.f32 %v6299_v1, %v3038_v4  ;;  %v2218_v2 = vld [vmem:[%s7680_s30 + $0xe18] sm:$0xff]  ;;  %v2233_v46 = vld [vmem:[%s7680_s30 + $0xe90] sm:$0xff]  ;;  %v2264_v1 = vld [vmem:[%s7680_s30 + $0xf88] sm:$0xff] }
 0x1bb   : > { %6795 = vmatprep.subr.mxu1 %v2274_v57  ;;  %v6258_v23 = vadd.f32 %v6257_v19, %v6256_v9  ;;  %5976 = vmatprep.mubr.msk.f32.mxu1 %vm1150_vm11, %v7618_v21  ;;  %v6300_v26 = vpop.f32.mrf.mxu1  ;;  %v2250_v4 = vld [vmem:[%s7680_s30 + $0xf18] sm:$0xff]  ;;  %v2265_v57 = vld [vmem:[%s7680_s30 + $0xf90] sm:$0xff]  ;;  %v2248_v19 = vld [vmem:[%s7680_s30 + $0xf08] sm:$0xff] }
 0x1bc   : > { %6752 = vmatpush3.msra.mxu0 %v2226_v13  ;;  %6796 = vmatpush3.msra.mxu1 %v2258_v16  ;;  %v2249_v9 = vld [vmem:[%s7680_s30 + $0xf10] sm:$0xff]  ;;  %v504_v16 = vld [vmem:[#allocation2 + $0xc0] sm:$0xff] }
 0x1bd   : > { %6753 = vmatprep.subr.mxu0 %v2241_v17  ;;  %v3043_v29 = vadd.f32 %v6258_v23, %v8726_v49  ;;  %5977 = vmatmul.mubr.msk.f32.gmra.mxu1 %vm1149_vm12, %v7618_v21  ;;  %v6301_v32 = vpop.f32.mrf.mxu1  ;;  %v2256_v49 = vld [vmem:[%s7680_s30 + $0xf48] sm:$0xff]  ;;  %v8874_v17 = vrot.slane %v8720_v47, %v8133_v34  ;;  %v8880_v23 = vrot.slane %v8720_v47, %v8138_v37  ;;  %v2215_v59 = vld [vmem:[%s7680_s30 + $0xe00] sm:$0xff] }
 0x1be   : > { %6797 = vmatprep.subr.mxu1 %v2273_v20  ;;  %5970 = vmatprep.mubr.msk.f32.mxu0 %vm1212_vm13, %v7618_v21  ;;  %v6302_v58 = vadd.f32 %v6301_v32, %v6300_v26  ;;  %v503_v20 = vld [vmem:[#allocation2 + $0x138] sm:$0xff]  ;;  %v2231_v26 = vld [vmem:[%s7680_s30 + $0xe80] sm:$0xff]  ;;  %vm1024_vm1 = vcmp.eq.s32.totalorder %v504_v16, %v8868_v5 }
 0x1bf   : > { %6754 = vmatpush3.msra.mxu0 %v2225_v24  ;;  %6798 = vmatpush3.msra.mxu1 %v2257_v27  ;;  %v2263_v27 = vld [vmem:[%s7680_s30 + $0xf80] sm:$0xff]  ;;  %vm1023_vm2 = vcmp.eq.s32.totalorder %v503_v20, %v8874_v17 }
 0x1c0   : > { %5971 = vmatmul.mubr.msk.f32.gmra.mxu0 %vm1211_vm14, %v7618_v21  ;;  %6755 = vmatprep.subr.mxu0 %v2240_v30  ;;  %v8836_v38 = vadd.f32 %v6302_v58, %v3043_v29  ;;  %v506_v29 = vld [vmem:[#allocation2 + $0x280] sm:$0xff]  ;;  %v8886_v30 = vrot.slane %v8720_v47, %v8143_v6 }
 0x1c1   : > { %6799 = vmatprep.subr.mxu1 %v2272_v31  ;;  %5978 = vmatprep.mubr.msk.f32.mxu1 %vm1214_vm15, %v7618_v21  ;;  %v505_v32 = vld [vmem:[#allocation2 + $0x1c0] sm:$0xff]  ;;  %vm1026_vm3 = vcmp.eq.s32.totalorder %v506_v29, %v8880_v23 }
 0x1c2   : > { %6756 = vmatpush3.msra.mxu0 %v2224_v35  ;;  %6800 = vmatpush3.msra.mxu1 %v2256_v49  ;;  %v2247_v58 = vld [vmem:[%s7680_s30 + $0xf00] sm:$0xff]  ;;  %vm1025_vm4 = vcmp.eq.s32.totalorder %v505_v32, %v8886_v30  ;;  %v2322_v32 = vld [vmem:[%s7680_s30 + $0x1158] sm:$0xff] }
 0x1c3   : > { %6757 = vmatprep.subr.mxu0 %v2239_v36  ;;  %5979 = vmatmul.mubr.msk.f32.gmra.mxu1 %vm1213_vm0, %v7618_v21  ;;  %v2310_v36 = vld [vmem:[%s7680_s30 + $0x10f8] sm:$0xff]  ;;  %v634_v16 = vld [vmem:[#allocation2 + $0x700] sm:$0xff] }
 0x1c4   : > { %6801 = vmatprep.subr.mxu1 %v2271_v10  ;;  %6758 = vmatpush3.msra.mxu0 %v2223_v3  ;;  %v2342_v3 = vld [vmem:[%s7680_s30 + $0x11f8] sm:$0xff]  ;;  %vm1154_vm11 = vcmp.eq.s32.totalorder %v634_v16, %v8880_v23 }
 0x1c5   : > { %6802 = vmatpush3.msra.mxu1 %v2255_v39  ;;  %6759 = vmatprep.subr.mxu0 %v2238_v14  ;;  %v568_v39 = vld [vmem:[#allocation2 + $0x2c0] sm:$0xff]  ;;  %v2330_v16 = vld [vmem:[%s7680_s30 + $0x1198] sm:$0xff] }
 0x1c6   : > { %6803 = vmatprep.subr.mxu1 %v2270_v15  ;;  %6760 = vmatpush3.msra.mxu0 %v2222_v11  ;;  %v2326_v15 = vld [vmem:[%s7680_s30 + $0x1178] sm:$0xff]  ;;  %vm1088_vm5 = vcmp.eq.s32.totalorder %v568_v39, %v8868_v5  ;;  %v698_v39 = vld [vmem:[#allocation2 + $0x748] sm:$0xff] }
 0x1c7   : > { %6804 = vmatpush3.msra.mxu1 %v2254_v40  ;;  %6761 = vmatprep.subr.mxu0 %v2237_v41  ;;  %v567_v11 = vld [vmem:[#allocation2 + $0x478] sm:$0xff]  ;;  %v2309_v41 = vld [vmem:[%s7680_s30 + $0x10f0] sm:$0xff]  ;;  %vm1218_vm15 = vcmp.eq.s32.totalorder %v698_v39, %v8880_v23 }
 0x1c8   : > { %6805 = vmatprep.subr.mxu1 %v2269_v42  ;;  %6762 = vmatpush3.msra.mxu0 %v2221_v43  ;;  %v2341_v42 = vld [vmem:[%s7680_s30 + $0x11f0] sm:$0xff]  ;;  %vm1087_vm6 = vcmp.eq.s32.totalorder %v567_v11, %v8874_v17 }
 0x1c9   : > { %6806 = vmatpush3.msra.mxu1 %v2253_v44  ;;  %6763 = vmatprep.subr.mxu0 %v2236_v7  ;;  %v2293_v44 = vld [vmem:[%s7680_s30 + $0x1070] sm:$0xff]  ;;  %v570_v7 = vld [vmem:[#allocation2 + $0x7c0] sm:$0xff] }
 0x1ca   : > { %6807 = vmatprep.subr.mxu1 %v2268_v45  ;;  %6764 = vmatpush3.msra.mxu0 %v2220_v48  ;;  %v2325_v48 = vld [vmem:[%s7680_s30 + $0x1170] sm:$0xff]  ;;  %vm1090_vm7 = vcmp.eq.s32.totalorder %v570_v7, %v8880_v23  ;;  %v2335_v7 = vld [vmem:[%s7680_s30 + $0x11c0] sm:$0xff] }
 0x1cb   : > { %6808 = vmatpush3.msra.mxu1 %v2252_v50  ;;  %6765 = vmatprep.subr.mxu0 %v2235_v52  ;;  %v2308_v52 = vld [vmem:[%s7680_s30 + $0x10e8] sm:$0xff]  ;;  %v2287_v23 = vld [vmem:[%s7680_s30 + $0x1040] sm:$0xff] }
 0x1cc   : > { %6809 = vmatprep.subr.mxu1 %v2267_v53  ;;  %6766 = vmatpush3.msra.mxu0 %v2219_v55  ;;  %v2340_v53 = vld [vmem:[%s7680_s30 + $0x11e8] sm:$0xff] }
 0x1cd   : > { %6810 = vmatpush3.msra.mxu1 %v2251_v62  ;;  %6767 = vmatprep.subr.mxu0 %v2234_v51  ;;  %v569_v55 = vld [vmem:[#allocation2 + $0x1c8] sm:$0xff] }
 0x1ce   : > { %6811 = vmatprep.subr.mxu1 %v2266_v61  ;;  %v6335_v13 = vpop.f32.mrf.mxu0  ;;  %6768 = vmatpush3.msra.mxu0 %v2218_v2  ;;  %v2292_v61 = vld [vmem:[%s7680_s30 + $0x1068] sm:$0xff]  ;;  %v632_v2 = vld [vmem:[#allocation2 + $0x660] sm:$0xff]  ;;  %vm1089_vm8 = vcmp.eq.s32.totalorder %v569_v55, %v8886_v30  ;;  %v2301_v55 = vld [vmem:[%s7680_s30 + $0x10b0] sm:$0xff] }
 0x1cf   : > { %6812 = vmatpush3.msra.mxu1 %v2250_v4  ;;  %6769 = vmatprep.subr.mxu0 %v2233_v46  ;;  %v2324_v4 = vld [vmem:[%s7680_s30 + $0x1168] sm:$0xff]  ;;  %v2307_v46 = vld [vmem:[%s7680_s30 + $0x10e0] sm:$0xff]  ;;  %vm1152_vm9 = vcmp.eq.s32.totalorder %v632_v2, %v8868_v5 }
 0x1d0   : > { %6813 = vmatprep.subr.mxu1 %v2265_v57  ;;  %v6379_v24 = vpop.f32.mrf.mxu1  ;;  %v6336_v12 = vpop.f32.mrf.mxu0  ;;  %6770 = vmatpush3.msra.mxu0 %v2217_v8  ;;  %v631_v57 = vld [vmem:[#allocation2 + $0x590] sm:$0xff]  ;;  %v2300_v2 = vld [vmem:[%s7680_s30 + $0x10a8] sm:$0xff] }
 0x1d1   : > { %6814 = vmatpush3.msra.mxu1 %v2249_v9  ;;  %v6337_v31 = vadd.f32 %v6336_v12, %v6335_v13  ;;  %6771 = vmatprep.subr.mxu0 %v2232_v28  ;;  %v2339_v9 = vld [vmem:[%s7680_s30 + $0x11e0] sm:$0xff]  ;;  %vm1151_vm10 = vcmp.eq.s32.totalorder %v631_v57, %v8874_v17  ;;  %v2338_v12 = vld [vmem:[%s7680_s30 + $0x11d8] sm:$0xff] }
 0x1d2   : > { %6815 = vmatprep.subr.mxu1 %v2264_v1  ;;  %v6380_v35 = vpop.f32.mrf.mxu1  ;;  %6772 = vmatpush3.msra.mxu0 %v2216_v18  ;;  %v2291_v1 = vld [vmem:[%s7680_s30 + $0x1060] sm:$0xff] }
 0x1d3   : > { %6816 = vmatpush3.msra.mxu1 %v2248_v19  ;;  %v3198_v49 = vadd.f32 %v6337_v31, %v8762_v25  ;;  %v6381_v47 = vadd.f32 %v6380_v35, %v6379_v24  ;;  %6773 = vmatprep.subr.mxu0 %v2231_v26  ;;  %v2294_v25 = vld [vmem:[%s7680_s30 + $0x1078] sm:$0xff]  ;;  %v2323_v19 = vld [vmem:[%s7680_s30 + $0x1160] sm:$0xff]  ;;  %v2305_v35 = vld [vmem:[%s7680_s30 + $0x10d0] sm:$0xff] }
 0x1d4   : > { %6817 = vmatprep.subr.mxu1 %v2263_v27  ;;  %v6338_v10 = vpop.f32.mrf.mxu0  ;;  %6774 = vmatpush3.msra.mxu0 %v2215_v59  ;;  %v2306_v24 = vld [vmem:[%s7680_s30 + $0x10d8] sm:$0xff]  ;;  %v2299_v57 = vld [vmem:[%s7680_s30 + $0x10a0] sm:$0xff] }
 0x1d5   : > { %5980 = vmatprep.mubr.msk.f32.mxu0 %vm1024_vm1, %v7618_v21  ;;  %v8898_v14 = vadd.f32 %v6381_v47, %v3198_v49  ;;  %6818 = vmatpush3.msra.mxu1 %v2247_v58  ;;  %v633_v26 = vld [vmem:[#allocation2 + $0x358] sm:$0xff]  ;;  %v695_v58 = vld [vmem:[#allocation2 + $0x60] sm:$0xff]  ;;  %v2337_v47 = vld [vmem:[%s7680_s30 + $0x11d0] sm:$0xff] }
 0x1d6   : > { %5981 = vmatmul.mubr.msk.f32.vlgmr.msra.gmra.mxu0 %vm1023_vm2, %v7618_v21  ;;  %v6339_v40 = vpop.f32.mrf.mxu0  ;;  %5988 = vmatprep.mubr.msk.f32.mxu1 %vm1026_vm3, %v7618_v21  ;;  %v2290_v31 = vld [vmem:[%s7680_s30 + $0x1058] sm:$0xff]  ;;  %vm1153_vm12 = vcmp.eq.s32.totalorder %v633_v26, %v8886_v30  ;;  %vm1215_vm14 = vcmp.eq.s32.totalorder %v695_v58, %v8874_v17  ;;  %v2281_v26 = vld [vmem:[%s7680_s30 + $0x1010] sm:$0xff]  ;;  %v2280_v58 = vld [vmem:[%s7680_s30 + $0x1008] sm:$0xff] }
 0x1d7   : > { %6831 = vmatprep.subr.mxu0 %v2310_v36  ;;  %v6340_v43 = vadd.f32 %v6339_v40, %v6338_v10  ;;  %6875 = vmatprep.subr.mxu1 %v2342_v3  ;;  %v6382_v45 = vpop.f32.mrf.mxu1  ;;  %v2289_v3 = vld [vmem:[%s7680_s30 + $0x1050] sm:$0xff]  ;;  %v2304_v40 = vld [vmem:[%s7680_s30 + $0x10c8] sm:$0xff] }
 0x1d8   : > { %5989 = vmatmul.mubr.msk.f32.vlgmr.msra.gmra.mxu1 %vm1025_vm4, %v7618_v21  ;;  %6832 = vmatpush3.msra.mxu0 %v2294_v25 }
 0x1d9   : > { %6876 = vmatpush3.msra.mxu1 %v2326_v15  ;;  %v3203_v50 = vadd.f32 %v6340_v43, %v8790_v54  ;;  %6833 = vmatprep.subr.mxu0 %v2309_v41  ;;  %v6383_v51 = vpop.f32.mrf.mxu1  ;;  %v2321_v15 = vld [vmem:[%s7680_s30 + $0x1150] sm:$0xff]  ;;  %v2336_v41 = vld [vmem:[%s7680_s30 + $0x11c8] sm:$0xff] }
 0x1da   : > { %6877 = vmatprep.subr.mxu1 %v2341_v42  ;;  %v6341_v62 = vpop.f32.mrf.mxu0  ;;  %5982 = vmatprep.mubr.msk.f32.mxu0 %vm1088_vm5, %v7618_v21  ;;  %v6384_v54 = vadd.f32 %v6383_v51, %v6382_v45  ;;  %v2288_v43 = vld [vmem:[%s7680_s30 + $0x1048] sm:$0xff]  ;;  %v2285_v51 = vld [vmem:[%s7680_s30 + $0x1030] sm:$0xff] }
 0x1db   : > { %6834 = vmatpush3.msra.mxu0 %v2293_v44  ;;  %6878 = vmatpush3.msra.mxu1 %v2325_v48  ;;  %v2303_v44 = vld [vmem:[%s7680_s30 + $0x10c0] sm:$0xff] }
 0x1dc   : > { %5983 = vmatmul.mubr.msk.f32.gmra.mxu0 %vm1087_vm6, %v7618_v21  ;;  %v6342_v8 = vpop.f32.mrf.mxu0  ;;  %6835 = vmatprep.subr.mxu0 %v2308_v52  ;;  %v8926_v13 = vadd.f32 %v6384_v54, %v3203_v50  ;;  %v2319_v48 = vld [vmem:[%s7680_s30 + $0x1140] sm:$0xff]  ;;  %v2302_v50 = vld [vmem:[%s7680_s30 + $0x10b8] sm:$0xff]  ;;  %v2332_v54 = vld [vmem:[%s7680_s30 + $0x11a8] sm:$0xff] }
 0x1dd   : > { %6879 = vmatprep.subr.mxu1 %v2340_v53  ;;  %v6343_v28 = vadd.f32 %v6342_v8, %v6341_v62  ;;  %5990 = vmatprep.mubr.msk.f32.mxu1 %vm1090_vm7, %v7618_v21  ;;  %v6385_v18 = vpop.f32.mrf.mxu1  ;;  %v2334_v52 = vld [vmem:[%s7680_s30 + $0x11b8] sm:$0xff]  ;;  %v2333_v62 = vld [vmem:[%s7680_s30 + $0x11b0] sm:$0xff]  ;;  %v2331_v8 = vld [vmem:[%s7680_s30 + $0x11a0] sm:$0xff] }
 0x1de   : > { %6836 = vmatpush3.msra.mxu0 %v2292_v61  ;;  %6880 = vmatpush3.msra.mxu1 %v2324_v4  ;;  %v2318_v53 = vld [vmem:[%s7680_s30 + $0x1138] sm:$0xff]  ;;  %v2317_v61 = vld [vmem:[%s7680_s30 + $0x1130] sm:$0xff]  ;;  %v2284_v4 = vld [vmem:[%s7680_s30 + $0x1028] sm:$0xff] }
 0x1df   : > { %6837 = vmatprep.subr.mxu0 %v2307_v46  ;;  %v3208_v20 = vadd.f32 %v6343_v28, %v8815_v22  ;;  %5991 = vmatmul.mubr.msk.f32.gmra.mxu1 %vm1089_vm8, %v7618_v21  ;;  %v6386_v29 = vpop.f32.mrf.mxu1  ;;  %v696_v22 = vld [vmem:[#allocation2 + $0x210] sm:$0xff]  ;;  %v2316_v46 = vld [vmem:[%s7680_s30 + $0x1128] sm:$0xff]  ;;  %v2315_v28 = vld [vmem:[%s7680_s30 + $0x1120] sm:$0xff] }
 0x1e0   : > { %6881 = vmatprep.subr.mxu1 %v2339_v9  ;;  %v6344_v27 = vpop.f32.mrf.mxu0  ;;  %5984 = vmatprep.mubr.msk.f32.mxu0 %vm1152_vm9, %v7618_v21  ;;  %v6387_v59 = vadd.f32 %v6386_v29, %v6385_v18  ;;  %vm1216_vm13 = vcmp.eq.s32.totalorder %v696_v22, %v8868_v5  ;;  %v697_v5 = vld [vmem:[#allocation2 + $0x4a0] sm:$0xff]  ;;  %v2296_v22 = vld [vmem:[%s7680_s30 + $0x1088] sm:$0xff] }
 0x1e1   : > { %6838 = vmatpush3.msra.mxu0 %v2291_v1  ;;  %6882 = vmatpush3.msra.mxu1 %v2323_v19  ;;  %vm1217_vm0 = vcmp.eq.s32.totalorder %v697_v5, %v8886_v30  ;;  %v2286_v30 = vld [vmem:[%s7680_s30 + $0x1038] sm:$0xff]  ;;  %v2283_v9 = vld [vmem:[%s7680_s30 + $0x1020] sm:$0xff] }
 0x1e2   : > { %5985 = vmatmul.mubr.msk.f32.gmra.mxu0 %vm1151_vm10, %v7618_v21  ;;  %v6345_v49 = vpop.f32.mrf.mxu0  ;;  %6839 = vmatprep.subr.mxu0 %v2306_v24  ;;  %v8951_v36 = vadd.f32 %v6387_v59, %v3208_v20  ;;  %v2298_v1 = vld [vmem:[%s7680_s30 + $0x1098] sm:$0xff]  ;;  %v8997_v18 = vld [vmem:[%s7670_s22 + $0x20] sm:$0xff]  ;;  %v2297_v24 = vld [vmem:[%s7680_s30 + $0x1090] sm:$0xff] }
 0x1e3   : > { %6883 = vmatprep.subr.mxu1 %v2338_v12  ;;  %v6346_v10 = vadd.f32 %v6345_v49, %v6344_v27  ;;  %5992 = vmatprep.mubr.msk.f32.mxu1 %vm1154_vm11, %v7618_v21  ;;  %v6388_v25 = vpop.f32.mrf.mxu1  ;;  %v2282_v19 = vld [vmem:[%s7680_s30 + $0x1018] sm:$0xff]  ;;  %v2329_v12 = vld [vmem:[%s7680_s30 + $0x1190] sm:$0xff]  ;;  %v9007_v29 = vrot.slane %v8997_v18, %v8005_v56  ;;  %v2328_v59 = vld [vmem:[%s7680_s30 + $0x1188] sm:$0xff] }
 0x1e4   : > { %6840 = vmatpush3.msra.mxu0 %v2290_v31  ;;  %6884 = vmatpush3.msra.mxu1 %v2322_v32  ;;  %v2314_v20 = vld [vmem:[%s7680_s30 + $0x1118] sm:$0xff]  ;;  %v2313_v27 = vld [vmem:[%s7680_s30 + $0x1110] sm:$0xff]  ;;  %v508_v32 = vld [vmem:[#allocation2 + $0x3c0] sm:$0xff] }
 0x1e5   : > { %6841 = vmatprep.subr.mxu0 %v2305_v35  ;;  %v3213_v11 = vadd.f32 %v6346_v10, %v8836_v38  ;;  %5993 = vmatmul.mubr.msk.f32.gmra.mxu1 %vm1153_vm12, %v7618_v21  ;;  %v6389_v42 = vpop.f32.mrf.mxu1  ;;  %v2320_v38 = vld [vmem:[%s7680_s30 + $0x1148] sm:$0xff]  ;;  %v9013_v35 = vrot.slane %v8997_v18, %v8018_v63  ;;  %v9019_v10 = vrot.slane %v8997_v18, %v8013_v60  ;;  %v2279_v5 = vld [vmem:[%s7680_s30 + $0x1000] sm:$0xff] }
 0x1e6   : > { %6885 = vmatprep.subr.mxu1 %v2337_v47  ;;  %5986 = vmatprep.mubr.msk.f32.mxu0 %vm1216_vm13, %v7618_v21  ;;  %v6390_v17 = vadd.f32 %v6389_v42, %v6388_v25  ;;  %v2312_v49 = vld [vmem:[%s7680_s30 + $0x1108] sm:$0xff]  ;;  %v507_v47 = vld [vmem:[#allocation2 + $0x100] sm:$0xff]  ;;  %vm1028_vm1 = vcmp.eq.s32.totalorder %v508_v32, %v9007_v29  ;;  %v509_v42 = vld [vmem:[#allocation2 + $0x558] sm:$0xff] }
 0x1e7   : > { %6842 = vmatpush3.msra.mxu0 %v2289_v3  ;;  %6886 = vmatpush3.msra.mxu1 %v2321_v15  ;;  %v2295_v25 = vld [vmem:[%s7680_s30 + $0x1080] sm:$0xff]  ;;  %vm1027_vm2 = vcmp.eq.s32.totalorder %v507_v47, %v9013_v35 }
 0x1e8   : > { %5987 = vmatmul.mubr.msk.f32.gmra.mxu0 %vm1215_vm14, %v7618_v21  ;;  %6843 = vmatprep.subr.mxu0 %v2304_v40  ;;  %v8972_v45 = vadd.f32 %v6390_v17, %v3213_v11  ;;  %v2327_v15 = vld [vmem:[%s7680_s30 + $0x1180] sm:$0xff]  ;;  %v9025_v40 = vrot.slane %v8997_v18, %v8021_v0 }
 0x1e9   : > { %6887 = vmatprep.subr.mxu1 %v2336_v41  ;;  %5994 = vmatprep.mubr.msk.f32.mxu1 %vm1218_vm15, %v7618_v21  ;;  %v510_v11 = vld [vmem:[#allocation2 + $0x3e0] sm:$0xff] }
 0x1ea   : > { %6844 = vmatpush3.msra.mxu0 %v2288_v43  ;;  %6888 = vmatpush3.msra.mxu1 %v2320_v38  ;;  %v2311_v17 = vld [vmem:[%s7680_s30 + $0x1100] sm:$0xff]  ;;  %vm1030_vm3 = vcmp.eq.s32.totalorder %v510_v11, %v9019_v10  ;;  %vm1029_vm4 = vcmp.eq.s32.totalorder %v509_v42, %v9025_v40 }
 0x1eb   : > { %6845 = vmatprep.subr.mxu0 %v2303_v44  ;;  %5995 = vmatmul.mubr.msk.f32.gmra.mxu1 %vm1217_vm0, %v7618_v21  ;;  %v2355_v32 = vld [vmem:[%s7680_s30 + $0x1260] sm:$0xff] }
 0x1ec   : > { %6889 = vmatprep.subr.mxu1 %v2335_v7  ;;  %6846 = vmatpush3.msra.mxu0 %v2287_v23  ;;  %v2374_v7 = vld [vmem:[%s7680_s30 + $0x12f8] sm:$0xff]  ;;  %v2387_v47 = vld [vmem:[%s7680_s30 + $0x1360] sm:$0xff] }
 0x1ed   : > { %6890 = vmatpush3.msra.mxu1 %v2319_v48  ;;  %6847 = vmatprep.subr.mxu0 %v2302_v50  ;;  %v2406_v48 = vld [vmem:[%s7680_s30 + $0x13f8] sm:$0xff]  ;;  %v572_v50 = vld [vmem:[#allocation2 + $0x7f0] sm:$0xff] }
 0x1ee   : > { %6891 = vmatprep.subr.mxu1 %v2334_v52  ;;  %6848 = vmatpush3.msra.mxu0 %v2286_v30  ;;  %v2390_v30 = vld [vmem:[%s7680_s30 + $0x1378] sm:$0xff]  ;;  %vm1092_vm5 = vcmp.eq.s32.totalorder %v572_v50, %v9007_v29  ;;  %v2353_v50 = vld [vmem:[%s7680_s30 + $0x1250] sm:$0xff] }
 0x1ef   : > { %6892 = vmatpush3.msra.mxu1 %v2318_v53  ;;  %6849 = vmatprep.subr.mxu0 %v2301_v55  ;;  %v571_v53 = vld [vmem:[#allocation2 + $0x418] sm:$0xff] }
 0x1f0   : > { %6893 = vmatprep.subr.mxu1 %v2333_v62  ;;  %6850 = vmatpush3.msra.mxu0 %v2285_v51  ;;  %v2373_v62 = vld [vmem:[%s7680_s30 + $0x12f0] sm:$0xff]  ;;  %vm1091_vm6 = vcmp.eq.s32.totalorder %v571_v53, %v9013_v35 }
 0x1f1   : > { %6894 = vmatpush3.msra.mxu1 %v2317_v61  ;;  %6851 = vmatprep.subr.mxu0 %v2300_v2  ;;  %v2405_v51 = vld [vmem:[%s7680_s30 + $0x13f0] sm:$0xff] }
 0x1f2   : > { %6895 = vmatprep.subr.mxu1 %v2332_v54  ;;  %6852 = vmatpush3.msra.mxu0 %v2284_v4  ;;  %v2357_v2 = vld [vmem:[%s7680_s30 + $0x1270] sm:$0xff]  ;;  %v574_v54 = vld [vmem:[#allocation2 + $0x318] sm:$0xff] }
 0x1f3   : > { %6896 = vmatpush3.msra.mxu1 %v2316_v46  ;;  %6853 = vmatprep.subr.mxu0 %v2299_v57  ;;  %v2389_v46 = vld [vmem:[%s7680_s30 + $0x1370] sm:$0xff]  ;;  %vm1094_vm7 = vcmp.eq.s32.totalorder %v574_v54, %v9019_v10  ;;  %v2367_v54 = vld [vmem:[%s7680_s30 + $0x12c0] sm:$0xff] }
 0x1f4   : > { %6897 = vmatprep.subr.mxu1 %v2331_v8  ;;  %6854 = vmatpush3.msra.mxu0 %v2283_v9  ;;  %v2372_v8 = vld [vmem:[%s7680_s30 + $0x12e8] sm:$0xff]  ;;  %v2385_v53 = vld [vmem:[%s7680_s30 + $0x1350] sm:$0xff] }
 0x1f5   : > { %6898 = vmatpush3.msra.mxu1 %v2315_v28  ;;  %6855 = vmatprep.subr.mxu0 %v2298_v1  ;;  %v2404_v9 = vld [vmem:[%s7680_s30 + $0x13e8] sm:$0xff]  ;;  %v573_v28 = vld [vmem:[#allocation2 + $0x4b0] sm:$0xff] }
 0x1f6   : > { %6899 = vmatprep.subr.mxu1 %v2330_v16  ;;  %v6423_v31 = vpop.f32.mrf.mxu0  ;;  %6856 = vmatpush3.msra.mxu0 %v2282_v19  ;;  %v2356_v19 = vld [vmem:[%s7680_s30 + $0x1268] sm:$0xff]  ;;  %vm1093_vm8 = vcmp.eq.s32.totalorder %v573_v28, %v9025_v40  ;;  %v2382_v28 = vld [vmem:[%s7680_s30 + $0x1338] sm:$0xff] }
 0x1f7   : > { %6900 = vmatpush3.msra.mxu1 %v2314_v20  ;;  %6857 = vmatprep.subr.mxu0 %v2297_v24  ;;  %v636_v20 = vld [vmem:[#allocation2 + $0x5a0] sm:$0xff]  ;;  %v2388_v24 = vld [vmem:[%s7680_s30 + $0x1368] sm:$0xff] }
 0x1f8   : > { %6901 = vmatprep.subr.mxu1 %v2329_v12  ;;  %v6467_v3 = vpop.f32.mrf.mxu1  ;;  %v6424_v39 = vpop.f32.mrf.mxu0  ;;  %6858 = vmatpush3.msra.mxu0 %v2281_v26  ;;  %v2371_v12 = vld [vmem:[%s7680_s30 + $0x12e0] sm:$0xff]  ;;  %vm1156_vm9 = vcmp.eq.s32.totalorder %v636_v20, %v9007_v29  ;;  %v2381_v20 = vld [vmem:[%s7680_s30 + $0x1330] sm:$0xff] }
 0x1f9   : > { %6902 = vmatpush3.msra.mxu1 %v2313_v27  ;;  %v6425_v41 = vadd.f32 %v6424_v39, %v6423_v31  ;;  %6859 = vmatprep.subr.mxu0 %v2296_v22  ;;  %v635_v26 = vld [vmem:[#allocation2 + $0x340] sm:$0xff]  ;;  %v2370_v39 = vld [vmem:[%s7680_s30 + $0x12d8] sm:$0xff] }
 0x1fa   : > { %6903 = vmatprep.subr.mxu1 %v2328_v59  ;;  %v6468_v43 = vpop.f32.mrf.mxu1  ;;  %6860 = vmatpush3.msra.mxu0 %v2280_v58  ;;  %v2403_v31 = vld [vmem:[%s7680_s30 + $0x13e0] sm:$0xff]  ;;  %v638_v58 = vld [vmem:[#allocation2 + $0x230] sm:$0xff]  ;;  %vm1155_vm10 = vcmp.eq.s32.totalorder %v635_v26, %v9013_v35  ;;  %v2380_v26 = vld [vmem:[%s7680_s30 + $0x1328] sm:$0xff] }
 0x1fb   : > { %6904 = vmatpush3.msra.mxu1 %v2312_v49  ;;  %v3368_v38 = vadd.f32 %v6425_v41, %v8898_v14  ;;  %v6469_v44 = vadd.f32 %v6468_v43, %v6467_v3  ;;  %6861 = vmatprep.subr.mxu0 %v2295_v25  ;;  %v2358_v14 = vld [vmem:[%s7680_s30 + $0x1278] sm:$0xff]  ;;  %vm1158_vm11 = vcmp.eq.s32.totalorder %v638_v58, %v9019_v10 }
 0x1fc   : > { %6905 = vmatprep.subr.mxu1 %v2327_v15  ;;  %v6426_v23 = vpop.f32.mrf.mxu0  ;;  %6862 = vmatpush3.msra.mxu0 %v2279_v5  ;;  %v2402_v25 = vld [vmem:[%s7680_s30 + $0x13d8] sm:$0xff]  ;;  %v637_v15 = vld [vmem:[#allocation2 + $0x3d0] sm:$0xff] }
 0x1fd   : > { %5996 = vmatprep.mubr.msk.f32.mxu0 %vm1028_vm1, %v7618_v21  ;;  %v9037_v52 = vadd.f32 %v6469_v44, %v3368_v38  ;;  %6906 = vmatpush3.msra.mxu1 %v2311_v17  ;;  %v2354_v5 = vld [vmem:[%s7680_s30 + $0x1258] sm:$0xff]  ;;  %v2369_v17 = vld [vmem:[%s7680_s30 + $0x12d0] sm:$0xff]  ;;  %v699_v38 = vld [vmem:[#allocation2 + $0x168] sm:$0xff]  ;;  %vm1157_vm12 = vcmp.eq.s32.totalorder %v637_v15, %v9025_v40 }
 0x1fe   : > { %5997 = vmatmul.mubr.msk.f32.vlgmr.msra.gmra.mxu0 %vm1027_vm2, %v7618_v21  ;;  %v6427_v55 = vpop.f32.mrf.mxu0  ;;  %6004 = vmatprep.mubr.msk.f32.mxu1 %vm1030_vm3, %v7618_v21  ;;  %v2386_v43 = vld [vmem:[%s7680_s30 + $0x1358] sm:$0xff]  ;;  %vm1219_vm14 = vcmp.eq.s32.totalorder %v699_v38, %v9013_v35  ;;  %v2345_v15 = vld [vmem:[%s7680_s30 + $0x1210] sm:$0xff]  ;;  %v2344_v38 = vld [vmem:[%s7680_s30 + $0x1208] sm:$0xff] }
 0x1ff   : > { %6919 = vmatprep.subr.mxu0 %v2374_v7  ;;  %v6428_v61 = vadd.f32 %v6427_v55, %v6426_v23  ;;  %6963 = vmatprep.subr.mxu1 %v2406_v48  ;;  %v6470_v4 = vpop.f32.mrf.mxu1  ;;  %v2401_v7 = vld [vmem:[%s7680_s30 + $0x13d0] sm:$0xff]  ;;  %v2362_v58 = vld [vmem:[%s7680_s30 + $0x1298] sm:$0xff] }
 0x200   : > { %6005 = vmatmul.mubr.msk.f32.vlgmr.msra.gmra.mxu1 %vm1029_vm4, %v7618_v21  ;;  %6920 = vmatpush3.msra.mxu0 %v2358_v14  ;;  %v702_v14 = vld [vmem:[#allocation2 + $0x2d8] sm:$0xff] }
 0x201   : > { %6964 = vmatpush3.msra.mxu1 %v2390_v30  ;;  %v3373_v57 = vadd.f32 %v6428_v61, %v8926_v13  ;;  %6921 = vmatprep.subr.mxu0 %v2373_v62  ;;  %v6471_v16 = vpop.f32.mrf.mxu1  ;;  %v2368_v62 = vld [vmem:[%s7680_s30 + $0x12c8] sm:$0xff]  ;;  %vm1222_vm15 = vcmp.eq.s32.totalorder %v702_v14, %v9019_v10  ;;  %v2351_v10 = vld [vmem:[%s7680_s30 + $0x1240] sm:$0xff] }
 0x202   : > { %6965 = vmatprep.subr.mxu1 %v2405_v51  ;;  %v6429_v1 = vpop.f32.mrf.mxu0  ;;  %5998 = vmatprep.mubr.msk.f32.mxu0 %vm1092_vm5, %v7618_v21  ;;  %v6472_v13 = vadd.f32 %v6471_v16, %v6470_v4  ;;  %v2400_v51 = vld [vmem:[%s7680_s30 + $0x13c8] sm:$0xff]  ;;  %v2399_v4 = vld [vmem:[%s7680_s30 + $0x13c0] sm:$0xff]  ;;  %v2397_v16 = vld [vmem:[%s7680_s30 + $0x13b0] sm:$0xff] }
 0x203   : > { %6922 = vmatpush3.msra.mxu0 %v2357_v2  ;;  %6966 = vmatpush3.msra.mxu1 %v2389_v46  ;;  %v2352_v2 = vld [vmem:[%s7680_s30 + $0x1248] sm:$0xff] }
 0x204   : > { %5999 = vmatmul.mubr.msk.f32.gmra.mxu0 %vm1091_vm6, %v7618_v21  ;;  %v6430_v27 = vpop.f32.mrf.mxu0  ;;  %6923 = vmatprep.subr.mxu0 %v2372_v8  ;;  %v9065_v22 = vadd.f32 %v6472_v13, %v3373_v57  ;;  %v2383_v57 = vld [vmem:[%s7680_s30 + $0x1340] sm:$0xff]  ;;  %v2366_v8 = vld [vmem:[%s7680_s30 + $0x12b8] sm:$0xff]  ;;  %v2364_v13 = vld [vmem:[%s7680_s30 + $0x12a8] sm:$0xff] }
 0x205   : > { %6967 = vmatprep.subr.mxu1 %v2404_v9  ;;  %v6431_v59 = vadd.f32 %v6430_v27, %v6429_v1  ;;  %6006 = vmatprep.mubr.msk.f32.mxu1 %vm1094_vm7, %v7618_v21  ;;  %v6473_v49 = vpop.f32.mrf.mxu1  ;;  %v2398_v9 = vld [vmem:[%s7680_s30 + $0x13b8] sm:$0xff]  ;;  %v2365_v1 = vld [vmem:[%s7680_s30 + $0x12b0] sm:$0xff]  ;;  %v2363_v27 = vld [vmem:[%s7680_s30 + $0x12a0] sm:$0xff] }
 0x206   : > { %6924 = vmatpush3.msra.mxu0 %v2356_v19  ;;  %6968 = vmatpush3.msra.mxu1 %v2388_v24  ;;  %v2349_v19 = vld [vmem:[%s7680_s30 + $0x1230] sm:$0xff]  ;;  %v2396_v24 = vld [vmem:[%s7680_s30 + $0x13a8] sm:$0xff] }
 0x207   : > { %6925 = vmatprep.subr.mxu0 %v2371_v12  ;;  %v3378_v3 = vadd.f32 %v6431_v59, %v8951_v36  ;;  %6007 = vmatmul.mubr.msk.f32.gmra.mxu1 %vm1093_vm8, %v7618_v21  ;;  %v6474_v41 = vpop.f32.mrf.mxu1  ;;  %v700_v36 = vld [vmem:[#allocation2 + $0x668] sm:$0xff]  ;;  %v2347_v59 = vld [vmem:[%s7680_s30 + $0x1220] sm:$0xff] }
 0x208   : > { %6969 = vmatprep.subr.mxu1 %v2403_v31  ;;  %v6432_v11 = vpop.f32.mrf.mxu0  ;;  %6000 = vmatprep.mubr.msk.f32.mxu0 %vm1156_vm9, %v7618_v21  ;;  %v6475_v42 = vadd.f32 %v6474_v41, %v6473_v49  ;;  %vm1220_vm13 = vcmp.eq.s32.totalorder %v700_v36, %v9007_v29  ;;  %v701_v29 = vld [vmem:[#allocation2 + $0x270] sm:$0xff]  ;;  %v2348_v12 = vld [vmem:[%s7680_s30 + $0x1228] sm:$0xff]  ;;  %v2395_v31 = vld [vmem:[%s7680_s30 + $0x13a0] sm:$0xff]  ;;  %v9143_v41 = vrot.slane %v8997_v18, %v8128_v33 }
 0x209   : > { %6926 = vmatpush3.msra.mxu0 %v2355_v32  ;;  %6970 = vmatpush3.msra.mxu1 %v2387_v47  ;;  %vm1221_vm0 = vcmp.eq.s32.totalorder %v701_v29, %v9025_v40  ;;  %v2350_v40 = vld [vmem:[%s7680_s30 + $0x1238] sm:$0xff]  ;;  %v2379_v32 = vld [vmem:[%s7680_s30 + $0x1320] sm:$0xff]  ;;  %v2360_v36 = vld [vmem:[%s7680_s30 + $0x1288] sm:$0xff] }
 0x20a   : > { %6001 = vmatmul.mubr.msk.f32.gmra.mxu0 %vm1155_vm10, %v7618_v21  ;;  %v6433_v44 = vpop.f32.mrf.mxu0  ;;  %6927 = vmatprep.subr.mxu0 %v2370_v39  ;;  %v9090_v23 = vadd.f32 %v6475_v42, %v3378_v3  ;;  %v2394_v49 = vld [vmem:[%s7680_s30 + $0x1398] sm:$0xff]  ;;  %v2361_v39 = vld [vmem:[%s7680_s30 + $0x1290] sm:$0xff]  ;;  %v2392_v42 = vld [vmem:[%s7680_s30 + $0x1388] sm:$0xff] }
 0x20b   : > { %6971 = vmatprep.subr.mxu1 %v2402_v25  ;;  %v6434_v48 = vadd.f32 %v6433_v44, %v6432_v11  ;;  %6008 = vmatprep.mubr.msk.f32.mxu1 %vm1158_vm11, %v7618_v21  ;;  %v6476_v30 = vpop.f32.mrf.mxu1  ;;  %v2346_v47 = vld [vmem:[%s7680_s30 + $0x1218] sm:$0xff]  ;;  %v2393_v25 = vld [vmem:[%s7680_s30 + $0x1390] sm:$0xff]  ;;  %v2376_v44 = vld [vmem:[%s7680_s30 + $0x1308] sm:$0xff] }
 0x20c   : > { %6928 = vmatpush3.msra.mxu0 %v2354_v5  ;;  %6972 = vmatpush3.msra.mxu1 %v2386_v43  ;;  %v2378_v3 = vld [vmem:[%s7680_s30 + $0x1318] sm:$0xff]  ;;  %v2377_v11 = vld [vmem:[%s7680_s30 + $0x1310] sm:$0xff]  ;;  %v512_v43 = vld [vmem:[#allocation2 + $0x4c0] sm:$0xff] }
 0x20d   : > { %6929 = vmatprep.subr.mxu0 %v2369_v17  ;;  %v3383_v55 = vadd.f32 %v6434_v48, %v8972_v45  ;;  %6009 = vmatmul.mubr.msk.f32.gmra.mxu1 %vm1157_vm12, %v7618_v21  ;;  %v6477_v61 = vpop.f32.mrf.mxu1  ;;  %v2384_v45 = vld [vmem:[%s7680_s30 + $0x1348] sm:$0xff]  ;;  %v9149_v17 = vrot.slane %v8997_v18, %v8133_v34  ;;  %v9155_v48 = vrot.slane %v8997_v18, %v8138_v37  ;;  %v2343_v29 = vld [vmem:[%s7680_s30 + $0x1200] sm:$0xff] }
 0x20e   : > { %6973 = vmatprep.subr.mxu1 %v2401_v7  ;;  %6002 = vmatprep.mubr.msk.f32.mxu0 %vm1220_vm13, %v7618_v21  ;;  %v6478_v35 = vadd.f32 %v6477_v61, %v6476_v30  ;;  %v511_v7 = vld [vmem:[#allocation2 + $0x618] sm:$0xff]  ;;  %v2359_v30 = vld [vmem:[%s7680_s30 + $0x1280] sm:$0xff]  ;;  %vm1032_vm1 = vcmp.eq.s32.totalorder %v512_v43, %v9143_v41  ;;  %v513_v61 = vld [vmem:[#allocation2 + $0x70] sm:$0xff] }
 0x20f   : > { %6930 = vmatpush3.msra.mxu0 %v2353_v50  ;;  %6974 = vmatpush3.msra.mxu1 %v2385_v53  ;;  %v2391_v53 = vld [vmem:[%s7680_s30 + $0x1380] sm:$0xff]  ;;  %vm1031_vm2 = vcmp.eq.s32.totalorder %v511_v7, %v9149_v17 }
 0x210   : > { %6003 = vmatmul.mubr.msk.f32.gmra.mxu0 %vm1219_vm14, %v7618_v21  ;;  %6931 = vmatprep.subr.mxu0 %v2368_v62  ;;  %v9111_v46 = vadd.f32 %v6478_v35, %v3383_v55  ;;  %v514_v55 = vld [vmem:[#allocation2 + $0x7b8] sm:$0xff]  ;;  %v9161_v62 = vrot.slane %v8997_v18, %v8143_v6  ;;  %v2375_v35 = vld [vmem:[%s7680_s30 + $0x1300] sm:$0xff] }
 0x211   : > { %6975 = vmatprep.subr.mxu1 %v2400_v51  ;;  %6010 = vmatprep.mubr.msk.f32.mxu1 %vm1222_vm15, %v7618_v21  ;;  %vm1034_vm3 = vcmp.eq.s32.totalorder %v514_v55, %v9155_v48  ;;  %v642_v43 = vld [vmem:[#allocation2 + $0x200] sm:$0xff] }
 0x212   : > { %6932 = vmatpush3.msra.mxu0 %v2352_v2  ;;  %6976 = vmatpush3.msra.mxu1 %v2384_v45  ;;  %vm1033_vm4 = vcmp.eq.s32.totalorder %v513_v61, %v9161_v62  ;;  %vm1162_vm11 = vcmp.eq.s32.totalorder %v642_v43, %v9155_v48  ;;  %v2450_v61 = vld [vmem:[%s7680_s30 + $0x1558] sm:$0xff] }
 0x213   : > { %6933 = vmatprep.subr.mxu0 %v2367_v54  ;;  %6011 = vmatmul.mubr.msk.f32.gmra.mxu1 %vm1221_vm0, %v7618_v21  ;;  %v2438_v54 = vld [vmem:[%s7680_s30 + $0x14f8] sm:$0xff] }
 0x214   : > { %6977 = vmatprep.subr.mxu1 %v2399_v4  ;;  %6934 = vmatpush3.msra.mxu0 %v2351_v10  ;;  %v2470_v10 = vld [vmem:[%s7680_s30 + $0x15f8] sm:$0xff] }
 0x215   : > { %6978 = vmatpush3.msra.mxu1 %v2383_v57  ;;  %6935 = vmatprep.subr.mxu0 %v2366_v8  ;;  %v576_v57 = vld [vmem:[#allocation2 + $0x540] sm:$0xff]  ;;  %v2458_v43 = vld [vmem:[%s7680_s30 + $0x1598] sm:$0xff] }
 0x216   : > { %6979 = vmatprep.subr.mxu1 %v2398_v9  ;;  %6936 = vmatpush3.msra.mxu0 %v2350_v40  ;;  %v2454_v9 = vld [vmem:[%s7680_s30 + $0x1578] sm:$0xff]  ;;  %v575_v40 = vld [vmem:[#allocation2 + $0x90] sm:$0xff]  ;;  %vm1096_vm5 = vcmp.eq.s32.totalorder %v576_v57, %v9143_v41  ;;  %v706_v57 = vld [vmem:[#allocation2 + $0x328] sm:$0xff] }
 0x217   : > { %6980 = vmatpush3.msra.mxu1 %v2382_v28  ;;  %6937 = vmatprep.subr.mxu0 %v2365_v1  ;;  %v2437_v1 = vld [vmem:[%s7680_s30 + $0x14f0] sm:$0xff]  ;;  %vm1095_vm6 = vcmp.eq.s32.totalorder %v575_v40, %v9149_v17  ;;  %vm1226_vm15 = vcmp.eq.s32.totalorder %v706_v57, %v9155_v48 }
 0x218   : > { %6981 = vmatprep.subr.mxu1 %v2397_v16  ;;  %6938 = vmatpush3.msra.mxu0 %v2349_v19  ;;  %v2469_v16 = vld [vmem:[%s7680_s30 + $0x15f0] sm:$0xff] }
 0x219   : > { %6982 = vmatpush3.msra.mxu1 %v2381_v20  ;;  %6939 = vmatprep.subr.mxu0 %v2364_v13  ;;  %v2421_v20 = vld [vmem:[%s7680_s30 + $0x1470] sm:$0xff]  ;;  %v578_v13 = vld [vmem:[#allocation2 + $0x648] sm:$0xff] }
 0x21a   : > { %6983 = vmatprep.subr.mxu1 %v2396_v24  ;;  %6940 = vmatpush3.msra.mxu0 %v2348_v12  ;;  %v2453_v12 = vld [vmem:[%s7680_s30 + $0x1570] sm:$0xff]  ;;  %vm1098_vm7 = vcmp.eq.s32.totalorder %v578_v13, %v9155_v48  ;;  %v2463_v13 = vld [vmem:[%s7680_s30 + $0x15c0] sm:$0xff] }
 0x21b   : > { %6984 = vmatpush3.msra.mxu1 %v2380_v26  ;;  %6941 = vmatprep.subr.mxu0 %v2363_v27  ;;  %v2436_v27 = vld [vmem:[%s7680_s30 + $0x14e8] sm:$0xff]  ;;  %v2415_v48 = vld [vmem:[%s7680_s30 + $0x1440] sm:$0xff] }
 0x21c   : > { %6985 = vmatprep.subr.mxu1 %v2395_v31  ;;  %6942 = vmatpush3.msra.mxu0 %v2347_v59  ;;  %v2468_v31 = vld [vmem:[%s7680_s30 + $0x15e8] sm:$0xff] }
 0x21d   : > { %6986 = vmatpush3.msra.mxu1 %v2379_v32  ;;  %6943 = vmatprep.subr.mxu0 %v2362_v58  ;;  %v577_v59 = vld [vmem:[#allocation2 + $0x588] sm:$0xff] }
 0x21e   : > { %6987 = vmatprep.subr.mxu1 %v2394_v49  ;;  %v6511_v5 = vpop.f32.mrf.mxu0  ;;  %6944 = vmatpush3.msra.mxu0 %v2346_v47  ;;  %v2420_v49 = vld [vmem:[%s7680_s30 + $0x1468] sm:$0xff]  ;;  %v640_v47 = vld [vmem:[#allocation2 + $0x7f8] sm:$0xff]  ;;  %vm1097_vm8 = vcmp.eq.s32.totalorder %v577_v59, %v9161_v62  ;;  %v2429_v59 = vld [vmem:[%s7680_s30 + $0x14b0] sm:$0xff] }
 0x21f   : > { %6988 = vmatpush3.msra.mxu1 %v2378_v3  ;;  %6945 = vmatprep.subr.mxu0 %v2361_v39  ;;  %v2452_v3 = vld [vmem:[%s7680_s30 + $0x1568] sm:$0xff]  ;;  %v2435_v39 = vld [vmem:[%s7680_s30 + $0x14e0] sm:$0xff]  ;;  %vm1160_vm9 = vcmp.eq.s32.totalorder %v640_v47, %v9143_v41 }
 0x220   : > { %6989 = vmatprep.subr.mxu1 %v2393_v25  ;;  %v6555_v50 = vpop.f32.mrf.mxu1  ;;  %v6512_v14 = vpop.f32.mrf.mxu0  ;;  %6946 = vmatpush3.msra.mxu0 %v2345_v15  ;;  %v639_v25 = vld [vmem:[#allocation2 + $0x560] sm:$0xff]  ;;  %v2428_v47 = vld [vmem:[%s7680_s30 + $0x14a8] sm:$0xff] }
 0x221   : > { %6990 = vmatpush3.msra.mxu1 %v2377_v11  ;;  %v6513_v51 = vadd.f32 %v6512_v14, %v6511_v5  ;;  %6947 = vmatprep.subr.mxu0 %v2360_v36  ;;  %v2467_v11 = vld [vmem:[%s7680_s30 + $0x15e0] sm:$0xff]  ;;  %vm1159_vm10 = vcmp.eq.s32.totalorder %v639_v25, %v9149_v17  ;;  %v2466_v14 = vld [vmem:[%s7680_s30 + $0x15d8] sm:$0xff] }
 0x222   : > { %6991 = vmatprep.subr.mxu1 %v2392_v42  ;;  %v6556_v2 = vpop.f32.mrf.mxu1  ;;  %6948 = vmatpush3.msra.mxu0 %v2344_v38  ;;  %v2419_v42 = vld [vmem:[%s7680_s30 + $0x1460] sm:$0xff] }
 0x223   : > { %6992 = vmatpush3.msra.mxu1 %v2376_v44  ;;  %v3538_v45 = vadd.f32 %v6513_v51, %v9037_v52  ;;  %v6557_v18 = vadd.f32 %v6556_v2, %v6555_v50  ;;  %6949 = vmatprep.subr.mxu0 %v2359_v30  ;;  %v2422_v52 = vld [vmem:[%s7680_s30 + $0x1478] sm:$0xff]  ;;  %v2451_v44 = vld [vmem:[%s7680_s30 + $0x1560] sm:$0xff]  ;;  %v2433_v2 = vld [vmem:[%s7680_s30 + $0x14d0] sm:$0xff] }
 0x224   : > { %6993 = vmatprep.subr.mxu1 %v2391_v53  ;;  %v6514_v4 = vpop.f32.mrf.mxu0  ;;  %6950 = vmatpush3.msra.mxu0 %v2343_v29  ;;  %v2434_v50 = vld [vmem:[%s7680_s30 + $0x14d8] sm:$0xff]  ;;  %v641_v30 = vld [vmem:[#allocation2 + $0x4e0] sm:$0xff] }
 0x225   : > { %6012 = vmatprep.mubr.msk.f32.mxu0 %vm1032_vm1, %v7618_v21  ;;  %v9173_v8 = vadd.f32 %v6557_v18, %v3538_v45  ;;  %6994 = vmatpush3.msra.mxu1 %v2375_v35  ;;  %v2418_v51 = vld [vmem:[%s7680_s30 + $0x1458] sm:$0xff]  ;;  %v703_v35 = vld [vmem:[#allocation2 + $0xc8] sm:$0xff]  ;;  %vm1161_vm12 = vcmp.eq.s32.totalorder %v641_v30, %v9161_v62  ;;  %v2465_v18 = vld [vmem:[%s7680_s30 + $0x15d0] sm:$0xff] }
 0x226   : > { %6013 = vmatmul.mubr.msk.f32.vlgmr.msra.gmra.mxu0 %vm1031_vm2, %v7618_v21  ;;  %v6515_v28 = vpop.f32.mrf.mxu0  ;;  %6020 = vmatprep.mubr.msk.f32.mxu1 %vm1034_vm3, %v7618_v21  ;;  %vm1223_vm14 = vcmp.eq.s32.totalorder %v703_v35, %v9149_v17  ;;  %v2427_v25 = vld [vmem:[%s7680_s30 + $0x14a0] sm:$0xff]  ;;  %v2409_v30 = vld [vmem:[%s7680_s30 + $0x1410] sm:$0xff]  ;;  %v2408_v35 = vld [vmem:[%s7680_s30 + $0x1408] sm:$0xff] }
 0x227   : > { %7007 = vmatprep.subr.mxu0 %v2438_v54  ;;  %v6516_v19 = vadd.f32 %v6515_v28, %v6514_v4  ;;  %7051 = vmatprep.subr.mxu1 %v2470_v10  ;;  %v6558_v24 = vpop.f32.mrf.mxu1  ;;  %v2417_v10 = vld [vmem:[%s7680_s30 + $0x1450] sm:$0xff]  ;;  %v2432_v28 = vld [vmem:[%s7680_s30 + $0x14c8] sm:$0xff] }
 0x228   : > { %6021 = vmatmul.mubr.msk.f32.vlgmr.msra.gmra.mxu1 %vm1033_vm4, %v7618_v21  ;;  %7008 = vmatpush3.msra.mxu0 %v2422_v52 }
 0x229   : > { %7052 = vmatpush3.msra.mxu1 %v2454_v9  ;;  %v3543_v26 = vadd.f32 %v6516_v19, %v9065_v22  ;;  %7009 = vmatprep.subr.mxu0 %v2437_v1  ;;  %v6559_v58 = vpop.f32.mrf.mxu1  ;;  %v2449_v9 = vld [vmem:[%s7680_s30 + $0x1550] sm:$0xff]  ;;  %v2464_v1 = vld [vmem:[%s7680_s30 + $0x15c8] sm:$0xff] }
 0x22a   : > { %7053 = vmatprep.subr.mxu1 %v2469_v16  ;;  %v6517_v32 = vpop.f32.mrf.mxu0  ;;  %6014 = vmatprep.mubr.msk.f32.mxu0 %vm1096_vm5, %v7618_v21  ;;  %v6560_v22 = vadd.f32 %v6559_v58, %v6558_v24  ;;  %v2416_v19 = vld [vmem:[%s7680_s30 + $0x1448] sm:$0xff]  ;;  %v2413_v58 = vld [vmem:[%s7680_s30 + $0x1430] sm:$0xff] }
 0x22b   : > { %7010 = vmatpush3.msra.mxu0 %v2421_v20  ;;  %7054 = vmatpush3.msra.mxu1 %v2453_v12  ;;  %v2431_v20 = vld [vmem:[%s7680_s30 + $0x14c0] sm:$0xff] }
 0x22c   : > { %6015 = vmatmul.mubr.msk.f32.gmra.mxu0 %vm1095_vm6, %v7618_v21  ;;  %v6518_v15 = vpop.f32.mrf.mxu0  ;;  %7011 = vmatprep.subr.mxu0 %v2436_v27  ;;  %v9201_v5 = vadd.f32 %v6560_v22, %v3543_v26  ;;  %v2447_v12 = vld [vmem:[%s7680_s30 + $0x1540] sm:$0xff]  ;;  %v2430_v26 = vld [vmem:[%s7680_s30 + $0x14b8] sm:$0xff]  ;;  %v2460_v22 = vld [vmem:[%s7680_s30 + $0x15a8] sm:$0xff] }
 0x22d   : > { %7055 = vmatprep.subr.mxu1 %v2468_v31  ;;  %v6519_v36 = vadd.f32 %v6518_v15, %v6517_v32  ;;  %6022 = vmatprep.mubr.msk.f32.mxu1 %vm1098_vm7, %v7618_v21  ;;  %v6561_v38 = vpop.f32.mrf.mxu1  ;;  %v2462_v27 = vld [vmem:[%s7680_s30 + $0x15b8] sm:$0xff]  ;;  %v2461_v32 = vld [vmem:[%s7680_s30 + $0x15b0] sm:$0xff]  ;;  %v2459_v15 = vld [vmem:[%s7680_s30 + $0x15a0] sm:$0xff] }
 0x22e   : > { %7012 = vmatpush3.msra.mxu0 %v2420_v49  ;;  %7056 = vmatpush3.msra.mxu1 %v2452_v3  ;;  %v2446_v31 = vld [vmem:[%s7680_s30 + $0x1538] sm:$0xff]  ;;  %v2445_v49 = vld [vmem:[%s7680_s30 + $0x1530] sm:$0xff]  ;;  %v2412_v3 = vld [vmem:[%s7680_s30 + $0x1428] sm:$0xff] }
 0x22f   : > { %7013 = vmatprep.subr.mxu0 %v2435_v39  ;;  %v3548_v7 = vadd.f32 %v6519_v36, %v9090_v23  ;;  %6023 = vmatmul.mubr.msk.f32.gmra.mxu1 %vm1097_vm8, %v7618_v21  ;;  %v6562_v55 = vpop.f32.mrf.mxu1  ;;  %v704_v23 = vld [vmem:[#allocation2 + $0xa0] sm:$0xff]  ;;  %v2444_v39 = vld [vmem:[%s7680_s30 + $0x1528] sm:$0xff] }
 0x230   : > { %7057 = vmatprep.subr.mxu1 %v2467_v11  ;;  %v6520_v53 = vpop.f32.mrf.mxu0  ;;  %6016 = vmatprep.mubr.msk.f32.mxu0 %vm1160_vm9, %v7618_v21  ;;  %v6563_v29 = vadd.f32 %v6562_v55, %v6561_v38  ;;  %vm1224_vm13 = vcmp.eq.s32.totalorder %v704_v23, %v9143_v41  ;;  %v705_v41 = vld [vmem:[#allocation2 + $0x48] sm:$0xff]  ;;  %v2411_v11 = vld [vmem:[%s7680_s30 + $0x1420] sm:$0xff] }
 0x231   : > { %7014 = vmatpush3.msra.mxu0 %v2419_v42  ;;  %7058 = vmatpush3.msra.mxu1 %v2451_v44  ;;  %vm1225_vm0 = vcmp.eq.s32.totalorder %v705_v41, %v9161_v62  ;;  %v2414_v62 = vld [vmem:[%s7680_s30 + $0x1438] sm:$0xff]  ;;  %v2443_v36 = vld [vmem:[%s7680_s30 + $0x1520] sm:$0xff]  ;;  %v9272_v38 = vld [vmem:[%s7670_s22 + $0x28] sm:$0xff] }
 0x232   : > { %6017 = vmatmul.mubr.msk.f32.gmra.mxu0 %vm1159_vm10, %v7618_v21  ;;  %v6521_v45 = vpop.f32.mrf.mxu0  ;;  %7015 = vmatprep.subr.mxu0 %v2434_v50  ;;  %v9226_v54 = vadd.f32 %v6563_v29, %v3548_v7  ;;  %v2426_v42 = vld [vmem:[%s7680_s30 + $0x1498] sm:$0xff]  ;;  %v2425_v50 = vld [vmem:[%s7680_s30 + $0x1490] sm:$0xff]  ;;  %v9282_v55 = vrot.slane %v9272_v38, %v8005_v56  ;;  %v2424_v23 = vld [vmem:[%s7680_s30 + $0x1488] sm:$0xff] }
 0x233   : > { %7059 = vmatprep.subr.mxu1 %v2466_v14  ;;  %v6522_v4 = vadd.f32 %v6521_v45, %v6520_v53  ;;  %6024 = vmatprep.mubr.msk.f32.mxu1 %vm1162_vm11, %v7618_v21  ;;  %v6564_v52 = vpop.f32.mrf.mxu1  ;;  %v2410_v44 = vld [vmem:[%s7680_s30 + $0x1418] sm:$0xff]  ;;  %v2457_v14 = vld [vmem:[%s7680_s30 + $0x1590] sm:$0xff]  ;;  %v2456_v29 = vld [vmem:[%s7680_s30 + $0x1588] sm:$0xff] }
 0x234   : > { %7016 = vmatpush3.msra.mxu0 %v2418_v51  ;;  %7060 = vmatpush3.msra.mxu1 %v2450_v61  ;;  %v2442_v7 = vld [vmem:[%s7680_s30 + $0x1518] sm:$0xff]  ;;  %v2441_v53 = vld [vmem:[%s7680_s30 + $0x1510] sm:$0xff]  ;;  %v516_v61 = vld [vmem:[#allocation2 + $0x6a8] sm:$0xff] }
 0x235   : > { %7017 = vmatprep.subr.mxu0 %v2433_v2  ;;  %v3553_v40 = vadd.f32 %v6522_v4, %v9111_v46  ;;  %6025 = vmatmul.mubr.msk.f32.gmra.mxu1 %vm1161_vm12, %v7618_v21  ;;  %v6565_v16 = vpop.f32.mrf.mxu1  ;;  %v2448_v46 = vld [vmem:[%s7680_s30 + $0x1548] sm:$0xff]  ;;  %v9288_v2 = vrot.slane %v9272_v38, %v8018_v63  ;;  %v9294_v4 = vrot.slane %v9272_v38, %v8013_v60  ;;  %v2407_v41 = vld [vmem:[%s7680_s30 + $0x1400] sm:$0xff] }
 0x236   : > { %7061 = vmatprep.subr.mxu1 %v2465_v18  ;;  %6018 = vmatprep.mubr.msk.f32.mxu0 %vm1224_vm13, %v7618_v21  ;;  %v6566_v17 = vadd.f32 %v6565_v16, %v6564_v52  ;;  %v2440_v45 = vld [vmem:[%s7680_s30 + $0x1508] sm:$0xff]  ;;  %v515_v18 = vld [vmem:[#allocation2 + $0x400] sm:$0xff]  ;;  %vm1036_vm1 = vcmp.eq.s32.totalorder %v516_v61, %v9282_v55  ;;  %v517_v16 = vld [vmem:[#allocation2 + $0x3f8] sm:$0xff] }
 0x237   : > { %7018 = vmatpush3.msra.mxu0 %v2417_v10  ;;  %7062 = vmatpush3.msra.mxu1 %v2449_v9  ;;  %v2423_v52 = vld [vmem:[%s7680_s30 + $0x1480] sm:$0xff]  ;;  %vm1035_vm2 = vcmp.eq.s32.totalorder %v515_v18, %v9288_v2 }
 0x238   : > { %6019 = vmatmul.mubr.msk.f32.gmra.mxu0 %vm1223_vm14, %v7618_v21  ;;  %7019 = vmatprep.subr.mxu0 %v2432_v28  ;;  %v9247_v24 = vadd.f32 %v6566_v17, %v3553_v40  ;;  %v2455_v9 = vld [vmem:[%s7680_s30 + $0x1580] sm:$0xff]  ;;  %v518_v40 = vld [vmem:[#allocation2 + $0x2e8] sm:$0xff]  ;;  %v9300_v28 = vrot.slane %v9272_v38, %v8021_v0 }
 0x239   : > { %7063 = vmatprep.subr.mxu1 %v2464_v1  ;;  %6026 = vmatprep.mubr.msk.f32.mxu1 %vm1226_vm15, %v7618_v21  ;;  %v2439_v17 = vld [vmem:[%s7680_s30 + $0x1500] sm:$0xff]  ;;  %vm1038_vm3 = vcmp.eq.s32.totalorder %v518_v40, %v9294_v4 }
 0x23a   : > { %7020 = vmatpush3.msra.mxu0 %v2416_v19  ;;  %7064 = vmatpush3.msra.mxu1 %v2448_v46  ;;  %vm1037_vm4 = vcmp.eq.s32.totalorder %v517_v16, %v9300_v28  ;;  %v2483_v61 = vld [vmem:[%s7680_s30 + $0x1660] sm:$0xff] }
 0x23b   : > { %7021 = vmatprep.subr.mxu0 %v2431_v20  ;;  %6027 = vmatmul.mubr.msk.f32.gmra.mxu1 %vm1225_vm0, %v7618_v21  ;;  %v2515_v18 = vld [vmem:[%s7680_s30 + $0x1760] sm:$0xff] }
 0x23c   : > { %7065 = vmatprep.subr.mxu1 %v2463_v13  ;;  %7022 = vmatpush3.msra.mxu0 %v2415_v48  ;;  %v2502_v13 = vld [vmem:[%s7680_s30 + $0x16f8] sm:$0xff] }
 0x23d   : > { %7066 = vmatpush3.msra.mxu1 %v2447_v12  ;;  %7023 = vmatprep.subr.mxu0 %v2430_v26  ;;  %v2534_v12 = vld [vmem:[%s7680_s30 + $0x17f8] sm:$0xff] }
 0x23e   : > { %7067 = vmatprep.subr.mxu1 %v2462_v27  ;;  %7024 = vmatpush3.msra.mxu0 %v2414_v62  ;;  %v580_v26 = vld [vmem:[#allocation2 + $0x198] sm:$0xff] }
 0x23f   : > { %7068 = vmatpush3.msra.mxu1 %v2446_v31  ;;  %7025 = vmatprep.subr.mxu0 %v2429_v59  ;;  %v2518_v62 = vld [vmem:[%s7680_s30 + $0x1778] sm:$0xff]  ;;  %vm1100_vm5 = vcmp.eq.s32.totalorder %v580_v26, %v9282_v55  ;;  %v2481_v26 = vld [vmem:[%s7680_s30 + $0x1650] sm:$0xff] }
 0x240   : > { %7069 = vmatprep.subr.mxu1 %v2461_v32  ;;  %7026 = vmatpush3.msra.mxu0 %v2413_v58  ;;  %v579_v31 = vld [vmem:[#allocation2 + $0x58] sm:$0xff]  ;;  %v2501_v32 = vld [vmem:[%s7680_s30 + $0x16f0] sm:$0xff] }
 0x241   : > { %7070 = vmatpush3.msra.mxu1 %v2445_v49  ;;  %7027 = vmatprep.subr.mxu0 %v2428_v47  ;;  %v2533_v58 = vld [vmem:[%s7680_s30 + $0x17f0] sm:$0xff]  ;;  %vm1099_vm6 = vcmp.eq.s32.totalorder %v579_v31, %v9288_v2 }
 0x242   : > { %7071 = vmatprep.subr.mxu1 %v2460_v22  ;;  %7028 = vmatpush3.msra.mxu0 %v2412_v3  ;;  %v2485_v47 = vld [vmem:[%s7680_s30 + $0x1670] sm:$0xff]  ;;  %v582_v22 = vld [vmem:[#allocation2 + $0x600] sm:$0xff] }
 0x243   : > { %7072 = vmatpush3.msra.mxu1 %v2444_v39  ;;  %7029 = vmatprep.subr.mxu0 %v2427_v25  ;;  %v2517_v39 = vld [vmem:[%s7680_s30 + $0x1770] sm:$0xff]  ;;  %vm1102_vm7 = vcmp.eq.s32.totalorder %v582_v22, %v9294_v4  ;;  %v2495_v22 = vld [vmem:[%s7680_s30 + $0x16c0] sm:$0xff] }
 0x244   : > { %7073 = vmatprep.subr.mxu1 %v2459_v15  ;;  %7030 = vmatpush3.msra.mxu0 %v2411_v11  ;;  %v2500_v15 = vld [vmem:[%s7680_s30 + $0x16e8] sm:$0xff]  ;;  %v2513_v31 = vld [vmem:[%s7680_s30 + $0x1750] sm:$0xff] }
 0x245   : > { %7074 = vmatpush3.msra.mxu1 %v2443_v36  ;;  %7031 = vmatprep.subr.mxu0 %v2426_v42  ;;  %v2532_v11 = vld [vmem:[%s7680_s30 + $0x17e8] sm:$0xff] }
 0x246   : > { %7075 = vmatprep.subr.mxu1 %v2458_v43  ;;  %v6599_v51 = vpop.f32.mrf.mxu0  ;;  %7032 = vmatpush3.msra.mxu0 %v2410_v44  ;;  %v581_v36 = vld [vmem:[#allocation2 + $0x68] sm:$0xff] }
 0x247   : > { %7076 = vmatpush3.msra.mxu1 %v2442_v7  ;;  %7033 = vmatprep.subr.mxu0 %v2425_v50  ;;  %v2484_v44 = vld [vmem:[%s7680_s30 + $0x1668] sm:$0xff]  ;;  %vm1101_vm8 = vcmp.eq.s32.totalorder %v581_v36, %v9300_v28  ;;  %v2510_v36 = vld [vmem:[%s7680_s30 + $0x1738] sm:$0xff] }
 0x248   : > { %7077 = vmatprep.subr.mxu1 %v2457_v14  ;;  %v6643_v10 = vpop.f32.mrf.mxu1  ;;  %v6600_v57 = vpop.f32.mrf.mxu0  ;;  %7034 = vmatpush3.msra.mxu0 %v2409_v30  ;;  %v644_v7 = vld [vmem:[#allocation2 + $0x2a8] sm:$0xff]  ;;  %v2499_v14 = vld [vmem:[%s7680_s30 + $0x16e0] sm:$0xff] }
 0x249   : > { %7078 = vmatpush3.msra.mxu1 %v2441_v53  ;;  %v6601_v1 = vadd.f32 %v6600_v57, %v6599_v51  ;;  %7035 = vmatprep.subr.mxu0 %v2424_v23  ;;  %v2516_v50 = vld [vmem:[%s7680_s30 + $0x1768] sm:$0xff]  ;;  %v2531_v51 = vld [vmem:[%s7680_s30 + $0x17e0] sm:$0xff]  ;;  %vm1164_vm9 = vcmp.eq.s32.totalorder %v644_v7, %v9282_v55  ;;  %v2498_v57 = vld [vmem:[%s7680_s30 + $0x16d8] sm:$0xff] }
 0x24a   : > { %7079 = vmatprep.subr.mxu1 %v2456_v29  ;;  %v6644_v19 = vpop.f32.mrf.mxu1  ;;  %7036 = vmatpush3.msra.mxu0 %v2408_v35  ;;  %v643_v30 = vld [vmem:[#allocation2 + $0x468] sm:$0xff]  ;;  %v646_v35 = vld [vmem:[#allocation2 + $0x510] sm:$0xff] }
 0x24b   : > { %7080 = vmatpush3.msra.mxu1 %v2440_v45  ;;  %v3708_v46 = vadd.f32 %v6601_v1, %v9173_v8  ;;  %v6645_v20 = vadd.f32 %v6644_v19, %v6643_v10  ;;  %7037 = vmatprep.subr.mxu0 %v2423_v52  ;;  %v2486_v8 = vld [vmem:[%s7680_s30 + $0x1678] sm:$0xff]  ;;  %vm1163_vm10 = vcmp.eq.s32.totalorder %v643_v30, %v9288_v2  ;;  %v2509_v7 = vld [vmem:[%s7680_s30 + $0x1730] sm:$0xff]  ;;  %v2508_v30 = vld [vmem:[%s7680_s30 + $0x1728] sm:$0xff] }
 0x24c   : > { %7081 = vmatprep.subr.mxu1 %v2455_v9  ;;  %v6602_v48 = vpop.f32.mrf.mxu0  ;;  %7038 = vmatpush3.msra.mxu0 %v2407_v41  ;;  %v2530_v52 = vld [vmem:[%s7680_s30 + $0x17d8] sm:$0xff]  ;;  %v645_v9 = vld [vmem:[#allocation2 + $0x1d0] sm:$0xff]  ;;  %vm1166_vm11 = vcmp.eq.s32.totalorder %v646_v35, %v9294_v4 }
 0x24d   : > { %6028 = vmatprep.mubr.msk.f32.mxu0 %vm1036_vm1, %v7618_v21  ;;  %v9312_v27 = vadd.f32 %v6645_v20, %v3708_v46  ;;  %7082 = vmatpush3.msra.mxu1 %v2439_v17  ;;  %v2482_v41 = vld [vmem:[%s7680_s30 + $0x1658] sm:$0xff]  ;;  %v2497_v17 = vld [vmem:[%s7680_s30 + $0x16d0] sm:$0xff]  ;;  %v707_v46 = vld [vmem:[#allocation2 + $0x7c8] sm:$0xff]  ;;  %vm1165_vm12 = vcmp.eq.s32.totalorder %v645_v9, %v9300_v28 }
 0x24e   : > { %6029 = vmatmul.mubr.msk.f32.vlgmr.msra.gmra.mxu0 %vm1035_vm2, %v7618_v21  ;;  %v6603_v59 = vpop.f32.mrf.mxu0  ;;  %6036 = vmatprep.mubr.msk.f32.mxu1 %vm1038_vm3, %v7618_v21  ;;  %v2514_v19 = vld [vmem:[%s7680_s30 + $0x1758] sm:$0xff]  ;;  %vm1227_vm14 = vcmp.eq.s32.totalorder %v707_v46, %v9288_v2  ;;  %v2473_v9 = vld [vmem:[%s7680_s30 + $0x1610] sm:$0xff]  ;;  %v2472_v46 = vld [vmem:[%s7680_s30 + $0x1608] sm:$0xff] }
 0x24f   : > { %7095 = vmatprep.subr.mxu0 %v2502_v13  ;;  %v6604_v49 = vadd.f32 %v6603_v59, %v6602_v48  ;;  %7139 = vmatprep.subr.mxu1 %v2534_v12  ;;  %v6646_v3 = vpop.f32.mrf.mxu1  ;;  %v2529_v13 = vld [vmem:[%s7680_s30 + $0x17d0] sm:$0xff]  ;;  %v2490_v35 = vld [vmem:[%s7680_s30 + $0x1698] sm:$0xff] }
 0x250   : > { %6037 = vmatmul.mubr.msk.f32.vlgmr.msra.gmra.mxu1 %vm1037_vm4, %v7618_v21  ;;  %7096 = vmatpush3.msra.mxu0 %v2486_v8  ;;  %v710_v8 = vld [vmem:[#allocation2 + $0x608] sm:$0xff] }
 0x251   : > { %7140 = vmatpush3.msra.mxu1 %v2518_v62  ;;  %v3713_v25 = vadd.f32 %v6604_v49, %v9201_v5  ;;  %7097 = vmatprep.subr.mxu0 %v2501_v32  ;;  %v6647_v43 = vpop.f32.mrf.mxu1  ;;  %v2496_v32 = vld [vmem:[%s7680_s30 + $0x16c8] sm:$0xff]  ;;  %vm1230_vm15 = vcmp.eq.s32.totalorder %v710_v8, %v9294_v4  ;;  %v2479_v4 = vld [vmem:[%s7680_s30 + $0x1640] sm:$0xff] }
 0x252   : > { %7141 = vmatprep.subr.mxu1 %v2533_v58  ;;  %v6605_v42 = vpop.f32.mrf.mxu0  ;;  %6030 = vmatprep.mubr.msk.f32.mxu0 %vm1100_vm5, %v7618_v21  ;;  %v6648_v5 = vadd.f32 %v6647_v43, %v6646_v3  ;;  %v2528_v58 = vld [vmem:[%s7680_s30 + $0x17c8] sm:$0xff]  ;;  %v2527_v3 = vld [vmem:[%s7680_s30 + $0x17c0] sm:$0xff]  ;;  %v2525_v43 = vld [vmem:[%s7680_s30 + $0x17b0] sm:$0xff] }
 0x253   : > { %7098 = vmatpush3.msra.mxu0 %v2485_v47  ;;  %7142 = vmatpush3.msra.mxu1 %v2517_v39  ;;  %v2480_v47 = vld [vmem:[%s7680_s30 + $0x1648] sm:$0xff] }
 0x254   : > { %6031 = vmatmul.mubr.msk.f32.gmra.mxu0 %vm1099_vm6, %v7618_v21  ;;  %v6606_v53 = vpop.f32.mrf.mxu0  ;;  %7099 = vmatprep.subr.mxu0 %v2500_v15  ;;  %v9340_v23 = vadd.f32 %v6648_v5, %v3713_v25  ;;  %v2511_v25 = vld [vmem:[%s7680_s30 + $0x1740] sm:$0xff]  ;;  %v2494_v15 = vld [vmem:[%s7680_s30 + $0x16b8] sm:$0xff]  ;;  %v2492_v5 = vld [vmem:[%s7680_s30 + $0x16a8] sm:$0xff] }
 0x255   : > { %7143 = vmatprep.subr.mxu1 %v2532_v11  ;;  %v6607_v29 = vadd.f32 %v6606_v53, %v6605_v42  ;;  %6038 = vmatprep.mubr.msk.f32.mxu1 %vm1102_vm7, %v7618_v21  ;;  %v6649_v45 = vpop.f32.mrf.mxu1  ;;  %v2526_v11 = vld [vmem:[%s7680_s30 + $0x17b8] sm:$0xff]  ;;  %v2493_v42 = vld [vmem:[%s7680_s30 + $0x16b0] sm:$0xff]  ;;  %v2491_v53 = vld [vmem:[%s7680_s30 + $0x16a0] sm:$0xff] }
 0x256   : > { %7100 = vmatpush3.msra.mxu0 %v2484_v44  ;;  %7144 = vmatpush3.msra.mxu1 %v2516_v50  ;;  %v2477_v44 = vld [vmem:[%s7680_s30 + $0x1630] sm:$0xff]  ;;  %v2524_v50 = vld [vmem:[%s7680_s30 + $0x17a8] sm:$0xff] }
 0x257   : > { %7101 = vmatprep.subr.mxu0 %v2499_v14  ;;  %v3718_v10 = vadd.f32 %v6607_v29, %v9226_v54  ;;  %6039 = vmatmul.mubr.msk.f32.gmra.mxu1 %vm1101_vm8, %v7618_v21  ;;  %v6650_v1 = vpop.f32.mrf.mxu1  ;;  %v708_v54 = vld [vmem:[#allocation2 + $0x430] sm:$0xff]  ;;  %v2476_v14 = vld [vmem:[%s7680_s30 + $0x1628] sm:$0xff]  ;;  %v2475_v29 = vld [vmem:[%s7680_s30 + $0x1620] sm:$0xff] }
 0x258   : > { %7145 = vmatprep.subr.mxu1 %v2531_v51  ;;  %v6608_v40 = vpop.f32.mrf.mxu0  ;;  %6032 = vmatprep.mubr.msk.f32.mxu0 %vm1164_vm9, %v7618_v21  ;;  %v6651_v16 = vadd.f32 %v6650_v1, %v6649_v45  ;;  %vm1228_vm13 = vcmp.eq.s32.totalorder %v708_v54, %v9282_v55  ;;  %v709_v55 = vld [vmem:[#allocation2 + $0x578] sm:$0xff]  ;;  %v2523_v51 = vld [vmem:[%s7680_s30 + $0x17a0] sm:$0xff]  ;;  %v9418_v1 = vrot.slane %v9272_v38, %v8128_v33  ;;  %v2488_v54 = vld [vmem:[%s7680_s30 + $0x1688] sm:$0xff] }
 0x259   : > { %7102 = vmatpush3.msra.mxu0 %v2483_v61  ;;  %7146 = vmatpush3.msra.mxu1 %v2515_v18  ;;  %vm1229_vm0 = vcmp.eq.s32.totalorder %v709_v55, %v9300_v28  ;;  %v2478_v28 = vld [vmem:[%s7680_s30 + $0x1638] sm:$0xff]  ;;  %v2507_v61 = vld [vmem:[%s7680_s30 + $0x1720] sm:$0xff] }
 0x25a   : > { %6033 = vmatmul.mubr.msk.f32.gmra.mxu0 %vm1163_vm10, %v7618_v21  ;;  %v6609_v20 = vpop.f32.mrf.mxu0  ;;  %7103 = vmatprep.subr.mxu0 %v2498_v57  ;;  %v9365_v48 = vadd.f32 %v6651_v16, %v3718_v10  ;;  %v2522_v45 = vld [vmem:[%s7680_s30 + $0x1798] sm:$0xff]  ;;  %v2489_v57 = vld [vmem:[%s7680_s30 + $0x1690] sm:$0xff]  ;;  %v2520_v16 = vld [vmem:[%s7680_s30 + $0x1788] sm:$0xff] }
 0x25b   : > { %7147 = vmatprep.subr.mxu1 %v2530_v52  ;;  %v6610_v12 = vadd.f32 %v6609_v20, %v6608_v40  ;;  %6040 = vmatprep.mubr.msk.f32.mxu1 %vm1166_vm11, %v7618_v21  ;;  %v6652_v62 = vpop.f32.mrf.mxu1  ;;  %v2474_v18 = vld [vmem:[%s7680_s30 + $0x1618] sm:$0xff]  ;;  %v2521_v52 = vld [vmem:[%s7680_s30 + $0x1790] sm:$0xff]  ;;  %v2504_v20 = vld [vmem:[%s7680_s30 + $0x1708] sm:$0xff] }
 0x25c   : > { %7104 = vmatpush3.msra.mxu0 %v2482_v41  ;;  %7148 = vmatpush3.msra.mxu1 %v2514_v19  ;;  %v2506_v10 = vld [vmem:[%s7680_s30 + $0x1718] sm:$0xff]  ;;  %v2505_v40 = vld [vmem:[%s7680_s30 + $0x1710] sm:$0xff]  ;;  %v520_v19 = vld [vmem:[#allocation2 + $0x5c0] sm:$0xff] }
 0x25d   : > { %7105 = vmatprep.subr.mxu0 %v2497_v17  ;;  %v3723_v59 = vadd.f32 %v6610_v12, %v9247_v24  ;;  %6041 = vmatmul.mubr.msk.f32.gmra.mxu1 %vm1165_vm12, %v7618_v21  ;;  %v6653_v49 = vpop.f32.mrf.mxu1  ;;  %v2512_v24 = vld [vmem:[%s7680_s30 + $0x1748] sm:$0xff]  ;;  %v9424_v17 = vrot.slane %v9272_v38, %v8133_v34  ;;  %v9430_v12 = vrot.slane %v9272_v38, %v8138_v37  ;;  %v2471_v55 = vld [vmem:[%s7680_s30 + $0x1600] sm:$0xff] }
 0x25e   : > { %7149 = vmatprep.subr.mxu1 %v2529_v13  ;;  %6034 = vmatprep.mubr.msk.f32.mxu0 %vm1228_vm13, %v7618_v21  ;;  %v6654_v2 = vadd.f32 %v6653_v49, %v6652_v62  ;;  %v519_v13 = vld [vmem:[#allocation2 + $0x6c8] sm:$0xff]  ;;  %v2487_v62 = vld [vmem:[%s7680_s30 + $0x1680] sm:$0xff]  ;;  %vm1040_vm1 = vcmp.eq.s32.totalorder %v520_v19, %v9418_v1 }
 0x25f   : > { %7106 = vmatpush3.msra.mxu0 %v2481_v26  ;;  %7150 = vmatpush3.msra.mxu1 %v2513_v31  ;;  %v2519_v31 = vld [vmem:[%s7680_s30 + $0x1780] sm:$0xff]  ;;  %v521_v49 = vld [vmem:[#allocation2 + $0x5e8] sm:$0xff]  ;;  %vm1039_vm2 = vcmp.eq.s32.totalorder %v519_v13, %v9424_v17 }
 0x260   : > { %6035 = vmatmul.mubr.msk.f32.gmra.mxu0 %vm1227_vm14, %v7618_v21  ;;  %7107 = vmatprep.subr.mxu0 %v2496_v32  ;;  %v9386_v39 = vadd.f32 %v6654_v2, %v3723_v59  ;;  %v522_v59 = vld [vmem:[#allocation2 + $0x5f8] sm:$0xff]  ;;  %v9436_v32 = vrot.slane %v9272_v38, %v8143_v6  ;;  %v2503_v2 = vld [vmem:[%s7680_s30 + $0x1700] sm:$0xff] }
 0x261   : > { %7151 = vmatprep.subr.mxu1 %v2528_v58  ;;  %6042 = vmatprep.mubr.msk.f32.mxu1 %vm1230_vm15, %v7618_v21  ;;  %vm1042_vm3 = vcmp.eq.s32.totalorder %v522_v59, %v9430_v12  ;;  %v650_v19 = vld [vmem:[#allocation2 + $0x760] sm:$0xff] }
 0x262   : > { %7108 = vmatpush3.msra.mxu0 %v2480_v47  ;;  %7152 = vmatpush3.msra.mxu1 %v2512_v24  ;;  %vm1041_vm4 = vcmp.eq.s32.totalorder %v521_v49, %v9436_v32  ;;  %vm1170_vm11 = vcmp.eq.s32.totalorder %v650_v19, %v9430_v12  ;;  %v2578_v49 = vld [vmem:[%s7680_s30 + $0x1958] sm:$0xff] }
 0x263   : > { %7109 = vmatprep.subr.mxu0 %v2495_v22  ;;  %6043 = vmatmul.mubr.msk.f32.gmra.mxu1 %vm1229_vm0, %v7618_v21  ;;  %v2566_v22 = vld [vmem:[%s7680_s30 + $0x18f8] sm:$0xff] }
 0x264   : > { %7153 = vmatprep.subr.mxu1 %v2527_v3  ;;  %7110 = vmatpush3.msra.mxu0 %v2479_v4  ;;  %v2598_v4 = vld [vmem:[%s7680_s30 + $0x19f8] sm:$0xff] }
 0x265   : > { %7154 = vmatpush3.msra.mxu1 %v2511_v25  ;;  %7111 = vmatprep.subr.mxu0 %v2494_v15  ;;  %v584_v25 = vld [vmem:[#allocation2 + $0xb0] sm:$0xff]  ;;  %v2586_v19 = vld [vmem:[%s7680_s30 + $0x1998] sm:$0xff] }
 0x266   : > { %7155 = vmatprep.subr.mxu1 %v2526_v11  ;;  %7112 = vmatpush3.msra.mxu0 %v2478_v28  ;;  %v2582_v11 = vld [vmem:[%s7680_s30 + $0x1978] sm:$0xff]  ;;  %v583_v28 = vld [vmem:[#allocation2 + $0x3a8] sm:$0xff]  ;;  %vm1104_vm5 = vcmp.eq.s32.totalorder %v584_v25, %v9418_v1  ;;  %v714_v25 = vld [vmem:[#allocation2 + $0x1f0] sm:$0xff] }
 0x267   : > { %7156 = vmatpush3.msra.mxu1 %v2510_v36  ;;  %7113 = vmatprep.subr.mxu0 %v2493_v42  ;;  %v2565_v42 = vld [vmem:[%s7680_s30 + $0x18f0] sm:$0xff]  ;;  %vm1103_vm6 = vcmp.eq.s32.totalorder %v583_v28, %v9424_v17  ;;  %vm1234_vm15 = vcmp.eq.s32.totalorder %v714_v25, %v9430_v12 }
 0x268   : > { %7157 = vmatprep.subr.mxu1 %v2525_v43  ;;  %7114 = vmatpush3.msra.mxu0 %v2477_v44  ;;  %v2597_v43 = vld [vmem:[%s7680_s30 + $0x19f0] sm:$0xff] }
 0x269   : > { %7158 = vmatpush3.msra.mxu1 %v2509_v7  ;;  %7115 = vmatprep.subr.mxu0 %v2492_v5  ;;  %v2549_v7 = vld [vmem:[%s7680_s30 + $0x1870] sm:$0xff]  ;;  %v586_v5 = vld [vmem:[#allocation2 + $0x158] sm:$0xff] }
 0x26a   : > { %7159 = vmatprep.subr.mxu1 %v2524_v50  ;;  %7116 = vmatpush3.msra.mxu0 %v2476_v14  ;;  %v2581_v14 = vld [vmem:[%s7680_s30 + $0x1970] sm:$0xff]  ;;  %vm1106_vm7 = vcmp.eq.s32.totalorder %v586_v5, %v9430_v12  ;;  %v2591_v5 = vld [vmem:[%s7680_s30 + $0x19c0] sm:$0xff] }
 0x26b   : > { %7160 = vmatpush3.msra.mxu1 %v2508_v30  ;;  %7117 = vmatprep.subr.mxu0 %v2491_v53  ;;  %v2564_v53 = vld [vmem:[%s7680_s30 + $0x18e8] sm:$0xff]  ;;  %v2543_v12 = vld [vmem:[%s7680_s30 + $0x1840] sm:$0xff] }
 0x26c   : > { %7161 = vmatprep.subr.mxu1 %v2523_v51  ;;  %7118 = vmatpush3.msra.mxu0 %v2475_v29  ;;  %v2596_v51 = vld [vmem:[%s7680_s30 + $0x19e8] sm:$0xff]  ;;  %v585_v29 = vld [vmem:[#allocation2 + $0x630] sm:$0xff] }
 0x26d   : > { %7162 = vmatpush3.msra.mxu1 %v2507_v61  ;;  %7119 = vmatprep.subr.mxu0 %v2490_v35  ;;  %vm1105_vm8 = vcmp.eq.s32.totalorder %v585_v29, %v9436_v32  ;;  %v2557_v29 = vld [vmem:[%s7680_s30 + $0x18b0] sm:$0xff] }
 0x26e   : > { %7163 = vmatprep.subr.mxu1 %v2522_v45  ;;  %v6687_v41 = vpop.f32.mrf.mxu0  ;;  %7120 = vmatpush3.msra.mxu0 %v2474_v18  ;;  %v2548_v45 = vld [vmem:[%s7680_s30 + $0x1868] sm:$0xff]  ;;  %v648_v18 = vld [vmem:[#allocation2 + $0x130] sm:$0xff] }
 0x26f   : > { %7164 = vmatpush3.msra.mxu1 %v2506_v10  ;;  %7121 = vmatprep.subr.mxu0 %v2489_v57  ;;  %v2580_v10 = vld [vmem:[%s7680_s30 + $0x1968] sm:$0xff]  ;;  %v2563_v57 = vld [vmem:[%s7680_s30 + $0x18e0] sm:$0xff]  ;;  %vm1168_vm9 = vcmp.eq.s32.totalorder %v648_v18, %v9418_v1 }
 0x270   : > { %7165 = vmatprep.subr.mxu1 %v2521_v52  ;;  %v6731_v26 = vpop.f32.mrf.mxu1  ;;  %v6688_v8 = vpop.f32.mrf.mxu0  ;;  %7122 = vmatpush3.msra.mxu0 %v2473_v9  ;;  %v647_v52 = vld [vmem:[#allocation2 + $0x750] sm:$0xff]  ;;  %v2556_v18 = vld [vmem:[%s7680_s30 + $0x18a8] sm:$0xff] }
 0x271   : > { %7166 = vmatpush3.msra.mxu1 %v2505_v40  ;;  %v6689_v58 = vadd.f32 %v6688_v8, %v6687_v41  ;;  %7123 = vmatprep.subr.mxu0 %v2488_v54  ;;  %v2595_v40 = vld [vmem:[%s7680_s30 + $0x19e0] sm:$0xff]  ;;  %vm1167_vm10 = vcmp.eq.s32.totalorder %v647_v52, %v9424_v17  ;;  %v2594_v8 = vld [vmem:[%s7680_s30 + $0x19d8] sm:$0xff] }
 0x272   : > { %7167 = vmatprep.subr.mxu1 %v2520_v16  ;;  %v6732_v47 = vpop.f32.mrf.mxu1  ;;  %7124 = vmatpush3.msra.mxu0 %v2472_v46  ;;  %v2547_v16 = vld [vmem:[%s7680_s30 + $0x1860] sm:$0xff] }
 0x273   : > { %7168 = vmatpush3.msra.mxu1 %v2504_v20  ;;  %v3878_v24 = vadd.f32 %v6689_v58, %v9312_v27  ;;  %v6733_v38 = vadd.f32 %v6732_v47, %v6731_v26  ;;  %7125 = vmatprep.subr.mxu0 %v2487_v62  ;;  %v2550_v27 = vld [vmem:[%s7680_s30 + $0x1878] sm:$0xff]  ;;  %v2579_v20 = vld [vmem:[%s7680_s30 + $0x1960] sm:$0xff]  ;;  %v649_v62 = vld [vmem:[#allocation2 + $0x28] sm:$0xff] }
 0x274   : > { %7169 = vmatprep.subr.mxu1 %v2519_v31  ;;  %v6690_v3 = vpop.f32.mrf.mxu0  ;;  %7126 = vmatpush3.msra.mxu0 %v2471_v55  ;;  %v2562_v26 = vld [vmem:[%s7680_s30 + $0x18d8] sm:$0xff]  ;;  %v2561_v47 = vld [vmem:[%s7680_s30 + $0x18d0] sm:$0xff]  ;;  %vm1169_vm12 = vcmp.eq.s32.totalorder %v649_v62, %v9436_v32  ;;  %v2555_v52 = vld [vmem:[%s7680_s30 + $0x18a0] sm:$0xff] }
 0x275   : > { %6044 = vmatprep.mubr.msk.f32.mxu0 %vm1040_vm1, %v7618_v21  ;;  %v9448_v15 = vadd.f32 %v6733_v38, %v3878_v24  ;;  %7170 = vmatpush3.msra.mxu1 %v2503_v2  ;;  %v2546_v58 = vld [vmem:[%s7680_s30 + $0x1858] sm:$0xff]  ;;  %v2593_v38 = vld [vmem:[%s7680_s30 + $0x19d0] sm:$0xff] }
 0x276   : > { %6045 = vmatmul.mubr.msk.f32.vlgmr.msra.gmra.mxu0 %vm1039_vm2, %v7618_v21  ;;  %v6691_v36 = vpop.f32.mrf.mxu0  ;;  %6052 = vmatprep.mubr.msk.f32.mxu1 %vm1042_vm3, %v7618_v21  ;;  %v711_v2 = vld [vmem:[#allocation2 + $0x638] sm:$0xff]  ;;  %v2537_v62 = vld [vmem:[%s7680_s30 + $0x1810] sm:$0xff] }
 0x277   : > { %7183 = vmatprep.subr.mxu0 %v2566_v22  ;;  %v6692_v44 = vadd.f32 %v6691_v36, %v6690_v3  ;;  %7227 = vmatprep.subr.mxu1 %v2598_v4  ;;  %v6734_v50 = vpop.f32.mrf.mxu1  ;;  %v2545_v4 = vld [vmem:[%s7680_s30 + $0x1850] sm:$0xff]  ;;  %vm1231_vm14 = vcmp.eq.s32.totalorder %v711_v2, %v9424_v17  ;;  %v2560_v36 = vld [vmem:[%s7680_s30 + $0x18c8] sm:$0xff] }
 0x278   : > { %6053 = vmatmul.mubr.msk.f32.vlgmr.msra.gmra.mxu1 %vm1041_vm4, %v7618_v21  ;;  %7184 = vmatpush3.msra.mxu0 %v2550_v27  ;;  %v2536_v2 = vld [vmem:[%s7680_s30 + $0x1808] sm:$0xff] }
 0x279   : > { %7228 = vmatpush3.msra.mxu1 %v2582_v11  ;;  %v3883_v30 = vadd.f32 %v6692_v44, %v9340_v23  ;;  %7185 = vmatprep.subr.mxu0 %v2565_v42  ;;  %v6735_v35 = vpop.f32.mrf.mxu1  ;;  %v2577_v11 = vld [vmem:[%s7680_s30 + $0x1950] sm:$0xff]  ;;  %v2592_v42 = vld [vmem:[%s7680_s30 + $0x19c8] sm:$0xff] }
 0x27a   : > { %7229 = vmatprep.subr.mxu1 %v2597_v43  ;;  %v6693_v61 = vpop.f32.mrf.mxu0  ;;  %6046 = vmatprep.mubr.msk.f32.mxu0 %vm1104_vm5, %v7618_v21  ;;  %v6736_v23 = vadd.f32 %v6735_v35, %v6734_v50  ;;  %v2544_v44 = vld [vmem:[%s7680_s30 + $0x1848] sm:$0xff]  ;;  %v2541_v35 = vld [vmem:[%s7680_s30 + $0x1830] sm:$0xff] }
 0x27b   : > { %7186 = vmatpush3.msra.mxu0 %v2549_v7  ;;  %7230 = vmatpush3.msra.mxu1 %v2581_v14  ;;  %v2559_v7 = vld [vmem:[%s7680_s30 + $0x18c0] sm:$0xff] }
 0x27c   : > { %6047 = vmatmul.mubr.msk.f32.gmra.mxu0 %vm1103_vm6, %v7618_v21  ;;  %v6694_v9 = vpop.f32.mrf.mxu0  ;;  %7187 = vmatprep.subr.mxu0 %v2564_v53  ;;  %v9476_v41 = vadd.f32 %v6736_v23, %v3883_v30  ;;  %v2575_v14 = vld [vmem:[%s7680_s30 + $0x1940] sm:$0xff]  ;;  %v2558_v30 = vld [vmem:[%s7680_s30 + $0x18b8] sm:$0xff]  ;;  %v2588_v23 = vld [vmem:[%s7680_s30 + $0x19a8] sm:$0xff] }
 0x27d   : > { %7231 = vmatprep.subr.mxu1 %v2596_v51  ;;  %v6695_v54 = vadd.f32 %v6694_v9, %v6693_v61  ;;  %6054 = vmatprep.mubr.msk.f32.mxu1 %vm1106_vm7, %v7618_v21  ;;  %v6737_v46 = vpop.f32.mrf.mxu1  ;;  %v2590_v53 = vld [vmem:[%s7680_s30 + $0x19b8] sm:$0xff]  ;;  %v2589_v61 = vld [vmem:[%s7680_s30 + $0x19b0] sm:$0xff]  ;;  %v2587_v9 = vld [vmem:[%s7680_s30 + $0x19a0] sm:$0xff] }
 0x27e   : > { %7188 = vmatpush3.msra.mxu0 %v2548_v45  ;;  %7232 = vmatpush3.msra.mxu1 %v2580_v10  ;;  %v2574_v51 = vld [vmem:[%s7680_s30 + $0x1938] sm:$0xff]  ;;  %v2573_v45 = vld [vmem:[%s7680_s30 + $0x1930] sm:$0xff]  ;;  %v2540_v10 = vld [vmem:[%s7680_s30 + $0x1828] sm:$0xff] }
 0x27f   : > { %7189 = vmatprep.subr.mxu0 %v2563_v57  ;;  %v3888_v13 = vadd.f32 %v6695_v54, %v9365_v48  ;;  %6055 = vmatmul.mubr.msk.f32.gmra.mxu1 %vm1105_vm8, %v7618_v21  ;;  %v6738_v59 = vpop.f32.mrf.mxu1  ;;  %v712_v48 = vld [vmem:[#allocation2 + $0x4b8] sm:$0xff]  ;;  %v2572_v57 = vld [vmem:[%s7680_s30 + $0x1928] sm:$0xff]  ;;  %v2571_v54 = vld [vmem:[%s7680_s30 + $0x1920] sm:$0xff] }
 0x280   : > { %7233 = vmatprep.subr.mxu1 %v2595_v40  ;;  %v6696_v31 = vpop.f32.mrf.mxu0  ;;  %6048 = vmatprep.mubr.msk.f32.mxu0 %vm1168_vm9, %v7618_v21  ;;  %v6739_v55 = vadd.f32 %v6738_v59, %v6737_v46  ;;  %vm1232_vm13 = vcmp.eq.s32.totalorder %v712_v48, %v9418_v1  ;;  %v713_v1 = vld [vmem:[#allocation2 + $0x298] sm:$0xff]  ;;  %v2539_v40 = vld [vmem:[%s7680_s30 + $0x1820] sm:$0xff]  ;;  %v9547_v46 = vld [vmem:[%s7670_s22 + $0x30] sm:$0xff] }
 0x281   : > { %7190 = vmatpush3.msra.mxu0 %v2547_v16  ;;  %7234 = vmatpush3.msra.mxu1 %v2579_v20  ;;  %vm1233_vm0 = vcmp.eq.s32.totalorder %v713_v1, %v9436_v32  ;;  %v2542_v32 = vld [vmem:[%s7680_s30 + $0x1838] sm:$0xff]  ;;  %v9557_v59 = vrot.slane %v9547_v46, %v8005_v56  ;;  %v2552_v48 = vld [vmem:[%s7680_s30 + $0x1888] sm:$0xff]  ;;  %v2535_v1 = vld [vmem:[%s7680_s30 + $0x1800] sm:$0xff] }
 0x282   : > { %6049 = vmatmul.mubr.msk.f32.gmra.mxu0 %vm1167_vm10, %v7618_v21  ;;  %v6697_v24 = vpop.f32.mrf.mxu0  ;;  %7191 = vmatprep.subr.mxu0 %v2562_v26  ;;  %v9501_v22 = vadd.f32 %v6739_v55, %v3888_v13  ;;  %v2554_v16 = vld [vmem:[%s7680_s30 + $0x1898] sm:$0xff]  ;;  %v2553_v26 = vld [vmem:[%s7680_s30 + $0x1890] sm:$0xff]  ;;  %v2584_v55 = vld [vmem:[%s7680_s30 + $0x1988] sm:$0xff] }
 0x283   : > { %7235 = vmatprep.subr.mxu1 %v2594_v8  ;;  %v6698_v3 = vadd.f32 %v6697_v24, %v6696_v31  ;;  %6056 = vmatprep.mubr.msk.f32.mxu1 %vm1170_vm11, %v7618_v21  ;;  %v6740_v27 = vpop.f32.mrf.mxu1  ;;  %v2538_v20 = vld [vmem:[%s7680_s30 + $0x1818] sm:$0xff]  ;;  %v2585_v8 = vld [vmem:[%s7680_s30 + $0x1990] sm:$0xff]  ;;  %v2568_v24 = vld [vmem:[%s7680_s30 + $0x1908] sm:$0xff] }
 0x284   : > { %7192 = vmatpush3.msra.mxu0 %v2546_v58  ;;  %7236 = vmatpush3.msra.mxu1 %v2578_v49  ;;  %v2570_v13 = vld [vmem:[%s7680_s30 + $0x1918] sm:$0xff]  ;;  %v2569_v31 = vld [vmem:[%s7680_s30 + $0x1910] sm:$0xff]  ;;  %v524_v49 = vld [vmem:[#allocation2 + $0x520] sm:$0xff] }
 0x285   : > { %7193 = vmatprep.subr.mxu0 %v2561_v47  ;;  %v3893_v28 = vadd.f32 %v6698_v3, %v9386_v39  ;;  %6057 = vmatmul.mubr.msk.f32.gmra.mxu1 %vm1169_vm12, %v7618_v21  ;;  %v6741_v43 = vpop.f32.mrf.mxu1  ;;  %v2576_v39 = vld [vmem:[%s7680_s30 + $0x1948] sm:$0xff]  ;;  %v9563_v47 = vrot.slane %v9547_v46, %v8018_v63  ;;  %v9569_v3 = vrot.slane %v9547_v46, %v8013_v60 }
 0x286   : > { %7237 = vmatprep.subr.mxu1 %v2593_v38  ;;  %6050 = vmatprep.mubr.msk.f32.mxu0 %vm1232_vm13, %v7618_v21  ;;  %v6742_v17 = vadd.f32 %v6741_v43, %v6740_v27  ;;  %v523_v38 = vld [vmem:[#allocation2 + $0x770] sm:$0xff]  ;;  %v2551_v27 = vld [vmem:[%s7680_s30 + $0x1880] sm:$0xff]  ;;  %vm1044_vm1 = vcmp.eq.s32.totalorder %v524_v49, %v9557_v59 }
 0x287   : > { %7194 = vmatpush3.msra.mxu0 %v2545_v4  ;;  %7238 = vmatpush3.msra.mxu1 %v2577_v11  ;;  %v2583_v11 = vld [vmem:[%s7680_s30 + $0x1980] sm:$0xff]  ;;  %vm1043_vm2 = vcmp.eq.s32.totalorder %v523_v38, %v9563_v47 }
 0x288   : > { %6051 = vmatmul.mubr.msk.f32.gmra.mxu0 %vm1231_vm14, %v7618_v21  ;;  %7195 = vmatprep.subr.mxu0 %v2560_v36  ;;  %v9522_v50 = vadd.f32 %v6742_v17, %v3893_v28  ;;  %v526_v28 = vld [vmem:[#allocation2 + $0x250] sm:$0xff]  ;;  %v9575_v36 = vrot.slane %v9547_v46, %v8021_v0  ;;  %v525_v43 = vld [vmem:[#allocation2 + $0x640] sm:$0xff] }
 0x289   : > { %7239 = vmatprep.subr.mxu1 %v2592_v42  ;;  %6058 = vmatprep.mubr.msk.f32.mxu1 %vm1234_vm15, %v7618_v21  ;;  %v2567_v17 = vld [vmem:[%s7680_s30 + $0x1900] sm:$0xff]  ;;  %vm1046_vm3 = vcmp.eq.s32.totalorder %v526_v28, %v9569_v3 }
 0x28a   : > { %7196 = vmatpush3.msra.mxu0 %v2544_v44  ;;  %7240 = vmatpush3.msra.mxu1 %v2576_v39  ;;  %vm1045_vm4 = vcmp.eq.s32.totalorder %v525_v43, %v9575_v36  ;;  %v2611_v49 = vld [vmem:[%s7680_s30 + $0x1a60] sm:$0xff] }
 0x28b   : > { %7197 = vmatprep.subr.mxu0 %v2559_v7  ;;  %6059 = vmatmul.mubr.msk.f32.gmra.mxu1 %vm1233_vm0, %v7618_v21  ;;  %v2643_v38 = vld [vmem:[%s7680_s30 + $0x1b60] sm:$0xff] }
 0x28c   : > { %7241 = vmatprep.subr.mxu1 %v2591_v5  ;;  %7198 = vmatpush3.msra.mxu0 %v2543_v12  ;;  %v2630_v5 = vld [vmem:[%s7680_s30 + $0x1af8] sm:$0xff] }
 0x28d   : > { %7242 = vmatpush3.msra.mxu1 %v2575_v14  ;;  %7199 = vmatprep.subr.mxu0 %v2558_v30  ;;  %v2662_v14 = vld [vmem:[%s7680_s30 + $0x1bf8] sm:$0xff]  ;;  %v588_v30 = vld [vmem:[#allocation2 + $0x1e0] sm:$0xff] }
 0x28e   : > { %7243 = vmatprep.subr.mxu1 %v2590_v53  ;;  %7200 = vmatpush3.msra.mxu0 %v2542_v32  ;;  %v2646_v32 = vld [vmem:[%s7680_s30 + $0x1b78] sm:$0xff]  ;;  %vm1108_vm5 = vcmp.eq.s32.totalorder %v588_v30, %v9557_v59  ;;  %v2609_v30 = vld [vmem:[%s7680_s30 + $0x1a50] sm:$0xff] }
 0x28f   : > { %7244 = vmatpush3.msra.mxu1 %v2574_v51  ;;  %7201 = vmatprep.subr.mxu0 %v2557_v29  ;;  %v587_v51 = vld [vmem:[#allocation2 + $0x370] sm:$0xff] }
 0x290   : > { %7245 = vmatprep.subr.mxu1 %v2589_v61  ;;  %7202 = vmatpush3.msra.mxu0 %v2541_v35  ;;  %v2629_v61 = vld [vmem:[%s7680_s30 + $0x1af0] sm:$0xff]  ;;  %vm1107_vm6 = vcmp.eq.s32.totalorder %v587_v51, %v9563_v47 }
 0x291   : > { %7246 = vmatpush3.msra.mxu1 %v2573_v45  ;;  %7203 = vmatprep.subr.mxu0 %v2556_v18  ;;  %v2661_v35 = vld [vmem:[%s7680_s30 + $0x1bf0] sm:$0xff] }
 0x292   : > { %7247 = vmatprep.subr.mxu1 %v2588_v23  ;;  %7204 = vmatpush3.msra.mxu0 %v2540_v10  ;;  %v2613_v18 = vld [vmem:[%s7680_s30 + $0x1a70] sm:$0xff]  ;;  %v590_v23 = vld [vmem:[#allocation2 + $0x6c0] sm:$0xff] }
 0x293   : > { %7248 = vmatpush3.msra.mxu1 %v2572_v57  ;;  %7205 = vmatprep.subr.mxu0 %v2555_v52  ;;  %v2645_v57 = vld [vmem:[%s7680_s30 + $0x1b70] sm:$0xff]  ;;  %vm1110_vm7 = vcmp.eq.s32.totalorder %v590_v23, %v9569_v3  ;;  %v2623_v23 = vld [vmem:[%s7680_s30 + $0x1ac0] sm:$0xff] }
 0x294   : > { %7249 = vmatprep.subr.mxu1 %v2587_v9  ;;  %7206 = vmatpush3.msra.mxu0 %v2539_v40  ;;  %v2628_v9 = vld [vmem:[%s7680_s30 + $0x1ae8] sm:$0xff]  ;;  %v2641_v51 = vld [vmem:[%s7680_s30 + $0x1b50] sm:$0xff] }
 0x295   : > { %7250 = vmatpush3.msra.mxu1 %v2571_v54  ;;  %7207 = vmatprep.subr.mxu0 %v2554_v16  ;;  %v2660_v40 = vld [vmem:[%s7680_s30 + $0x1be8] sm:$0xff]  ;;  %v589_v54 = vld [vmem:[#allocation2 + $0x7b0] sm:$0xff] }
 0x296   : > { %7251 = vmatprep.subr.mxu1 %v2586_v19  ;;  %v6775_v58 = vpop.f32.mrf.mxu0  ;;  %7208 = vmatpush3.msra.mxu0 %v2538_v20  ;;  %v2612_v20 = vld [vmem:[%s7680_s30 + $0x1a68] sm:$0xff]  ;;  %vm1109_vm8 = vcmp.eq.s32.totalorder %v589_v54, %v9575_v36  ;;  %v2638_v54 = vld [vmem:[%s7680_s30 + $0x1b38] sm:$0xff] }
 0x297   : > { %7252 = vmatpush3.msra.mxu1 %v2570_v13  ;;  %7209 = vmatprep.subr.mxu0 %v2553_v26  ;;  %v652_v13 = vld [vmem:[#allocation2 + $0x228] sm:$0xff] }
 0x298   : > { %7253 = vmatprep.subr.mxu1 %v2585_v8  ;;  %v6819_v4 = vpop.f32.mrf.mxu1  ;;  %v6776_v25 = vpop.f32.mrf.mxu0  ;;  %7210 = vmatpush3.msra.mxu0 %v2537_v62  ;;  %v2644_v26 = vld [vmem:[%s7680_s30 + $0x1b68] sm:$0xff]  ;;  %v2627_v8 = vld [vmem:[%s7680_s30 + $0x1ae0] sm:$0xff]  ;;  %v651_v62 = vld [vmem:[#allocation2 + $0x5d0] sm:$0xff]  ;;  %vm1172_vm9 = vcmp.eq.s32.totalorder %v652_v13, %v9557_v59 }
 0x299   : > { %7254 = vmatpush3.msra.mxu1 %v2569_v31  ;;  %v6777_v42 = vadd.f32 %v6776_v25, %v6775_v58  ;;  %7211 = vmatprep.subr.mxu0 %v2552_v48  ;;  %v2659_v58 = vld [vmem:[%s7680_s30 + $0x1be0] sm:$0xff]  ;;  %vm1171_vm10 = vcmp.eq.s32.totalorder %v651_v62, %v9563_v47  ;;  %v2626_v25 = vld [vmem:[%s7680_s30 + $0x1ad8] sm:$0xff]  ;;  %v2637_v13 = vld [vmem:[%s7680_s30 + $0x1b30] sm:$0xff] }
 0x29a   : > { %7255 = vmatprep.subr.mxu1 %v2584_v55  ;;  %v6820_v44 = vpop.f32.mrf.mxu1  ;;  %7212 = vmatpush3.msra.mxu0 %v2536_v2  ;;  %v654_v2 = vld [vmem:[#allocation2 + $0x290] sm:$0xff]  ;;  %v2636_v62 = vld [vmem:[%s7680_s30 + $0x1b28] sm:$0xff] }
 0x29b   : > { %7256 = vmatpush3.msra.mxu1 %v2568_v24  ;;  %v4048_v39 = vadd.f32 %v6777_v42, %v9448_v15  ;;  %v6821_v7 = vadd.f32 %v6820_v44, %v6819_v4  ;;  %7213 = vmatprep.subr.mxu0 %v2551_v27  ;;  %v2614_v15 = vld [vmem:[%s7680_s30 + $0x1a78] sm:$0xff]  ;;  %vm1174_vm11 = vcmp.eq.s32.totalorder %v654_v2, %v9569_v3 }
 0x29c   : > { %7257 = vmatprep.subr.mxu1 %v2583_v11  ;;  %v6778_v12 = vpop.f32.mrf.mxu0  ;;  %7214 = vmatpush3.msra.mxu0 %v2535_v1  ;;  %v2658_v27 = vld [vmem:[%s7680_s30 + $0x1bd8] sm:$0xff]  ;;  %v653_v11 = vld [vmem:[#allocation2 + $0x208] sm:$0xff] }
 0x29d   : > { %6060 = vmatprep.mubr.msk.f32.mxu0 %vm1044_vm1, %v7618_v21  ;;  %v9587_v53 = vadd.f32 %v6821_v7, %v4048_v39  ;;  %7258 = vmatpush3.msra.mxu1 %v2567_v17  ;;  %v2610_v1 = vld [vmem:[%s7680_s30 + $0x1a58] sm:$0xff]  ;;  %v2625_v17 = vld [vmem:[%s7680_s30 + $0x1ad0] sm:$0xff]  ;;  %v715_v39 = vld [vmem:[#allocation2] sm:$0xff]  ;;  %vm1173_vm12 = vcmp.eq.s32.totalorder %v653_v11, %v9575_v36 }
 0x29e   : > { %6061 = vmatmul.mubr.msk.f32.vlgmr.msra.gmra.mxu0 %vm1043_vm2, %v7618_v21  ;;  %v6779_v29 = vpop.f32.mrf.mxu0  ;;  %6068 = vmatprep.mubr.msk.f32.mxu1 %vm1046_vm3, %v7618_v21  ;;  %v2642_v44 = vld [vmem:[%s7680_s30 + $0x1b58] sm:$0xff]  ;;  %vm1235_vm14 = vcmp.eq.s32.totalorder %v715_v39, %v9563_v47  ;;  %v2601_v11 = vld [vmem:[%s7680_s30 + $0x1a10] sm:$0xff]  ;;  %v2600_v39 = vld [vmem:[%s7680_s30 + $0x1a08] sm:$0xff] }
 0x29f   : > { %7271 = vmatprep.subr.mxu0 %v2630_v5  ;;  %v6780_v45 = vadd.f32 %v6779_v29, %v6778_v12  ;;  %7315 = vmatprep.subr.mxu1 %v2662_v14  ;;  %v6822_v10 = vpop.f32.mrf.mxu1  ;;  %v2657_v5 = vld [vmem:[%s7680_s30 + $0x1bd0] sm:$0xff]  ;;  %v2618_v2 = vld [vmem:[%s7680_s30 + $0x1a98] sm:$0xff] }
 0x2a0   : > { %6069 = vmatmul.mubr.msk.f32.vlgmr.msra.gmra.mxu1 %vm1045_vm4, %v7618_v21  ;;  %7272 = vmatpush3.msra.mxu0 %v2614_v15  ;;  %v718_v15 = vld [vmem:[#allocation2 + $0x480] sm:$0xff] }
 0x2a1   : > { %7316 = vmatpush3.msra.mxu1 %v2646_v32  ;;  %v4053_v52 = vadd.f32 %v6780_v45, %v9476_v41  ;;  %7273 = vmatprep.subr.mxu0 %v2629_v61  ;;  %v6823_v19 = vpop.f32.mrf.mxu1  ;;  %v2624_v61 = vld [vmem:[%s7680_s30 + $0x1ac8] sm:$0xff]  ;;  %vm1238_vm15 = vcmp.eq.s32.totalorder %v718_v15, %v9569_v3  ;;  %v2607_v3 = vld [vmem:[%s7680_s30 + $0x1a40] sm:$0xff] }
 0x2a2   : > { %7317 = vmatprep.subr.mxu1 %v2661_v35  ;;  %v6781_v16 = vpop.f32.mrf.mxu0  ;;  %6062 = vmatprep.mubr.msk.f32.mxu0 %vm1108_vm5, %v7618_v21  ;;  %v6824_v41 = vadd.f32 %v6823_v19, %v6822_v10  ;;  %v2656_v35 = vld [vmem:[%s7680_s30 + $0x1bc8] sm:$0xff]  ;;  %v2655_v10 = vld [vmem:[%s7680_s30 + $0x1bc0] sm:$0xff]  ;;  %v2653_v19 = vld [vmem:[%s7680_s30 + $0x1bb0] sm:$0xff] }
 0x2a3   : > { %7274 = vmatpush3.msra.mxu0 %v2613_v18  ;;  %7318 = vmatpush3.msra.mxu1 %v2645_v57  ;;  %v2608_v18 = vld [vmem:[%s7680_s30 + $0x1a48] sm:$0xff] }
 0x2a4   : > { %6063 = vmatmul.mubr.msk.f32.gmra.mxu0 %vm1107_vm6, %v7618_v21  ;;  %v6782_v31 = vpop.f32.mrf.mxu0  ;;  %7275 = vmatprep.subr.mxu0 %v2628_v9  ;;  %v9615_v48 = vadd.f32 %v6824_v41, %v4053_v52  ;;  %v2639_v52 = vld [vmem:[%s7680_s30 + $0x1b40] sm:$0xff]  ;;  %v2622_v9 = vld [vmem:[%s7680_s30 + $0x1ab8] sm:$0xff]  ;;  %v2620_v41 = vld [vmem:[%s7680_s30 + $0x1aa8] sm:$0xff] }
 0x2a5   : > { %7319 = vmatprep.subr.mxu1 %v2660_v40  ;;  %v6783_v55 = vadd.f32 %v6782_v31, %v6781_v16  ;;  %6070 = vmatprep.mubr.msk.f32.mxu1 %vm1110_vm7, %v7618_v21  ;;  %v6825_v24 = vpop.f32.mrf.mxu1  ;;  %v2654_v40 = vld [vmem:[%s7680_s30 + $0x1bb8] sm:$0xff]  ;;  %v2621_v16 = vld [vmem:[%s7680_s30 + $0x1ab0] sm:$0xff]  ;;  %v2619_v31 = vld [vmem:[%s7680_s30 + $0x1aa0] sm:$0xff] }
 0x2a6   : > { %7276 = vmatpush3.msra.mxu0 %v2612_v20  ;;  %7320 = vmatpush3.msra.mxu1 %v2644_v26  ;;  %v2605_v20 = vld [vmem:[%s7680_s30 + $0x1a30] sm:$0xff]  ;;  %v2652_v26 = vld [vmem:[%s7680_s30 + $0x1ba8] sm:$0xff] }
 0x2a7   : > { %7277 = vmatprep.subr.mxu0 %v2627_v8  ;;  %v4058_v4 = vadd.f32 %v6783_v55, %v9501_v22  ;;  %6071 = vmatmul.mubr.msk.f32.gmra.mxu1 %vm1109_vm8, %v7618_v21  ;;  %v6826_v42 = vpop.f32.mrf.mxu1  ;;  %v716_v22 = vld [vmem:[#allocation2 + $0x2d0] sm:$0xff]  ;;  %v2604_v8 = vld [vmem:[%s7680_s30 + $0x1a28] sm:$0xff]  ;;  %v2603_v55 = vld [vmem:[%s7680_s30 + $0x1a20] sm:$0xff] }
 0x2a8   : > { %7321 = vmatprep.subr.mxu1 %v2659_v58  ;;  %v6784_v28 = vpop.f32.mrf.mxu0  ;;  %6064 = vmatprep.mubr.msk.f32.mxu0 %vm1172_vm9, %v7618_v21  ;;  %v6827_v43 = vadd.f32 %v6826_v42, %v6825_v24  ;;  %vm1236_vm13 = vcmp.eq.s32.totalorder %v716_v22, %v9557_v59  ;;  %v717_v59 = vld [vmem:[#allocation2 + $0x650] sm:$0xff]  ;;  %v2651_v58 = vld [vmem:[%s7680_s30 + $0x1ba0] sm:$0xff]  ;;  %v2650_v24 = vld [vmem:[%s7680_s30 + $0x1b98] sm:$0xff]  ;;  %v9693_v42 = vrot.slane %v9547_v46, %v8128_v33 }
 0x2a9   : > { %7278 = vmatpush3.msra.mxu0 %v2611_v49  ;;  %7322 = vmatpush3.msra.mxu1 %v2643_v38  ;;  %vm1237_vm0 = vcmp.eq.s32.totalorder %v717_v59, %v9575_v36  ;;  %v2606_v36 = vld [vmem:[%s7680_s30 + $0x1a38] sm:$0xff]  ;;  %v2635_v49 = vld [vmem:[%s7680_s30 + $0x1b20] sm:$0xff]  ;;  %v2616_v22 = vld [vmem:[%s7680_s30 + $0x1a88] sm:$0xff] }
 0x2aa   : > { %6065 = vmatmul.mubr.msk.f32.gmra.mxu0 %vm1171_vm10, %v7618_v21  ;;  %v6785_v7 = vpop.f32.mrf.mxu0  ;;  %7279 = vmatprep.subr.mxu0 %v2626_v25  ;;  %v9640_v12 = vadd.f32 %v6827_v43, %v4058_v4  ;;  %v2602_v38 = vld [vmem:[%s7680_s30 + $0x1a18] sm:$0xff]  ;;  %v2617_v25 = vld [vmem:[%s7680_s30 + $0x1a90] sm:$0xff]  ;;  %v2648_v43 = vld [vmem:[%s7680_s30 + $0x1b88] sm:$0xff] }
 0x2ab   : > { %7323 = vmatprep.subr.mxu1 %v2658_v27  ;;  %v6786_v14 = vadd.f32 %v6785_v7, %v6784_v28  ;;  %6072 = vmatprep.mubr.msk.f32.mxu1 %vm1174_vm11, %v7618_v21  ;;  %v6828_v32 = vpop.f32.mrf.mxu1  ;;  %v2634_v4 = vld [vmem:[%s7680_s30 + $0x1b18] sm:$0xff]  ;;  %v2649_v27 = vld [vmem:[%s7680_s30 + $0x1b90] sm:$0xff]  ;;  %v2632_v7 = vld [vmem:[%s7680_s30 + $0x1b08] sm:$0xff] }
 0x2ac   : > { %7280 = vmatpush3.msra.mxu0 %v2610_v1  ;;  %7324 = vmatpush3.msra.mxu1 %v2642_v44  ;;  %v2633_v28 = vld [vmem:[%s7680_s30 + $0x1b10] sm:$0xff]  ;;  %v528_v44 = vld [vmem:[#allocation2 + $0x420] sm:$0xff] }
 0x2ad   : > { %7281 = vmatprep.subr.mxu0 %v2625_v17  ;;  %v4063_v29 = vadd.f32 %v6786_v14, %v9522_v50  ;;  %6073 = vmatmul.mubr.msk.f32.gmra.mxu1 %vm1173_vm12, %v7618_v21  ;;  %v6829_v45 = vpop.f32.mrf.mxu1  ;;  %v2640_v50 = vld [vmem:[%s7680_s30 + $0x1b48] sm:$0xff]  ;;  %v9699_v17 = vrot.slane %v9547_v46, %v8133_v34  ;;  %v9705_v14 = vrot.slane %v9547_v46, %v8138_v37  ;;  %v2599_v59 = vld [vmem:[%s7680_s30 + $0x1a00] sm:$0xff] }
 0x2ae   : > { %7325 = vmatprep.subr.mxu1 %v2657_v5  ;;  %6066 = vmatprep.mubr.msk.f32.mxu0 %vm1236_vm13, %v7618_v21  ;;  %v6830_v47 = vadd.f32 %v6829_v45, %v6828_v32  ;;  %v527_v5 = vld [vmem:[#allocation2 + $0x348] sm:$0xff]  ;;  %v2615_v32 = vld [vmem:[%s7680_s30 + $0x1a80] sm:$0xff]  ;;  %vm1048_vm1 = vcmp.eq.s32.totalorder %v528_v44, %v9693_v42  ;;  %v658_v44 = vld [vmem:[#allocation2 + $0x3f0] sm:$0xff] }
 0x2af   : > { %7282 = vmatpush3.msra.mxu0 %v2609_v30  ;;  %7326 = vmatpush3.msra.mxu1 %v2641_v51  ;;  %v2647_v51 = vld [vmem:[%s7680_s30 + $0x1b80] sm:$0xff]  ;;  %vm1047_vm2 = vcmp.eq.s32.totalorder %v527_v5, %v9699_v17  ;;  %vm1178_vm11 = vcmp.eq.s32.totalorder %v658_v44, %v9705_v14  ;;  %v2714_v44 = vld [vmem:[%s7680_s30 + $0x1d98] sm:$0xff] }
 0x2b0   : > { %6067 = vmatmul.mubr.msk.f32.gmra.mxu0 %vm1235_vm14, %v7618_v21  ;;  %7283 = vmatprep.subr.mxu0 %v2624_v61  ;;  %v9661_v57 = vadd.f32 %v6830_v47, %v4063_v29  ;;  %v530_v29 = vld [vmem:[#allocation2 + $0x620] sm:$0xff]  ;;  %v9711_v61 = vrot.slane %v9547_v46, %v8143_v6 }
 0x2b1   : > { %7327 = vmatprep.subr.mxu1 %v2656_v35  ;;  %6074 = vmatprep.mubr.msk.f32.mxu1 %vm1238_vm15, %v7618_v21  ;;  %v529_v45 = vld [vmem:[#allocation2 + $0xe0] sm:$0xff]  ;;  %vm1050_vm3 = vcmp.eq.s32.totalorder %v530_v29, %v9705_v14 }
 0x2b2   : > { %7284 = vmatpush3.msra.mxu0 %v2608_v18  ;;  %7328 = vmatpush3.msra.mxu1 %v2640_v50  ;;  %v2631_v47 = vld [vmem:[%s7680_s30 + $0x1b00] sm:$0xff]  ;;  %vm1049_vm4 = vcmp.eq.s32.totalorder %v529_v45, %v9711_v61  ;;  %v2706_v45 = vld [vmem:[%s7680_s30 + $0x1d58] sm:$0xff] }
 0x2b3   : > { %7285 = vmatprep.subr.mxu0 %v2623_v23  ;;  %6075 = vmatmul.mubr.msk.f32.gmra.mxu1 %vm1237_vm0, %v7618_v21  ;;  %v2694_v23 = vld [vmem:[%s7680_s30 + $0x1cf8] sm:$0xff] }
 0x2b4   : > { %7329 = vmatprep.subr.mxu1 %v2655_v10  ;;  %7286 = vmatpush3.msra.mxu0 %v2607_v3  ;;  %v2726_v3 = vld [vmem:[%s7680_s30 + $0x1df8] sm:$0xff] }
 0x2b5   : > { %7330 = vmatpush3.msra.mxu1 %v2639_v52  ;;  %7287 = vmatprep.subr.mxu0 %v2622_v9  ;;  %v592_v52 = vld [vmem:[#allocation2 + $0x6b8] sm:$0xff] }
 0x2b6   : > { %7331 = vmatprep.subr.mxu1 %v2654_v40  ;;  %7288 = vmatpush3.msra.mxu0 %v2606_v36  ;;  %v2710_v40 = vld [vmem:[%s7680_s30 + $0x1d78] sm:$0xff]  ;;  %vm1112_vm5 = vcmp.eq.s32.totalorder %v592_v52, %v9693_v42  ;;  %v722_v52 = vld [vmem:[#allocation2 + $0x190] sm:$0xff] }
 0x2b7   : > { %7332 = vmatpush3.msra.mxu1 %v2638_v54  ;;  %7289 = vmatprep.subr.mxu0 %v2621_v16  ;;  %v591_v36 = vld [vmem:[#allocation2 + $0xd8] sm:$0xff]  ;;  %v2693_v16 = vld [vmem:[%s7680_s30 + $0x1cf0] sm:$0xff]  ;;  %vm1242_vm15 = vcmp.eq.s32.totalorder %v722_v52, %v9705_v14  ;;  %v2679_v52 = vld [vmem:[%s7680_s30 + $0x1c80] sm:$0xff] }
 0x2b8   : > { %7333 = vmatprep.subr.mxu1 %v2653_v19  ;;  %7290 = vmatpush3.msra.mxu0 %v2605_v20  ;;  %v2725_v19 = vld [vmem:[%s7680_s30 + $0x1df0] sm:$0xff]  ;;  %vm1111_vm6 = vcmp.eq.s32.totalorder %v591_v36, %v9699_v17 }
 0x2b9   : > { %7334 = vmatpush3.msra.mxu1 %v2637_v13  ;;  %7291 = vmatprep.subr.mxu0 %v2620_v41  ;;  %v2677_v13 = vld [vmem:[%s7680_s30 + $0x1c70] sm:$0xff] }
 0x2ba   : > { %7335 = vmatprep.subr.mxu1 %v2652_v26  ;;  %7292 = vmatpush3.msra.mxu0 %v2604_v8  ;;  %v594_v41 = vld [vmem:[#allocation2 + $0x5b0] sm:$0xff] }
 0x2bb   : > { %7336 = vmatpush3.msra.mxu1 %v2636_v62  ;;  %7293 = vmatprep.subr.mxu0 %v2619_v31  ;;  %v2709_v8 = vld [vmem:[%s7680_s30 + $0x1d70] sm:$0xff]  ;;  %v2692_v31 = vld [vmem:[%s7680_s30 + $0x1ce8] sm:$0xff]  ;;  %vm1114_vm7 = vcmp.eq.s32.totalorder %v594_v41, %v9705_v14  ;;  %v2719_v41 = vld [vmem:[%s7680_s30 + $0x1dc0] sm:$0xff] }
 0x2bc   : > { %7337 = vmatprep.subr.mxu1 %v2651_v58  ;;  %7294 = vmatpush3.msra.mxu0 %v2603_v55  ;;  %v2724_v58 = vld [vmem:[%s7680_s30 + $0x1de8] sm:$0xff]  ;;  %v593_v55 = vld [vmem:[#allocation2 + $0x140] sm:$0xff] }
 0x2bd   : > { %7338 = vmatpush3.msra.mxu1 %v2635_v49  ;;  %7295 = vmatprep.subr.mxu0 %v2618_v2  ;;  %vm1113_vm8 = vcmp.eq.s32.totalorder %v593_v55, %v9711_v61  ;;  %v2671_v14 = vld [vmem:[%s7680_s30 + $0x1c40] sm:$0xff]  ;;  %v2685_v55 = vld [vmem:[%s7680_s30 + $0x1cb0] sm:$0xff] }
 0x2be   : > { %7339 = vmatprep.subr.mxu1 %v2650_v24  ;;  %v6863_v1 = vpop.f32.mrf.mxu0  ;;  %7296 = vmatpush3.msra.mxu0 %v2602_v38  ;;  %v2676_v24 = vld [vmem:[%s7680_s30 + $0x1c68] sm:$0xff]  ;;  %v656_v38 = vld [vmem:[#allocation2 + $0x80] sm:$0xff] }
 0x2bf   : > { %7340 = vmatpush3.msra.mxu1 %v2634_v4  ;;  %7297 = vmatprep.subr.mxu0 %v2617_v25  ;;  %v2708_v4 = vld [vmem:[%s7680_s30 + $0x1d68] sm:$0xff]  ;;  %v2691_v25 = vld [vmem:[%s7680_s30 + $0x1ce0] sm:$0xff]  ;;  %vm1176_vm9 = vcmp.eq.s32.totalorder %v656_v38, %v9693_v42 }
 0x2c0   : > { %7341 = vmatprep.subr.mxu1 %v2649_v27  ;;  %v6907_v30 = vpop.f32.mrf.mxu1  ;;  %v6864_v15 = vpop.f32.mrf.mxu0  ;;  %7298 = vmatpush3.msra.mxu0 %v2601_v11  ;;  %v655_v27 = vld [vmem:[#allocation2 + $0x7a0] sm:$0xff]  ;;  %v2684_v38 = vld [vmem:[%s7680_s30 + $0x1ca8] sm:$0xff] }
 0x2c1   : > { %7342 = vmatpush3.msra.mxu1 %v2633_v28  ;;  %v6865_v35 = vadd.f32 %v6864_v15, %v6863_v1  ;;  %7299 = vmatprep.subr.mxu0 %v2616_v22  ;;  %v2723_v28 = vld [vmem:[%s7680_s30 + $0x1de0] sm:$0xff]  ;;  %vm1175_vm10 = vcmp.eq.s32.totalorder %v655_v27, %v9699_v17  ;;  %v2722_v15 = vld [vmem:[%s7680_s30 + $0x1dd8] sm:$0xff] }
 0x2c2   : > { %7343 = vmatprep.subr.mxu1 %v2648_v43  ;;  %v6908_v18 = vpop.f32.mrf.mxu1  ;;  %7300 = vmatpush3.msra.mxu0 %v2600_v39  ;;  %v2675_v43 = vld [vmem:[%s7680_s30 + $0x1c60] sm:$0xff] }
 0x2c3   : > { %7344 = vmatpush3.msra.mxu1 %v2632_v7  ;;  %v4218_v50 = vadd.f32 %v6865_v35, %v9587_v53  ;;  %v6909_v46 = vadd.f32 %v6908_v18, %v6907_v30  ;;  %7301 = vmatprep.subr.mxu0 %v2615_v32  ;;  %v2678_v53 = vld [vmem:[%s7680_s30 + $0x1c78] sm:$0xff]  ;;  %v2707_v7 = vld [vmem:[%s7680_s30 + $0x1d60] sm:$0xff]  ;;  %v657_v32 = vld [vmem:[#allocation2 + $0x4c8] sm:$0xff] }
 0x2c4   : > { %7345 = vmatprep.subr.mxu1 %v2647_v51  ;;  %v6866_v10 = vpop.f32.mrf.mxu0  ;;  %7302 = vmatpush3.msra.mxu0 %v2599_v59  ;;  %v2690_v30 = vld [vmem:[%s7680_s30 + $0x1cd8] sm:$0xff]  ;;  %v2689_v18 = vld [vmem:[%s7680_s30 + $0x1cd0] sm:$0xff]  ;;  %vm1177_vm12 = vcmp.eq.s32.totalorder %v657_v32, %v9711_v61  ;;  %v2683_v27 = vld [vmem:[%s7680_s30 + $0x1ca0] sm:$0xff] }
 0x2c5   : > { %6076 = vmatprep.mubr.msk.f32.mxu0 %vm1048_vm1, %v7618_v21  ;;  %v9723_v9 = vadd.f32 %v6909_v46, %v4218_v50  ;;  %7346 = vmatpush3.msra.mxu1 %v2631_v47  ;;  %v2674_v35 = vld [vmem:[%s7680_s30 + $0x1c58] sm:$0xff]  ;;  %v2721_v46 = vld [vmem:[%s7680_s30 + $0x1dd0] sm:$0xff] }
 0x2c6   : > { %6077 = vmatmul.mubr.msk.f32.vlgmr.msra.gmra.mxu0 %vm1047_vm2, %v7618_v21  ;;  %v6867_v54 = vpop.f32.mrf.mxu0  ;;  %6084 = vmatprep.mubr.msk.f32.mxu1 %vm1050_vm3, %v7618_v21  ;;  %v719_v47 = vld [vmem:[#allocation2 + $0x3d8] sm:$0xff]  ;;  %v2665_v32 = vld [vmem:[%s7680_s30 + $0x1c10] sm:$0xff] }
 0x2c7   : > { %7359 = vmatprep.subr.mxu0 %v2694_v23  ;;  %v6868_v20 = vadd.f32 %v6867_v54, %v6866_v10  ;;  %7403 = vmatprep.subr.mxu1 %v2726_v3  ;;  %v6910_v26 = vpop.f32.mrf.mxu1  ;;  %v2673_v3 = vld [vmem:[%s7680_s30 + $0x1c50] sm:$0xff]  ;;  %vm1239_vm14 = vcmp.eq.s32.totalorder %v719_v47, %v9699_v17  ;;  %v2688_v54 = vld [vmem:[%s7680_s30 + $0x1cc8] sm:$0xff] }
 0x2c8   : > { %6085 = vmatmul.mubr.msk.f32.vlgmr.msra.gmra.mxu1 %vm1049_vm4, %v7618_v21  ;;  %7360 = vmatpush3.msra.mxu0 %v2678_v53  ;;  %v2664_v47 = vld [vmem:[%s7680_s30 + $0x1c08] sm:$0xff] }
 0x2c9   : > { %7404 = vmatpush3.msra.mxu1 %v2710_v40  ;;  %v4223_v62 = vadd.f32 %v6868_v20, %v9615_v48  ;;  %7361 = vmatprep.subr.mxu0 %v2693_v16  ;;  %v6911_v2 = vpop.f32.mrf.mxu1  ;;  %v2705_v40 = vld [vmem:[%s7680_s30 + $0x1d50] sm:$0xff]  ;;  %v2720_v16 = vld [vmem:[%s7680_s30 + $0x1dc8] sm:$0xff] }
 0x2ca   : > { %7405 = vmatprep.subr.mxu1 %v2725_v19  ;;  %v6869_v49 = vpop.f32.mrf.mxu0  ;;  %6078 = vmatprep.mubr.msk.f32.mxu0 %vm1112_vm5, %v7618_v21  ;;  %v6912_v48 = vadd.f32 %v6911_v2, %v6910_v26  ;;  %v2672_v20 = vld [vmem:[%s7680_s30 + $0x1c48] sm:$0xff]  ;;  %v2669_v2 = vld [vmem:[%s7680_s30 + $0x1c30] sm:$0xff] }
 0x2cb   : > { %7362 = vmatpush3.msra.mxu0 %v2677_v13  ;;  %7406 = vmatpush3.msra.mxu1 %v2709_v8  ;;  %v2687_v13 = vld [vmem:[%s7680_s30 + $0x1cc0] sm:$0xff] }
 0x2cc   : > { %6079 = vmatmul.mubr.msk.f32.gmra.mxu0 %vm1111_vm6, %v7618_v21  ;;  %v6870_v11 = vpop.f32.mrf.mxu0  ;;  %7363 = vmatprep.subr.mxu0 %v2692_v31  ;;  %v9751_v1 = vadd.f32 %v6912_v48, %v4223_v62  ;;  %v2703_v8 = vld [vmem:[%s7680_s30 + $0x1d40] sm:$0xff]  ;;  %v2686_v62 = vld [vmem:[%s7680_s30 + $0x1cb8] sm:$0xff]  ;;  %v2716_v48 = vld [vmem:[%s7680_s30 + $0x1da8] sm:$0xff] }
 0x2cd   : > { %7407 = vmatprep.subr.mxu1 %v2724_v58  ;;  %v6871_v22 = vadd.f32 %v6870_v11, %v6869_v49  ;;  %6086 = vmatprep.mubr.msk.f32.mxu1 %vm1114_vm7, %v7618_v21  ;;  %v6913_v39 = vpop.f32.mrf.mxu1  ;;  %v2718_v31 = vld [vmem:[%s7680_s30 + $0x1db8] sm:$0xff]  ;;  %v2717_v49 = vld [vmem:[%s7680_s30 + $0x1db0] sm:$0xff]  ;;  %v2715_v11 = vld [vmem:[%s7680_s30 + $0x1da0] sm:$0xff] }
 0x2ce   : > { %7364 = vmatpush3.msra.mxu0 %v2676_v24  ;;  %7408 = vmatpush3.msra.mxu1 %v2708_v4  ;;  %v2702_v58 = vld [vmem:[%s7680_s30 + $0x1d38] sm:$0xff]  ;;  %v2701_v24 = vld [vmem:[%s7680_s30 + $0x1d30] sm:$0xff]  ;;  %v2668_v4 = vld [vmem:[%s7680_s30 + $0x1c28] sm:$0xff] }
 0x2cf   : > { %7365 = vmatprep.subr.mxu0 %v2691_v25  ;;  %v4228_v5 = vadd.f32 %v6871_v22, %v9640_v12  ;;  %6087 = vmatmul.mubr.msk.f32.gmra.mxu1 %vm1113_vm8, %v7618_v21  ;;  %v6914_v29 = vpop.f32.mrf.mxu1  ;;  %v720_v12 = vld [vmem:[#allocation2 + $0x718] sm:$0xff]  ;;  %v2700_v25 = vld [vmem:[%s7680_s30 + $0x1d28] sm:$0xff]  ;;  %v2699_v22 = vld [vmem:[%s7680_s30 + $0x1d20] sm:$0xff] }
 0x2d0   : > { %7409 = vmatprep.subr.mxu1 %v2723_v28  ;;  %v6872_v51 = vpop.f32.mrf.mxu0  ;;  %6080 = vmatprep.mubr.msk.f32.mxu0 %vm1176_vm9, %v7618_v21  ;;  %v6915_v59 = vadd.f32 %v6914_v29, %v6913_v39  ;;  %vm1240_vm13 = vcmp.eq.s32.totalorder %v720_v12, %v9693_v42  ;;  %v721_v42 = vld [vmem:[#allocation2 + $0x7d0] sm:$0xff]  ;;  %v2667_v28 = vld [vmem:[%s7680_s30 + $0x1c20] sm:$0xff]  ;;  %v9822_v39 = vld [vmem:[%s7670_s22 + $0x38] sm:$0xff] }
 0x2d1   : > { %7366 = vmatpush3.msra.mxu0 %v2675_v43  ;;  %7410 = vmatpush3.msra.mxu1 %v2707_v7  ;;  %vm1241_vm0 = vcmp.eq.s32.totalorder %v721_v42, %v9711_v61  ;;  %v2670_v61 = vld [vmem:[%s7680_s30 + $0x1c38] sm:$0xff]  ;;  %v9832_v29 = vrot.slane %v9822_v39, %v8005_v56  ;;  %v2680_v12 = vld [vmem:[%s7680_s30 + $0x1c88] sm:$0xff]  ;;  %v9844_v56 = vrot.slane %v9822_v39, %v8013_v60  ;;  %v2695_v42 = vld [vmem:[%s7680_s30 + $0x1d00] sm:$0xff] }
 0x2d2   : > { %6081 = vmatmul.mubr.msk.f32.gmra.mxu0 %vm1175_vm10, %v7618_v21  ;;  %v6873_v50 = vpop.f32.mrf.mxu0  ;;  %7367 = vmatprep.subr.mxu0 %v2690_v30  ;;  %v9776_v23 = vadd.f32 %v6915_v59, %v4228_v5  ;;  %v2682_v43 = vld [vmem:[%s7680_s30 + $0x1c98] sm:$0xff]  ;;  %v2681_v30 = vld [vmem:[%s7680_s30 + $0x1c90] sm:$0xff]  ;;  %v2712_v59 = vld [vmem:[%s7680_s30 + $0x1d88] sm:$0xff] }
 0x2d3   : > { %7411 = vmatprep.subr.mxu1 %v2722_v15  ;;  %v6874_v10 = vadd.f32 %v6873_v50, %v6872_v51  ;;  %6088 = vmatprep.mubr.msk.f32.mxu1 %vm1178_vm11, %v7618_v21  ;;  %v6916_v53 = vpop.f32.mrf.mxu1  ;;  %v2666_v7 = vld [vmem:[%s7680_s30 + $0x1c18] sm:$0xff]  ;;  %v2713_v15 = vld [vmem:[%s7680_s30 + $0x1d90] sm:$0xff]  ;;  %v2696_v50 = vld [vmem:[%s7680_s30 + $0x1d08] sm:$0xff] }
 0x2d4   : > { %7368 = vmatpush3.msra.mxu0 %v2674_v35  ;;  %7412 = vmatpush3.msra.mxu1 %v2706_v45  ;;  %v2698_v5 = vld [vmem:[%s7680_s30 + $0x1d18] sm:$0xff]  ;;  %v2697_v51 = vld [vmem:[%s7680_s30 + $0x1d10] sm:$0xff]  ;;  %v532_v45 = vld [vmem:[#allocation2 + $0x3a0] sm:$0xff] }
 0x2d5   : > { %7369 = vmatprep.subr.mxu0 %v2689_v18  ;;  %v4233_v36 = vadd.f32 %v6874_v10, %v9661_v57  ;;  %6089 = vmatmul.mubr.msk.f32.gmra.mxu1 %vm1177_vm12, %v7618_v21  ;;  %v6917_v19 = vpop.f32.mrf.mxu1  ;;  %v2704_v57 = vld [vmem:[%s7680_s30 + $0x1d48] sm:$0xff]  ;;  %v9838_v18 = vrot.slane %v9822_v39, %v8018_v63  ;;  %v9850_v63 = vrot.slane %v9822_v39, %v8021_v0 }
 0x2d6   : > { %7413 = vmatprep.subr.mxu1 %v2721_v46  ;;  %6082 = vmatprep.mubr.msk.f32.mxu0 %vm1240_vm13, %v7618_v21  ;;  %v6918_v17 = vadd.f32 %v6917_v19, %v6916_v53  ;;  %v531_v46 = vld [vmem:[#allocation2 + $0x148] sm:$0xff]  ;;  %v2711_v53 = vld [vmem:[%s7680_s30 + $0x1d80] sm:$0xff]  ;;  %vm1052_vm1 = vcmp.eq.s32.totalorder %v532_v45, %v9832_v29 }
 0x2d7   : > { %7370 = vmatpush3.msra.mxu0 %v2673_v3  ;;  %7414 = vmatpush3.msra.mxu1 %v2705_v40  ;;  %v534_v40 = vld [vmem:[#allocation2 + $0x310] sm:$0xff]  ;;  %v533_v60 = vld [vmem:[#allocation2 + $0x4e8] sm:$0xff]  ;;  %vm1051_vm2 = vcmp.eq.s32.totalorder %v531_v46, %v9838_v18  ;;  %v661_v46 = vld [vmem:[#allocation2 + $0x160] sm:$0xff] }
 0x2d8   : > { %6083 = vmatmul.mubr.msk.f32.gmra.mxu0 %vm1239_vm14, %v7618_v21  ;;  %7371 = vmatprep.subr.mxu0 %v2688_v54  ;;  %v9797_v26 = vadd.f32 %v6918_v17, %v4233_v36  ;;  %v2663_v54 = vld [vmem:[%s7680_s30 + $0x1c00] sm:$0xff]  ;;  %vm1054_vm3 = vcmp.eq.s32.totalorder %v534_v40, %v9844_v56  ;;  %vm1053_vm4 = vcmp.eq.s32.totalorder %v533_v60, %v9850_v63  ;;  %v2770_v40 = vld [vmem:[%s7680_s30 + $0x1f58] sm:$0xff] }
 0x2d9   : > { %7415 = vmatprep.subr.mxu1 %v2720_v16  ;;  %6090 = vmatprep.mubr.msk.f32.mxu1 %vm1242_vm15, %v7618_v21  ;;  %vm1181_vm12 = vcmp.eq.s32.totalorder %v661_v46, %v9850_v63  ;;  %v2776_v46 = vld [vmem:[%s7680_s30 + $0x1f88] sm:$0xff] }
 0x2da   : > { %7372 = vmatpush3.msra.mxu0 %v2672_v20  ;;  %7416 = vmatpush3.msra.mxu1 %v2704_v57  ;;  %v2758_v20 = vld [vmem:[%s7680_s30 + $0x1ef8] sm:$0xff] }
 0x2db   : > { %7373 = vmatprep.subr.mxu0 %v2687_v13  ;;  %6091 = vmatmul.mubr.msk.f32.gmra.mxu1 %vm1241_vm0, %v7618_v21  ;;  %v2790_v57 = vld [vmem:[%s7680_s30 + $0x1ff8] sm:$0xff]  ;;  %v596_v13 = vld [vmem:[#allocation2 + $0x128] sm:$0xff] }
 0x2dc   : > { %7417 = vmatprep.subr.mxu1 %v2719_v41  ;;  %7374 = vmatpush3.msra.mxu0 %v2671_v14  ;;  %v2774_v14 = vld [vmem:[%s7680_s30 + $0x1f78] sm:$0xff]  ;;  %vm1116_vm5 = vcmp.eq.s32.totalorder %v596_v13, %v9832_v29 }
 0x2dd   : > { %7418 = vmatpush3.msra.mxu1 %v2703_v8  ;;  %7375 = vmatprep.subr.mxu0 %v2686_v62  ;;  %v595_v8 = vld [vmem:[#allocation2 + $0x30] sm:$0xff] }
 0x2de   : > { %7419 = vmatprep.subr.mxu1 %v2718_v31  ;;  %7376 = vmatpush3.msra.mxu0 %v2670_v61  ;;  %v2757_v31 = vld [vmem:[%s7680_s30 + $0x1ef0] sm:$0xff]  ;;  %vm1115_vm6 = vcmp.eq.s32.totalorder %v595_v8, %v9838_v18 }
 0x2df   : > { %7420 = vmatpush3.msra.mxu1 %v2702_v58  ;;  %7377 = vmatprep.subr.mxu0 %v2685_v55  ;;  %v2789_v61 = vld [vmem:[%s7680_s30 + $0x1ff0] sm:$0xff] }
 0x2e0   : > { %7421 = vmatprep.subr.mxu1 %v2717_v49  ;;  %7378 = vmatpush3.msra.mxu0 %v2669_v2  ;;  %v2741_v55 = vld [vmem:[%s7680_s30 + $0x1e70] sm:$0xff] }
 0x2e1   : > { %7422 = vmatpush3.msra.mxu1 %v2701_v24  ;;  %7379 = vmatprep.subr.mxu0 %v2684_v38  ;;  %v598_v49 = vld [vmem:[#allocation2 + $0x5f0] sm:$0xff] }
 0x2e2   : > { %7423 = vmatprep.subr.mxu1 %v2716_v48  ;;  %7380 = vmatpush3.msra.mxu0 %v2668_v4  ;;  %v2773_v24 = vld [vmem:[%s7680_s30 + $0x1f70] sm:$0xff]  ;;  %v2756_v48 = vld [vmem:[%s7680_s30 + $0x1ee8] sm:$0xff]  ;;  %vm1118_vm7 = vcmp.eq.s32.totalorder %v598_v49, %v9844_v56  ;;  %v2750_v49 = vld [vmem:[%s7680_s30 + $0x1eb8] sm:$0xff] }
 0x2e3   : > { %7424 = vmatpush3.msra.mxu1 %v2700_v25  ;;  %7381 = vmatprep.subr.mxu0 %v2683_v27  ;;  %v2788_v4 = vld [vmem:[%s7680_s30 + $0x1fe8] sm:$0xff]  ;;  %v597_v25 = vld [vmem:[#allocation2 + $0x1a0] sm:$0xff] }
 0x2e4   : > { %7425 = vmatprep.subr.mxu1 %v2715_v11  ;;  %7382 = vmatpush3.msra.mxu0 %v2667_v28  ;;  %v2740_v28 = vld [vmem:[%s7680_s30 + $0x1e68] sm:$0xff]  ;;  %vm1117_vm8 = vcmp.eq.s32.totalorder %v597_v25, %v9850_v63  ;;  %v2765_v25 = vld [vmem:[%s7680_s30 + $0x1f30] sm:$0xff] }
 0x2e5   : > { %7426 = vmatpush3.msra.mxu1 %v2699_v22  ;;  %7383 = vmatprep.subr.mxu0 %v2682_v43  ;;  %v660_v22 = vld [vmem:[#allocation2 + $0x378] sm:$0xff]  ;;  %v2772_v43 = vld [vmem:[%s7680_s30 + $0x1f68] sm:$0xff] }
 0x2e6   : > { %7427 = vmatprep.subr.mxu1 %v2714_v44  ;;  %v6951_v35 = vpop.f32.mrf.mxu0  ;;  %7384 = vmatpush3.msra.mxu0 %v2666_v7  ;;  %v2755_v44 = vld [vmem:[%s7680_s30 + $0x1ee0] sm:$0xff]  ;;  %v659_v7 = vld [vmem:[#allocation2 + $0x798] sm:$0xff]  ;;  %vm1180_vm9 = vcmp.eq.s32.totalorder %v660_v22, %v9832_v29  ;;  %v2764_v22 = vld [vmem:[%s7680_s30 + $0x1f28] sm:$0xff] }
 0x2e7   : > { %7428 = vmatpush3.msra.mxu1 %v2698_v5  ;;  %7385 = vmatprep.subr.mxu0 %v2681_v30  ;;  %v2787_v30 = vld [vmem:[%s7680_s30 + $0x1fe0] sm:$0xff]  ;;  %vm1179_vm10 = vcmp.eq.s32.totalorder %v659_v7, %v9838_v18 }
 0x2e8   : > { %7429 = vmatprep.subr.mxu1 %v2713_v15  ;;  %v6995_v10 = vpop.f32.mrf.mxu1  ;;  %v6952_v3 = vpop.f32.mrf.mxu0  ;;  %7386 = vmatpush3.msra.mxu0 %v2665_v32  ;;  %v2763_v7 = vld [vmem:[%s7680_s30 + $0x1f20] sm:$0xff] }
 0x2e9   : > { %7430 = vmatpush3.msra.mxu1 %v2697_v51  ;;  %v6953_v36 = vadd.f32 %v6952_v3, %v6951_v35  ;;  %7387 = vmatprep.subr.mxu0 %v2680_v12  ;;  %v2739_v51 = vld [vmem:[%s7680_s30 + $0x1e60] sm:$0xff] }
 0x2ea   : > { %7431 = vmatprep.subr.mxu1 %v2712_v59  ;;  %v6996_v16 = vpop.f32.mrf.mxu1  ;;  %7388 = vmatpush3.msra.mxu0 %v2664_v47  ;;  %v662_v35 = vld [vmem:[#allocation2 + $0x260] sm:$0xff]  ;;  %v2754_v47 = vld [vmem:[%s7680_s30 + $0x1ed8] sm:$0xff] }
 0x2eb   : > { %7432 = vmatpush3.msra.mxu1 %v2696_v50  ;;  %v4388_v19 = vadd.f32 %v6953_v36, %v9723_v9  ;;  %v6997_v0 = vadd.f32 %v6996_v16, %v6995_v10  ;;  %7389 = vmatprep.subr.mxu0 %v2679_v52  ;;  %v2742_v9 = vld [vmem:[%s7680_s30 + $0x1e78] sm:$0xff]  ;;  %v2771_v59 = vld [vmem:[%s7680_s30 + $0x1f60] sm:$0xff]  ;;  %vm1182_vm11 = vcmp.eq.s32.totalorder %v662_v35, %v9844_v56  ;;  %v2753_v36 = vld [vmem:[%s7680_s30 + $0x1ed0] sm:$0xff] }
 0x2ec   : > { %7433 = vmatprep.subr.mxu1 %v2711_v53  ;;  %v6954_v17 = vpop.f32.mrf.mxu0  ;;  %7390 = vmatpush3.msra.mxu0 %v2663_v54  ;;  %v2786_v50 = vld [vmem:[%s7680_s30 + $0x1fd8] sm:$0xff]  ;;  %v723_v54 = vld [vmem:[#allocation2 + $0x710] sm:$0xff] }
 0x2ed   : > { %6092 = vmatprep.mubr.msk.f32.mxu0 %vm1052_vm1, %v7618_v21  ;;  %v9862_v41 = vadd.f32 %v6997_v0, %v4388_v19  ;;  %7434 = vmatpush3.msra.mxu1 %v2695_v42  ;;  %v2738_v52 = vld [vmem:[%s7680_s30 + $0x1e58] sm:$0xff]  ;;  %v2785_v16 = vld [vmem:[%s7680_s30 + $0x1fd0] sm:$0xff]  ;;  %vm1243_vm14 = vcmp.eq.s32.totalorder %v723_v54, %v9838_v18  ;;  %v2775_v54 = vld [vmem:[%s7680_s30 + $0x1f80] sm:$0xff] }
 0x2ee   : > { %6093 = vmatmul.mubr.msk.f32.vlgmr.msra.gmra.mxu0 %vm1051_vm2, %v7618_v21  ;;  %v6955_v62 = vpop.f32.mrf.mxu0  ;;  %6100 = vmatprep.mubr.msk.f32.mxu1 %vm1054_vm3, %v7618_v21  ;;  %v2737_v0 = vld [vmem:[%s7680_s30 + $0x1e50] sm:$0xff] }
 0x2ef   : > { %7447 = vmatprep.subr.mxu0 %v2758_v20  ;;  %v6956_v58 = vadd.f32 %v6955_v62, %v6954_v17  ;;  %7491 = vmatprep.subr.mxu1 %v2790_v57  ;;  %v6998_v2 = vpop.f32.mrf.mxu1  ;;  %v726_v20 = vld [vmem:[#allocation2 + $0x238] sm:$0xff]  ;;  %v2769_v57 = vld [vmem:[%s7680_s30 + $0x1f50] sm:$0xff]  ;;  %v2736_v62 = vld [vmem:[%s7680_s30 + $0x1e48] sm:$0xff] }
 0x2f0   : > { %6101 = vmatmul.mubr.msk.f32.vlgmr.msra.gmra.mxu1 %vm1053_vm4, %v7618_v21  ;;  %7448 = vmatpush3.msra.mxu0 %v2742_v9  ;;  %v2752_v9 = vld [vmem:[%s7680_s30 + $0x1ec8] sm:$0xff]  ;;  %vm1246_vm15 = vcmp.eq.s32.totalorder %v726_v20, %v9844_v56  ;;  %v2735_v56 = vld [vmem:[%s7680_s30 + $0x1e40] sm:$0xff]  ;;  %v2745_v35 = vld [vmem:[%s7680_s30 + $0x1e90] sm:$0xff] }
 0x2f1   : > { %7492 = vmatpush3.msra.mxu1 %v2774_v14  ;;  %v4393_v38 = vadd.f32 %v6956_v58, %v9751_v1  ;;  %7449 = vmatprep.subr.mxu0 %v2757_v31  ;;  %v6999_v11 = vpop.f32.mrf.mxu1  ;;  %v2784_v14 = vld [vmem:[%s7680_s30 + $0x1fc8] sm:$0xff]  ;;  %v2751_v31 = vld [vmem:[%s7680_s30 + $0x1ec0] sm:$0xff] }
 0x2f2   : > { %7493 = vmatprep.subr.mxu1 %v2789_v61  ;;  %v6957_v27 = vpop.f32.mrf.mxu0  ;;  %6094 = vmatprep.mubr.msk.f32.mxu0 %vm1116_vm5, %v7618_v21  ;;  %v7000_v1 = vadd.f32 %v6999_v11, %v6998_v2  ;;  %v2783_v61 = vld [vmem:[%s7680_s30 + $0x1fc0] sm:$0xff]  ;;  %v2782_v2 = vld [vmem:[%s7680_s30 + $0x1fb8] sm:$0xff]  ;;  %v2780_v11 = vld [vmem:[%s7680_s30 + $0x1fa8] sm:$0xff] }
 0x2f3   : > { %7450 = vmatpush3.msra.mxu0 %v2741_v55  ;;  %7494 = vmatpush3.msra.mxu1 %v2773_v24  ;;  %v2767_v55 = vld [vmem:[%s7680_s30 + $0x1f40] sm:$0xff]  ;;  %v2766_v24 = vld [vmem:[%s7680_s30 + $0x1f38] sm:$0xff] }
 0x2f4   : > { %6095 = vmatmul.mubr.msk.f32.gmra.mxu0 %vm1115_vm6, %v7618_v21  ;;  %v6958_v5 = vpop.f32.mrf.mxu0  ;;  %7451 = vmatprep.subr.mxu0 %v2756_v48  ;;  %v9890_v15 = vadd.f32 %v7000_v1, %v4393_v38  ;;  %v2749_v38 = vld [vmem:[%s7680_s30 + $0x1eb0] sm:$0xff]  ;;  %v2747_v1 = vld [vmem:[%s7680_s30 + $0x1ea0] sm:$0xff] }
 0x2f5   : > { %7495 = vmatprep.subr.mxu1 %v2788_v4  ;;  %v6959_v32 = vadd.f32 %v6958_v5, %v6957_v27  ;;  %6102 = vmatprep.mubr.msk.f32.mxu1 %vm1118_vm7, %v7618_v21  ;;  %v7001_v12 = vpop.f32.mrf.mxu1  ;;  %v2781_v48 = vld [vmem:[%s7680_s30 + $0x1fb0] sm:$0xff]  ;;  %v2748_v27 = vld [vmem:[%s7680_s30 + $0x1ea8] sm:$0xff]  ;;  %v2746_v5 = vld [vmem:[%s7680_s30 + $0x1e98] sm:$0xff] }
 0x2f6   : > { %7452 = vmatpush3.msra.mxu0 %v2740_v28  ;;  %7496 = vmatpush3.msra.mxu1 %v2772_v43  ;;  %v2733_v4 = vld [vmem:[%s7680_s30 + $0x1e30] sm:$0xff]  ;;  %v2732_v28 = vld [vmem:[%s7680_s30 + $0x1e28] sm:$0xff]  ;;  %v2779_v43 = vld [vmem:[%s7680_s30 + $0x1fa0] sm:$0xff] }
 0x2f7   : > { %7453 = vmatprep.subr.mxu0 %v2755_v44  ;;  %v4398_v45 = vadd.f32 %v6959_v32, %v9776_v23  ;;  %6103 = vmatmul.mubr.msk.f32.gmra.mxu1 %vm1117_vm8, %v7618_v21  ;;  %v7002_v3 = vpop.f32.mrf.mxu1  ;;  %v724_v23 = vld [vmem:[#allocation2 + $0xa8] sm:$0xff]  ;;  %v2731_v44 = vld [vmem:[%s7680_s30 + $0x1e20] sm:$0xff]  ;;  %v2730_v32 = vld [vmem:[%s7680_s30 + $0x1e18] sm:$0xff] }
 0x2f8   : > { %7497 = vmatprep.subr.mxu1 %v2787_v30  ;;  %v6960_v10 = vpop.f32.mrf.mxu0  ;;  %6096 = vmatprep.mubr.msk.f32.mxu0 %vm1180_vm9, %v7618_v21  ;;  %v7003_v53 = vadd.f32 %v7002_v3, %v7001_v12  ;;  %vm1244_vm13 = vcmp.eq.s32.totalorder %v724_v23, %v9832_v29  ;;  %v725_v29 = vld [vmem:[#allocation2 + $0x2b8] sm:$0xff]  ;;  %v2777_v12 = vld [vmem:[%s7680_s30 + $0x1f90] sm:$0xff]  ;;  %v536_v3 = vld [vmem:[#allocation2 + $0x440] sm:$0xff] }
 0x2f9   : > { %7454 = vmatpush3.msra.mxu0 %v2739_v51  ;;  %7498 = vmatpush3.msra.mxu1 %v2771_v59  ;;  %vm1245_vm0 = vcmp.eq.s32.totalorder %v725_v29, %v9850_v63  ;;  %v2734_v63 = vld [vmem:[%s7680_s30 + $0x1e38] sm:$0xff]  ;;  %v2729_v59 = vld [vmem:[%s7680_s30 + $0x1e10] sm:$0xff]  ;;  %v2760_v23 = vld [vmem:[%s7680_s30 + $0x1f08] sm:$0xff] }
 0x2fa   : > { %6097 = vmatmul.mubr.msk.f32.gmra.mxu0 %vm1179_vm10, %v7618_v21  ;;  %v6961_v60 = vpop.f32.mrf.mxu0  ;;  %7455 = vmatprep.subr.mxu0 %v2754_v47  ;;  %v9915_v42 = vadd.f32 %v7003_v53, %v4398_v45  ;;  %v2778_v30 = vld [vmem:[%s7680_s30 + $0x1f98] sm:$0xff]  ;;  %v2761_v45 = vld [vmem:[%s7680_s30 + $0x1f10] sm:$0xff]  ;;  %v2744_v47 = vld [vmem:[%s7680_s30 + $0x1e88] sm:$0xff] }
 0x2fb   : > { %7499 = vmatprep.subr.mxu1 %v2786_v50  ;;  %v6962_v19 = vadd.f32 %v6961_v60, %v6960_v10  ;;  %6104 = vmatprep.mubr.msk.f32.mxu1 %vm1182_vm11, %v7618_v21  ;;  %v7004_v17 = vpop.f32.mrf.mxu1  ;;  %v2762_v51 = vld [vmem:[%s7680_s30 + $0x1f18] sm:$0xff]  ;;  %v9969_v50 = vrot.slane %v9822_v39, %v8128_v33  ;;  %v2728_v10 = vld [vmem:[%s7680_s30 + $0x1e08] sm:$0xff]  ;;  %v2743_v53 = vld [vmem:[%s7680_s30 + $0x1e80] sm:$0xff]  ;;  %v982_v33 = vrot.slane %v9822_v39, %v8133_v34 }
 0x2fc   : > { %7456 = vmatpush3.msra.mxu0 %v2738_v52  ;;  %7500 = vmatpush3.msra.mxu1 %v2770_v40  ;;  %v9975_v52 = vrot.slane %v9822_v39, %v8138_v37  ;;  %v538_v40 = vld [vmem:[#allocation2 + $0x390] sm:$0xff]  ;;  %v535_v60 = vld [vmem:[#allocation2 + $0x38] sm:$0xff]  ;;  %v2727_v37 = vld [vmem:[%s7680_s30 + $0x1e00] sm:$0xff] }
 0x2fd   : > { %7457 = vmatprep.subr.mxu0 %v2753_v36  ;;  %v4403_v13 = vadd.f32 %v6962_v19, %v9797_v26  ;;  %6105 = vmatmul.mubr.msk.f32.gmra.mxu1 %vm1181_vm12, %v7618_v21  ;;  %v7005_v8 = vpop.f32.mrf.mxu1  ;;  %v2768_v26 = vld [vmem:[%s7680_s30 + $0x1f48] sm:$0xff]  ;;  %v990_v36 = vrot.slane %v9822_v39, %v8143_v6  ;;  %vm1056_vm1 = vcmp.eq.s32.totalorder %v536_v3, %v9969_v50  ;;  %v600_v19 = vld [vmem:[#allocation2 + $0x240] sm:$0xff]  ;;  %v599_v34 = vld [vmem:[#allocation2 + $0x670] sm:$0xff] }
 0x2fe   : > { %7501 = vmatprep.subr.mxu1 %v2785_v16  ;;  %6098 = vmatprep.mubr.msk.f32.mxu0 %vm1244_vm13, %v7618_v21  ;;  %v7006_v18 = vadd.f32 %v7005_v8, %v7004_v17  ;;  %v537_v16 = vld [vmem:[#allocation2 + $0x50] sm:$0xff]  ;;  %v2759_v20 = vld [vmem:[%s7680_s30 + $0x1f00] sm:$0xff]  ;;  %vm1058_vm2 = vcmp.eq.s32.totalorder %v538_v40, %v9975_v52  ;;  %vm1055_vm3 = vcmp.eq.s32.totalorder %v535_v60, %v982_v33  ;;  %v601_v6 = vld [vmem:[#allocation2 + $0x118] sm:$0xff] }
 0x2ff   : > { %7458 = vmatpush3.msra.mxu0 %v2737_v0  ;;  %7502 = vmatpush3.msra.mxu1 %v2769_v57  ;;  %v602_v0 = vld [vmem:[#allocation2 + $0x268] sm:$0xff]  ;;  %vm1057_vm4 = vcmp.eq.s32.totalorder %v537_v16, %v990_v36  ;;  %vm1120_vm5 = vcmp.eq.s32.totalorder %v600_v19, %v9969_v50  ;;  %vm1119_vm7 = vcmp.eq.s32.totalorder %v599_v34, %v982_v33  ;;  %v727_v29 = vld [vmem:[#allocation2 + $0x1b0] sm:$0xff]  ;;  %v729_v8 = vld [vmem:[#allocation2 + $0x580] sm:$0xff] }
 0x300   : > { %6099 = vmatmul.mubr.msk.f32.gmra.mxu0 %vm1243_vm14, %v7618_v21  ;;  %7459 = vmatprep.subr.mxu0 %v2752_v9  ;;  %v9936_v58 = vadd.f32 %v7006_v18, %v4403_v13  ;;  %vm1122_vm6 = vcmp.eq.s32.totalorder %v602_v0, %v9975_v52  ;;  %v664_v39 = vld [vmem:[#allocation2 + $0x288] sm:$0xff]  ;;  %vm1121_vm8 = vcmp.eq.s32.totalorder %v601_v6, %v990_v36  ;;  %v728_v9 = vld [vmem:[#allocation2 + $0x5e0] sm:$0xff] }
 0x301   : > { %7503 = vmatprep.subr.mxu1 %v2784_v14  ;;  %6106 = vmatprep.mubr.msk.f32.mxu1 %vm1246_vm15, %v7618_v21  ;;  %v666_v17 = vld [vmem:[#allocation2 + $0x408] sm:$0xff]  ;;  %vm1184_vm9 = vcmp.eq.s32.totalorder %v664_v39, %v9969_v50  ;;  %v730_v14 = vld [vmem:[#allocation2 + $0x150] sm:$0xff]  ;;  %vm1248_vm13 = vcmp.eq.s32.totalorder %v728_v9, %v9969_v50  ;;  %vm1247_vm15 = vcmp.eq.s32.totalorder %v727_v29, %v982_v33 }
 0x302   : > { %7460 = vmatpush3.msra.mxu0 %v2736_v62  ;;  %7504 = vmatpush3.msra.mxu1 %v2768_v26  ;;  %vm1186_vm10 = vcmp.eq.s32.totalorder %v666_v17, %v9975_v52  ;;  %v663_v57 = vld [vmem:[#allocation2 + $0x728] sm:$0xff]  ;;  %vm1250_vm14 = vcmp.eq.s32.totalorder %v730_v14, %v9975_v52 }
 0x303   : > { %7461 = vmatprep.subr.mxu0 %v2751_v31  ;;  %6107 = vmatmul.mubr.msk.f32.gmra.mxu1 %vm1245_vm0, %v7618_v21  ;;  %v665_v13 = vld [vmem:[#allocation2 + $0x188] sm:$0xff]  ;;  %vm1183_vm11 = vcmp.eq.s32.totalorder %v663_v57, %v982_v33  ;;  %vm1249_vm0 = vcmp.eq.s32.totalorder %v729_v8, %v990_v36 }
 0x304   : > { %7505 = vmatprep.subr.mxu1 %v2783_v61  ;;  %7462 = vmatpush3.msra.mxu0 %v2735_v56  ;;  %vm1185_vm12 = vcmp.eq.s32.totalorder %v665_v13, %v990_v36 }
 0x305   : > { %7506 = vmatpush3.msra.mxu1 %v2767_v55  ;;  %7463 = vmatprep.subr.mxu0 %v2750_v49 }
 0x306   : > { %7507 = vmatprep.subr.mxu1 %v2782_v2  ;;  %7464 = vmatpush3.msra.mxu0 %v2734_v63 }
 0x307   : > { %7508 = vmatpush3.msra.mxu1 %v2766_v24  ;;  %7465 = vmatprep.subr.mxu0 %v2749_v38 }
 0x308   : > { %7509 = vmatprep.subr.mxu1 %v2781_v48  ;;  %7466 = vmatpush3.msra.mxu0 %v2733_v4 }
 0x309   : > { %7510 = vmatpush3.msra.mxu1 %v2765_v25  ;;  %7467 = vmatprep.subr.mxu0 %v2748_v27 }
 0x30a   : > { %7511 = vmatprep.subr.mxu1 %v2780_v11  ;;  %7468 = vmatpush3.msra.mxu0 %v2732_v28 }
 0x30b   : > { %7512 = vmatpush3.msra.mxu1 %v2764_v22  ;;  %7469 = vmatprep.subr.mxu0 %v2747_v1 }
 0x30c   : > { %7513 = vmatprep.subr.mxu1 %v2779_v43  ;;  %7470 = vmatpush3.msra.mxu0 %v2731_v44 }
 0x30d   : > { %7514 = vmatpush3.msra.mxu1 %v2763_v7  ;;  %7471 = vmatprep.subr.mxu0 %v2746_v5 }
 0x30e   : > { %7515 = vmatprep.subr.mxu1 %v2778_v30  ;;  %7472 = vmatpush3.msra.mxu0 %v2730_v32  ;;  %v10010_v62 = vpop.f32.mrf.mxu0 }
 0x30f   : > { %7516 = vmatpush3.msra.mxu1 %v2762_v51  ;;  %7473 = vmatprep.subr.mxu0 %v2745_v35 }
 0x310   : > { %7517 = vmatprep.subr.mxu1 %v2777_v12  ;;  %7474 = vmatpush3.msra.mxu0 %v2729_v59  ;;  %v10012_v18 = vpop.f32.mrf.mxu1  ;;  %v10014_v26 = vpop.f32.mrf.mxu0 }
 0x311   : > { %7518 = vmatpush3.msra.mxu1 %v2761_v45  ;;  %7475 = vmatprep.subr.mxu0 %v2744_v47 }
 0x312   : > { %7519 = vmatprep.subr.mxu1 %v2776_v46  ;;  %7476 = vmatpush3.msra.mxu0 %v2728_v10  ;;  %v10016_v31 = vpop.f32.mrf.mxu1 }
 0x313   : > { %7520 = vmatpush3.msra.mxu1 %v2760_v23  ;;  %7477 = vmatprep.subr.mxu0 %v2743_v53 }
 0x314   : > { %7521 = vmatprep.subr.mxu1 %v2775_v54  ;;  %7478 = vmatpush3.msra.mxu0 %v2727_v37  ;;  %v10018_v61 = vpop.f32.mrf.mxu0 }
 0x315   : > { %6108 = vmatprep.mubr.msk.f32.mxu0 %vm1056_vm1, %v7618_v21  ;;  %7522 = vmatpush3.msra.mxu1 %v2759_v20  ;;  %vm5515_vm1 = vcmask 64512  }
 0x316   : > { %6116 = vmatprep.mubr.msk.f32.mxu1 %vm1058_vm2, %v7618_v21  ;;  %6109 = vmatmul.mubr.msk.f32.vlgmr.msra.gmra.mxu0 %vm1055_vm3, %v7618_v21  ;;  %v10022_v55 = vpop.f32.mrf.mxu0 }
 0x317   : > { %6117 = vmatmul.mubr.msk.f32.vlgmr.msra.gmra.mxu1 %vm1057_vm4, %v7618_v21  ;;  %6110 = vmatprep.mubr.msk.f32.mxu0 %vm1120_vm5, %v7618_v21  ;;  %v10020_v56 = vpop.f32.mrf.mxu1 }
 0x318   : > { %6118 = vmatprep.mubr.msk.f32.mxu1 %vm1122_vm6, %v7618_v21 }
 0x319   : > { %v10024_v49 = vpop.f32.mrf.mxu1 }
 0x31a   : > { %6111 = vmatmul.mubr.msk.f32.gmra.mxu0 %vm1119_vm7, %v7618_v21  ;;  %v10026_v2 = vpop.f32.mrf.mxu0 }
 0x31b   : > { %6119 = vmatmul.mubr.msk.f32.gmra.mxu1 %vm1121_vm8, %v7618_v21  ;;  %6112 = vmatprep.mubr.msk.f32.mxu0 %vm1184_vm9, %v7618_v21 }
 0x31c   : > { %6120 = vmatprep.mubr.msk.f32.mxu1 %vm1186_vm10, %v7618_v21 }
 0x31d   : > { %v10028_v63 = vpop.f32.mrf.mxu1 }
 0x31e   : > { %6113 = vmatmul.mubr.msk.f32.gmra.mxu0 %vm1183_vm11, %v7618_v21 }
 0x31f   : > { %6121 = vmatmul.mubr.msk.f32.gmra.mxu1 %vm1185_vm12, %v7618_v21  ;;  %6114 = vmatprep.mubr.msk.f32.mxu0 %vm1248_vm13, %v7618_v21  ;;  %v10032_v24 = vpop.f32.mrf.mxu1 }
 0x320   : > { %6122 = vmatprep.mubr.msk.f32.mxu1 %vm1250_vm14, %v7618_v21 }
 0x322   : > { %6115 = vmatmul.mubr.msk.f32.gmra.mxu0 %vm1247_vm15, %v7618_v21 }
 0x323   : > { %6123 = vmatmul.mubr.msk.f32.gmra.mxu1 %vm1249_vm0, %v7618_v21  ;;  %v10030_v21 = vpop.f32.mrf.mxu0  ;;  %v10036_v48 = vpop.f32.mrf.mxu1 }
 0x325   : > { %v10034_v38 = vpop.f32.mrf.mxu0  ;;  %v10040_v25 = vpop.f32.mrf.mxu1 }
 0x327   : > { %v10038_v4 = vpop.f32.mrf.mxu0 }
 0x336   : > { %v7127_v27 = vpop.f32.mrf.mxu0 }
 0x338   : > { %v10042_v11 = vpop.f32.mrf.mxu1  ;;  %v7128_v28 = vpop.f32.mrf.mxu0 }
 0x33a   : > { %v7172_v22 = vpop.f32.mrf.mxu1 }
 0x33c   : > { %v7130_v1 = vpop.f32.mrf.mxu0 }
 0x33e   : > { %v7131_v44 = vpop.f32.mrf.mxu0 }
 0x33f   : > { %v10044_v43 = vpop.f32.mrf.mxu1 }
 0x341   : > { %v10046_v7 = vpop.f32.mrf.mxu1 }
 0x342   : > { %v10048_v5 = vpop.f32.mrf.mxu0 }
 0x344   : > { %v10052_v32 = vpop.f32.mrf.mxu0 }
 0x345   : > { %v10050_v30 = vpop.f32.mrf.mxu1 }
 0x347   : > { %v10054_v51 = vpop.f32.mrf.mxu1 }
 0x348   : > { %v10056_v35 = vpop.f32.mrf.mxu0 }
 0x34a   : > { %v10060_v59 = vpop.f32.mrf.mxu0 }
 0x34b   : > { %v10058_v12 = vpop.f32.mrf.mxu1 }
 0x34d   : > { %v10062_v45 = vpop.f32.mrf.mxu1 }
 0x35e   : > { %v7215_v47 = vpop.f32.mrf.mxu0 }
 0x360   : > { %v10064_v50 = vpop.f32.mrf.mxu1  ;;  %v7216_v46 = vpop.f32.mrf.mxu0 }
 0x362   : > { %v10066_v10 = vpop.f32.mrf.mxu1 }
 0x364   : > { %v10068_v3 = vpop.f32.mrf.mxu0 }
 0x366   : > { %v7219_v23 = vpop.f32.mrf.mxu0 }
 0x367   : > { %v10070_v52 = vpop.f32.mrf.mxu1 }
 0x369   : > { %v10072_v53 = vpop.f32.mrf.mxu1 }
 0x36a   : > { %v10074_v40 = vpop.f32.mrf.mxu0 }
 0x36c   : > { %v10078_v36 = vpop.f32.mrf.mxu0 }
 0x36d   : > { %v10076_v33 = vpop.f32.mrf.mxu1 }
 0x36f   : > { %v10080_v54 = vpop.f32.mrf.mxu1 }
 0x370   : > { %10224 = vst [vmem:[#allocation3_spill] sm:$0xff] %v10080_v54  ;;  %v10082_v60 = vpop.f32.mrf.mxu0 }
 0x371   : > { %10225 = vst [vmem:[#allocation4_spill] sm:$0xff] %v10082_v60 }
 0x372   : > { %v10086_v37 = vpop.f32.mrf.mxu0 }
 0x373   : > { %v10084_v16 = vpop.f32.mrf.mxu1  ;;  %10227 = vst [vmem:[#allocation6_spill] sm:$0xff] %v10086_v37 }
 0x374   : > { %10226 = vst [vmem:[#allocation5_spill] sm:$0xff] %v10084_v16 }
 0x375   : > { %v10088_v19 = vpop.f32.mrf.mxu1 }
 0x376   : > { %10228 = vst [vmem:[#allocation7_spill] sm:$0xff] %v10088_v19 }
 0x386   : > { %v7303_v0 = vpop.f32.mrf.mxu0 }
 0x388   : > { %v10090_v20 = vpop.f32.mrf.mxu1  ;;  %v7304_v34 = vpop.f32.mrf.mxu0 }
 0x38a   : > { %v10092_v6 = vpop.f32.mrf.mxu1 }
 0x38c   : > { %v10094_v39 = vpop.f32.mrf.mxu0 }
 0x38e   : > { %v10098_v57 = vpop.f32.mrf.mxu0 }
 0x38f   : > { %v10096_v17 = vpop.f32.mrf.mxu1 }
 0x390   : > { %10229 = vst [vmem:[#allocation8_spill] sm:$0xff] %v10096_v17 }
 0x391   : > { %v10100_v13 = vpop.f32.mrf.mxu1 }
 0x392   : > { %10230 = vst [vmem:[#allocation9_spill] sm:$0xff] %v10100_v13  ;;  %v10102_v9 = vpop.f32.mrf.mxu0  ;;  %v7041_v13 = vadd.f32 %v10014_v26, %v10010_v62 }
 0x393   : > { %10231 = vst [vmem:[#allocation10_spill] sm:$0xff] %v10102_v9 }
 0x394   : > { %v10106_v29 = vpop.f32.mrf.mxu0 }
 0x395   : > { %v10104_v14 = vpop.f32.mrf.mxu1  ;;  %10233 = vst [vmem:[#allocation12_spill] sm:$0xff] %v10106_v29  ;;  %v4558_v29 = vadd.f32 %v7041_v13, %v9862_v41  ;;  %v7088_v41 = vadd.f32 %v10024_v49, %v10020_v56  ;;  %v7135_v56 = vadd.f32 %v10052_v32, %v10048_v5  ;;  %v7179_v32 = vadd.f32 %v10054_v51, %v10050_v30 }
 0x396   : > { %10232 = vst [vmem:[#allocation11_spill] sm:$0xff] %v10104_v14  ;;  %v7182_v30 = vadd.f32 %v10062_v45, %v10058_v12 }
 0x397   : > { %v10108_v8 = vpop.f32.mrf.mxu1 }
 0x398   : > { %10234 = vst [vmem:[#allocation13_spill] sm:$0xff] %v10108_v8  ;;  %v10110_v19 = vpop.f32.mrf.mxu0 }
 0x399   : > { %10235 = vst [vmem:[#allocation14_spill] sm:$0xff] %v10110_v19  ;;  %v7085_v19 = vadd.f32 %v10016_v31, %v10012_v18  ;;  %v7173_v18 = vadd.f32 %v7172_v22, %v10042_v11  ;;  %v7132_v31 = vadd.f32 %v7131_v44, %v7130_v1  ;;  %v7176_v11 = vadd.f32 %v10046_v7, %v10044_v43 }
 0x39a   : > { %v10114_v37 = vpop.f32.mrf.mxu0  ;;  %v7261_v1 = vadd.f32 %v10066_v10, %v10064_v50  ;;  %v7220_v44 = vadd.f32 %v7219_v23, %v10068_v3  ;;  %v7138_v43 = vadd.f32 %v10060_v59, %v10056_v35  ;;  %v7305_v7 = vadd.f32 %v7304_v34, %v7303_v0  ;;  %v10242_v0 = vld [vmem:[#allocation6_spill] sm:$0xff] }
 0x39b   : > { %v10112_v16 = vpop.f32.mrf.mxu1  ;;  %10237 = vst [vmem:[#allocation16_spill] sm:$0xff] %v10114_v37  ;;  %v7129_v37 = vadd.f32 %v7128_v28, %v7127_v27  ;;  %v4643_v62 = vadd.f32 %v7085_v19, %v4558_v29  ;;  %v7264_v50 = vadd.f32 %v10072_v53, %v10070_v52  ;;  %v7349_v35 = vadd.f32 %v10092_v6, %v10090_v20  ;;  %v10241_v19 = vld [vmem:[#allocation4_spill] sm:$0xff]  ;;  %v10243_v12 = vld [vmem:[#allocation10_spill] sm:$0xff] }
 0x39c   : > { %10236 = vst [vmem:[#allocation15_spill] sm:$0xff] %v10112_v16  ;;  %v7044_v16 = vadd.f32 %v10022_v55, %v10018_v61  ;;  %v7091_v55 = vadd.f32 %v10032_v24, %v10028_v63  ;;  %v7094_v63 = vadd.f32 %v10040_v25, %v10036_v48  ;;  %v7223_v48 = vadd.f32 %v10078_v36, %v10074_v40  ;;  %v10240_v40 = vld [vmem:[#allocation3_spill] sm:$0xff]  ;;  %v10244_v45 = vld [vmem:[#allocation12_spill] sm:$0xff] }
 0x39d   : > { %v10116_v60 = vpop.f32.mrf.mxu1  ;;  %v4728_v13 = vadd.f32 %v7129_v37, %v4643_v62  ;;  %v7308_v59 = vadd.f32 %v10098_v57, %v10094_v39  ;;  %v7267_v36 = vadd.f32 %v10240_v40, %v10076_v33  ;;  %v7226_v34 = vadd.f32 %v10242_v0, %v10241_v19  ;;  %v10245_v6 = vld [vmem:[#allocation8_spill] sm:$0xff]  ;;  %v10248_v33 = vld [vmem:[#allocation7_spill] sm:$0xff] }
 0x39e   : > { %10238 = vst [vmem:[#allocation17_spill] sm:$0xff] %v10116_v60  ;;  %v7047_v60 = vadd.f32 %v10030_v21, %v10026_v2  ;;  %v4563_v26 = vadd.f32 %v7044_v16, %v9890_v15  ;;  %v7050_v2 = vadd.f32 %v10038_v4, %v10034_v38  ;;  %v7217_v15 = vadd.f32 %v7216_v46, %v7215_v47 }
 0x39f   : > { %v4813_v49 = vadd.f32 %v7173_v18, %v4728_v13  ;;  %v10246_v18 = vld [vmem:[#allocation9_spill] sm:$0xff] }
 0x3a0   : > { %v4568_v61 = vadd.f32 %v7047_v60, %v9915_v42  ;;  %v4648_v28 = vadd.f32 %v7088_v41, %v4563_v26  ;;  %v4573_v22 = vadd.f32 %v7050_v2, %v9936_v58  ;;  %v7311_v41 = vadd.f32 %v10244_v45, %v10243_v12 }
 0x3a1   : > { %v4898_v4 = vadd.f32 %v7217_v15, %v4813_v49  ;;  %v7352_v39 = vadd.f32 %v10246_v18, %v10245_v6 }
 0x3a2   : > { %v4733_v16 = vadd.f32 %v7132_v31, %v4648_v28  ;;  %v4653_v42 = vadd.f32 %v7091_v55, %v4568_v61  ;;  %v4658_v47 = vadd.f32 %v7094_v63, %v4573_v22  ;;  %v10247_v61 = vld [vmem:[#allocation5_spill] sm:$0xff] }
 0x3a3   : > { %v4983_v60 = vadd.f32 %v7261_v1, %v4898_v4  ;;  %v7270_v55 = vadd.f32 %v10248_v33, %v10247_v61  ;;  %v10252_v1 = vld [vmem:[#allocation14_spill] sm:$0xff]  ;;  %v1765_v33 = vld [vmem:[%s7675_s27 + $0x10] sm:$0xff] }
 0x3a4   : > { %v4738_v5 = vadd.f32 %v7135_v56, %v4653_v42  ;;  %v4818_v58 = vadd.f32 %v7176_v11, %v4733_v16  ;;  %v4743_v3 = vadd.f32 %v7138_v43, %v4658_v47  ;;  %v10250_v16 = vld [vmem:[#allocation11_spill] sm:$0xff]  ;;  %v10251_v11 = vld [vmem:[#allocation13_spill] sm:$0xff] }
 0x3a5   : > { %v5068_v51 = vadd.f32 %v7305_v7, %v4983_v60  ;;  %v7355_v42 = vadd.f32 %v10251_v11, %v10250_v16 }
 0x3a6   : > { %v4903_v37 = vadd.f32 %v7220_v44, %v4818_v58  ;;  %v4823_v10 = vadd.f32 %v7179_v32, %v4738_v5  ;;  %v4828_v26 = vadd.f32 %v7182_v30, %v4743_v3  ;;  %v10253_v44 = vld [vmem:[#allocation16_spill] sm:$0xff]  ;;  %v10255_v3 = vld [vmem:[#allocation17_spill] sm:$0xff] }
 0x3a7   : > { %v5153_v13 = vadd.f32 %v7349_v35, %v5068_v51  ;;  %v7314_v5 = vadd.f32 %v10253_v44, %v10252_v1 }
 0x3a8   : > { %v4908_v23 = vadd.f32 %v7223_v48, %v4823_v10  ;;  %v4988_v29 = vadd.f32 %v7264_v50, %v4903_v37  ;;  %v4913_v31 = vadd.f32 %v7226_v34, %v4828_v26  ;;  %v10254_v10 = vld [vmem:[#allocation15_spill] sm:$0xff] }
 0x3a9   : > { %v7358_v30 = vadd.f32 %v10255_v3, %v10254_v10 }
 0x3aa   : > { %v5073_v20 = vadd.f32 %v7308_v59, %v4988_v29  ;;  %v4993_v57 = vadd.f32 %v7267_v36, %v4908_v23  ;;  %v4998_v32 = vadd.f32 %v7270_v55, %v4913_v31 }
 0x3ac   : > { %v5078_v49 = vadd.f32 %v7311_v41, %v4993_v57  ;;  %v5158_v4 = vadd.f32 %v7352_v39, %v5073_v20  ;;  %v5083_v50 = vadd.f32 %v7314_v5, %v4998_v32  ;;  %v1764_v41 = vld [vmem:[%s7675_s27 + $0x8] sm:$0xff] }
 0x3ae   : > { %v7391_v17 = vpop.f32.mrf.mxu0  ;;  %v5168_v29 = vadd.f32 %v7358_v30, %v5083_v50 }
 0x3b0   : > { %v10118_v54 = vpop.f32.mrf.mxu1  ;;  %v7392_v9 = vpop.f32.mrf.mxu0 }
 0x3b1   : > { %10239 = vst [vmem:[#allocation18_spill] sm:$0xff] %v10118_v54  ;;  %v7393_v62 = vadd.f32 %v7392_v9, %v7391_v17 }
 0x3b2   : > { %v10122_v14 = vpop.f32.mrf.mxu1 }
 0x3b3   : > { %v5238_v15 = vadd.f32 %v7393_v62, %v5153_v13 }
 0x3b4   : > { %v10131_v8 = vpop.f32.mrf.mxu0 }
 0x3b6   : > { %v7395_v21 = vpop.f32.mrf.mxu0 }
 0x3b7   : > { %v10133_v54 = vpop.f32.mrf.mxu1  ;;  %v7396_v9 = vadd.f32 %v7395_v21, %v10131_v8  ;;  %v5163_v21 = vadd.f32 %v7355_v42, %v5078_v49  ;;  %v1766_v49 = vld [vmem:[%s7675_s27 + $0x18] sm:$0xff] }
 0x3b8   : > { %v10249_v56 = vld [vmem:[#allocation18_spill] sm:$0xff] }
 0x3b9   : > { %v10144_v27 = vpop.f32.mrf.mxu1  ;;  %v7437_v17 = vadd.f32 %v10122_v14, %v10249_v56  ;;  %v5243_v48 = vadd.f32 %v7396_v9, %v5158_v4 }
 0x3ba   : > { %v7397_v24 = vpop.f32.mrf.mxu0  ;;  %v7440_v14 = vadd.f32 %v10144_v27, %v10133_v54 }
 0x3bb   : > { %v5323_v47 = vadd.f32 %v7437_v17, %v5238_v15 }
 0x3bc   : > { %v7398_v25 = vpop.f32.mrf.mxu0  ;;  %v5328_v36 = vadd.f32 %v7440_v14, %v5243_v48 }
 0x3bd   : > { %v10153_v38 = vpop.f32.mrf.mxu1  ;;  %v7399_v43 = vadd.f32 %v7398_v25, %v7397_v24  ;;  %v1763_v25 = vld [vmem:[%s7675_s27] sm:$0xff] }
 0x3bf   : > { %v7442_v46 = vpop.f32.mrf.mxu1  ;;  %v5248_v59 = vadd.f32 %v7399_v43, %v5163_v21 }
 0x3c0   : > { %v7400_v52 = vpop.f32.mrf.mxu0  ;;  %v7443_v24 = vadd.f32 %v7442_v46, %v10153_v38 }
 0x3c2   : > { %v7401_v2 = vpop.f32.mrf.mxu0  ;;  %v5333_v45 = vadd.f32 %v7443_v24, %v5248_v59 }
 0x3c3   : > { %v7444_v53 = vpop.f32.mrf.mxu1  ;;  %v7402_v19 = vadd.f32 %v7401_v2, %v7400_v52 }
 0x3c5   : > { %v7445_v28 = vpop.f32.mrf.mxu1  ;;  %v5253_v13 = vadd.f32 %v7402_v19, %v5168_v29 }
 0x3c6   : > { %v7446_v20 = vadd.f32 %v7445_v28, %v7444_v53 }
 0x3c8   : > { %v5338_v15 = vadd.f32 %v7446_v20, %v5253_v13 }
 0x3d6   : > { %v7479_v22 = vpop.f32.mrf.mxu0 }
 0x3d7   : > { %v7523_v63 = vpop.f32.mrf.mxu1 }
 0x3d8   : > { %v7480_v58 = vpop.f32.mrf.mxu0 }
 0x3d9   : > { %v7524_v7 = vpop.f32.mrf.mxu1  ;;  %v7481_v8 = vadd.f32 %v7480_v58, %v7479_v22 }
 0x3da   : > { %v7482_v60 = vpop.f32.mrf.mxu0  ;;  %v7525_v35 = vadd.f32 %v7524_v7, %v7523_v63 }
 0x3db   : > { %v7526_v37 = vpop.f32.mrf.mxu1  ;;  %v5408_v51 = vadd.f32 %v7481_v8, %v5323_v47 }
 0x3dc   : > { %v7483_v23 = vpop.f32.mrf.mxu0 }
 0x3dd   : > { %v7527_v40 = vpop.f32.mrf.mxu1  ;;  %v5493_v54 = vadd.f32 %v7525_v35, %v5408_v51  ;;  %v7484_v27 = vadd.f32 %v7483_v23, %v7482_v60 }
 0x3de   : > { %v7485_v0 = vpop.f32.mrf.mxu0  ;;  %v7528_v12 = vadd.f32 %v7527_v40, %v7526_v37 }
 0x3df   : > { %v7529_v34 = vpop.f32.mrf.mxu1  ;;  %v5511_v62 = vadd.f32 %v5493_v54, %v1763_v25  ;;  %v5413_v26 = vadd.f32 %v7484_v27, %v5328_v36 }
 0x3e0   : > { %v7486_v38 = vpop.f32.mrf.mxu0 }
 0x3e1   : > { %v7530_v46 = vpop.f32.mrf.mxu1  ;;  %5516 = vst.msk [vmem:[%s7675_s27] sm:$0xff] %vm5515_vm1, %v5511_v62  ;;  %v5498_v52 = vadd.f32 %v7528_v12, %v5413_v26  ;;  %v7487_v6 = vadd.f32 %v7486_v38, %v7485_v0 }
 0x3e2   : > { %v7488_v18 = vpop.f32.mrf.mxu0  ;;  %v7531_v61 = vadd.f32 %v7530_v46, %v7529_v34 }
 0x3e3   : > { %v7532_v39 = vpop.f32.mrf.mxu1  ;;  %v5512_v57 = vadd.f32 %v5498_v52, %v1764_v41  ;;  %v5418_v31 = vadd.f32 %v7487_v6, %v5333_v45 }
 0x3e4   : > { %v7489_v55 = vpop.f32.mrf.mxu0 }
 0x3e5   : > { %v7533_v2 = vpop.f32.mrf.mxu1  ;;  %5517 = vst.msk [vmem:[%s7675_s27 + $0x8] sm:$0xff] %vm5515_vm1, %v5512_v57  ;;  %v5503_v56 = vadd.f32 %v7531_v61, %v5418_v31  ;;  %v7490_v53 = vadd.f32 %v7489_v55, %v7488_v18 }
 0x3e6   : > { %v7534_v9 = vadd.f32 %v7533_v2, %v7532_v39 }
 0x3e7   : > { %v5513_v28 = vadd.f32 %v5503_v56, %v1765_v33  ;;  %v5423_v17 = vadd.f32 %v7490_v53, %v5338_v15 }
 0x3e9   : > { %5518 = vst.msk [vmem:[%s7675_s27 + $0x10] sm:$0xff] %vm5515_vm1, %v5513_v28  ;;  %v5508_v16 = vadd.f32 %v7534_v9, %v5423_v17 }
 0x3eb   : > { %v5514_v11 = vadd.f32 %v5508_v16, %v1766_v49 }
 0x3ed   : > { %5519 = vst.msk [vmem:[%s7675_s27 + $0x18] sm:$0xff] %vm5515_vm1, %v5514_v11 }
 0x3ee PF: > { %s12_s13 = sadd.s32 1, %s7615_s13   ;;  %s10256_s9 = smov %s7607_s11 }
 0x3ef   : > { %p9_p9 = scmp.ge.s32.totalorder %s12_s13, 10   ;;  %s10257_s10 = smov %s7611_s12 }
 0x3f0   : > { %s10258_s11 = smov %s10261_s14  ;;  %s10259_s12 = smov %s10265_s15 }
 0x3f1   :  { %11 = sbr.rel (!%p9_p9) target bundleno = 3 (0x3), region = 65 }

</bundles_post_ra>
